<compile_context>
chip_gen: v7x
topology: tpu7x:2x2x1
jax: 0.10.0
libtpu: 0.0.40
codegen_flags: <defaults>
</compile_context>

<pallas_src>
import numpy as np
import jax
import jax.numpy as jnp
from jax.experimental import pallas as pl
from jax.experimental.pallas import tpu as pltpu

# ----------------------------------------------------------------------------
# Small-model config (stands in for model_cfg of PVTNetV2)
# ----------------------------------------------------------------------------
CFG = dict(
    FEATURE_SIZE=16,
    PATCH_SIZE=4,
    EMBED_DIM=[8, 16],
    NUM_HEADS=[1, 2],
    MLP_RATIOS=[2, 2],
    DEPTHS=[1, 1],
    SR_RATIOS=[2, 1],   # TODO(synk): smat cfg does not expose sr_ratios; PVTv2 default [8,4,..] is too large for 4x4 tokens, using [2,1]
    RESHAPE=True,
)
IN_CHANNELS = 4
LN_EPS = 1e-6


# ----------------------------------------------------------------------------
# In-kernel math helpers (pure jnp, traced inside Pallas kernels)
# ----------------------------------------------------------------------------
def _ln(x, g, b):
    mean = jnp.mean(x, axis=-1, keepdims=True)
    var = jnp.mean(jnp.square(x - mean), axis=-1, keepdims=True)
    return (x - mean) * jax.lax.rsqrt(var + LN_EPS) * g + b


def _erf(x):
    # TODO(synk): lax.erf lowering inside Mosaic is not guaranteed; use the
    # Abramowitz & Stegun 7.1.26 rational approximation (|abs err| <= 1.5e-7,
    # i.e. at f32 rounding level) so exact-GELU semantics are preserved in-kernel.
    ax = jnp.abs(x)
    t = 1.0 / (1.0 + 0.3275911 * ax)
    poly = t * (0.254829592 + t * (-0.284496736 + t * (1.421413741
               + t * (-1.453152027 + t * 1.061405429))))
    y = 1.0 - poly * jnp.exp(-ax * ax)
    return jnp.where(x >= 0, y, -y)


def _gelu_exact(x):
    return 0.5 * x * (1.0 + _erf(x * 0.7071067811865476))


# ----------------------------------------------------------------------------
# Fused patch-embed kernel: (im2col patches) @ W + b, then LayerNorm
# ----------------------------------------------------------------------------
def _patch_embed_kernel(pat_ref, w_ref, b_ref, g_ref, beta_ref, o_ref):
    x = jnp.dot(pat_ref[...], w_ref[...], preferred_element_type=jnp.float32) + b_ref[...]
    o_ref[...] = _ln(x, g_ref[...], beta_ref[...])


def pallas_patch_embed(patches, w, b, g, beta, nsplit):
    M, K = patches.shape
    C = w.shape[1]
    T = M // nsplit
    return pl.pallas_call(
        _patch_embed_kernel,
        grid=(nsplit,),
        in_specs=[pl.BlockSpec((T, K), lambda i: (i, 0)),
                  pl.BlockSpec((K, C), lambda i: (0, 0)),
                  pl.BlockSpec((1, C), lambda i: (0, 0)),
                  pl.BlockSpec((1, C), lambda i: (0, 0)),
                  pl.BlockSpec((1, C), lambda i: (0, 0))],
        out_specs=pl.BlockSpec((T, C), lambda i: (i, 0)),
        out_shape=jax.ShapeDtypeStruct((M, C), jnp.float32),
        compiler_params=pltpu.CompilerParams(dimension_semantics=("parallel",)),
    )(patches, w, b, g, beta)


# ----------------------------------------------------------------------------
# Fully fused transformer block kernel
# ----------------------------------------------------------------------------
def _make_block_kernel(*, T, Tk, C, heads, hidden, sr, final_ln):
    dh = C // heads
    scale = dh ** -0.5

    def kernel(*refs):
        pos = [0]

        def nxt():
            r = refs[pos[0]]
            pos[0] += 1
            return r

        tok_ref, amask_ref, sdw_ref = nxt(), nxt(), nxt()
        if sr > 1:
            gsr_ref, srw_ref, srb_ref, srg_ref, srbeta_ref = nxt(), nxt(), nxt(), nxt(), nxt()
        ln1g_ref, ln1b_ref = nxt(), nxt()
        qw_ref, kw_ref, vw_ref, pw_ref, pb_ref = nxt(), nxt(), nxt(), nxt(), nxt()
        ln2g_ref, ln2b_ref = nxt(), nxt()
        fc1w_ref, fc1b_ref = nxt(), nxt()
        dww_ref, dwb_ref = nxt(), nxt()
        fc2w_ref, fc2b_ref = nxt(), nxt()
        if final_ln:
            flng_ref, flnb_ref = nxt(), nxt()
        out_ref = nxt()

        tok = tok_ref[...]                                  # (T, C)
        # ---- attention branch ----
        h = _ln(tok, ln1g_ref[...], ln1b_ref[...])

        if sr > 1:
            # spatial-reduction conv (sr x sr, stride sr) as gather-matmuls
            xr = jnp.zeros((Tk, C), jnp.float32)
            for kk in range(sr * sr):
                gath = jnp.dot(gsr_ref[kk], h, preferred_element_type=jnp.float32)
                xr = xr + jnp.dot(gath, srw_ref[kk], preferred_element_type=jnp.float32)
            xr = xr + srb_ref[...]
            xkv = _ln(xr, srg_ref[...], srbeta_ref[...])
        else:
            xkv = h                                         # Tk == T

        amask = amask_ref[...]                              # (T, Tk) block-diagonal mask
        attn_out = jnp.zeros((T, C), jnp.float32)
        for hh in range(heads):
            qh = jnp.dot(h, qw_ref[hh], preferred_element_type=jnp.float32)      # (T, dh)
            kh = jnp.dot(xkv, kw_ref[hh], preferred_element_type=jnp.float32)    # (Tk, dh)
            vh = jnp.dot(xkv, vw_ref[hh], preferred_element_type=jnp.float32)    # (Tk, dh)
            s = jax.lax.dot_general(qh, kh, (((1,), (1,)), ((), ())),
                                    preferred_element_type=jnp.float32) * scale + amask
            s = s - jnp.max(s, axis=-1, keepdims=True)
            e = jnp.exp(s)
            p = e * pl.reciprocal(jnp.sum(e, axis=-1, keepdims=True), approx=True)
            ctx = jnp.dot(p, vh, preferred_element_type=jnp.float32)             # (T, dh)
            attn_out = attn_out + jnp.dot(ctx, pw_ref[hh],
                                          preferred_element_type=jnp.float32)
        tok = tok + attn_out + pb_ref[...]

        # ---- MLP branch: fc1 -> 3x3 depthwise conv -> GELU -> fc2 ----
        h2 = _ln(tok, ln2g_ref[...], ln2b_ref[...])
        h1 = jnp.dot(h2, fc1w_ref[...], preferred_element_type=jnp.float32) + fc1b_ref[...]
        dww = dww_ref[...]                                   # (9, hidden)
        dwacc = jnp.zeros((T, hidden), jnp.float32)
        for kk in range(9):
            shifted = jnp.dot(sdw_ref[kk], h1, preferred_element_type=jnp.float32)
            dwacc = dwacc + shifted * dww[kk:kk + 1, :]
        dwacc = dwacc + dwb_ref[...]
        g = _gelu_exact(dwacc)
        tok = tok + jnp.dot(g, fc2w_ref[...], preferred_element_type=jnp.float32) + fc2b_ref[...]

        if final_ln:
            tok = _ln(tok, flng_ref[...], flnb_ref[...])
        out_ref[...] = tok

    return kernel


def pallas_block(tokens, bp, stage_params, consts, *, C, heads, hidden, sr, nsplit, final_ln):
    BT = tokens.shape[0]
    T = BT // nsplit
    dh = C // heads
    amask, sdw, gsr = consts
    Tk = amask.shape[1]

    # Per-head weight stacks (tiny JAX-side reshapes; indexed on the leading ref axis
    # inside the kernel so no lane slicing is needed).
    q_w = bp["q_w"].reshape(C, heads, dh).transpose(1, 0, 2)           # (heads, C, dh)
    k_w = bp["kv_w"][:, :C].reshape(C, heads, dh).transpose(1, 0, 2)   # (heads, C, dh)
    v_w = bp["kv_w"][:, C:].reshape(C, heads, dh).transpose(1, 0, 2)   # (heads, C, dh)
    p_w = bp["proj_w"].reshape(heads, dh, C)                           # (heads, dh, C)

    args = [tokens, amask, sdw]
    if sr > 1:
        srw = bp["sr_w"].reshape(sr * sr, C, C)
        args += [gsr, srw, bp["sr_b"], bp["sr_ln_g"], bp["sr_ln_b"]]
    args += [bp["ln1_g"], bp["ln1_b"],
             q_w, k_w, v_w, p_w, bp["proj_b"],
             bp["ln2_g"], bp["ln2_b"],
             bp["fc1_w"], bp["fc1_b"],
             bp["dw_w"], bp["dw_b"],
             bp["fc2_w"], bp["fc2_b"]]
    if final_ln:
        args += [stage_params["norm_g"], stage_params["norm_b"]]

    def full_spec(a):
        return pl.BlockSpec(a.shape, lambda i, nd=a.ndim: (0,) * nd)

    in_specs = [pl.BlockSpec((T, C), lambda i: (i, 0))] + [full_spec(a) for a in args[1:]]

    kernel = _make_block_kernel(T=T, Tk=Tk, C=C, heads=heads, hidden=hidden,
                                sr=sr, final_ln=final_ln)
    return pl.pallas_call(
        kernel,
        grid=(nsplit,),
        in_specs=in_specs,
        out_specs=pl.BlockSpec((T, C), lambda i: (i, 0)),
        out_shape=jax.ShapeDtypeStruct((BT, C), jnp.float32),
        compiler_params=pltpu.CompilerParams(dimension_semantics=("parallel",)),
    )(*args)


# ----------------------------------------------------------------------------
# Glue: im2col for the (overlapping) patch-embed convs only
# ----------------------------------------------------------------------------
def im2col(x_nhwc, kh, kw, stride, pad):
    """Returns (B, Ho, Wo, kh*kw, C) patches."""
    B, H, W, C = x_nhwc.shape
    xp = jnp.pad(x_nhwc, ((0, 0), (pad, pad), (pad, pad), (0, 0)))
    Ho = (H + 2 * pad - kh) // stride + 1
    Wo = (W + 2 * pad - kw) // stride + 1
    cols = []
    for i in range(kh):
        for j in range(kw):
            cols.append(xp[:, i:i + stride * Ho:stride, j:j + stride * Wo:stride, :])
    patches = jnp.stack(cols, axis=3)  # (B, Ho, Wo, kh*kw, C)
    return patches, Ho, Wo


# ----------------------------------------------------------------------------
# Compile-time constants: depthwise-conv shift matrices, SR gather matrices,
# block-diagonal attention mask (batch folded into the token axis).
# ----------------------------------------------------------------------------
def _build_stage_consts(Bs, H, W, sr):
    N = H * W
    T = Bs * N
    sdw = np.zeros((9, T, T), np.float32)     # 3x3 dw-conv, zero padding baked in
    for ki in range(3):
        for kj in range(3):
            k = ki * 3 + kj
            for b in range(Bs):
                for i in range(H):
                    for j in range(W):
                        ii, jj = i + ki - 1, j + kj - 1
                        if 0 <= ii < H and 0 <= jj < W:
                            sdw[k, b * N + i * W + j, b * N + ii * W + jj] = 1.0
    if sr > 1:
        Hs, Ws = H // sr, W // sr
        Mk = Hs * Ws
        gsr = np.zeros((sr * sr, Bs * Mk, T), np.float32)
        for ki in range(sr):
            for kj in range(sr):
                k = ki * sr + kj
                for b in range(Bs):
                    for hs in range(Hs):
                        for ws in range(Ws):
                            gsr[k, b * Mk + hs * Ws + ws,
                                b * N + (hs * sr + ki) * W + (ws * sr + kj)] = 1.0
        gsr = jnp.asarray(gsr)
    else:
        Mk = N
        gsr = None
    amask = np.full((T, Bs * Mk), -1e30, np.float32)
    for b in range(Bs):
        amask[b * N:(b + 1) * N, b * Mk:(b + 1) * Mk] = 0.0
    return jnp.asarray(amask), jnp.asarray(sdw), gsr


# ----------------------------------------------------------------------------
# Parameter construction (deterministic, synthetic — mirrors PVTv2 __init__ shapes)
# ----------------------------------------------------------------------------
def _w(key, shape, scale=0.02):
    return scale * jax.random.normal(key, shape, dtype=jnp.float32)


def init_params(key, in_channels, cfg):
    embed_dims = cfg["EMBED_DIM"]
    mlps = cfg["MLP_RATIOS"]
    depths = cfg["DEPTHS"]
    srs = cfg["SR_RATIOS"]
    stages = []
    cin = in_channels
    for s, C in enumerate(embed_dims):
        k = 7 if s == 0 else 3
        keys = iter(jax.random.split(key, 64 * (s + 1))[-64:])
        sp = dict(
            pe_w=_w(next(keys), (k * k * cin, C)),
            pe_b=jnp.zeros((1, C), jnp.float32),
            pe_ln_g=jnp.ones((1, C), jnp.float32),
            pe_ln_b=jnp.zeros((1, C), jnp.float32),
            norm_g=jnp.ones((1, C), jnp.float32),
            norm_b=jnp.zeros((1, C), jnp.float32),
            blocks=[],
        )
        hidden = C * mlps[s]
        sr = srs[s]
        for _ in range(depths[s]):
            bp = dict(
                ln1_g=jnp.ones((1, C), jnp.float32), ln1_b=jnp.zeros((1, C), jnp.float32),
                q_w=_w(next(keys), (C, C)),                       # qkv_bias=False in PVTv2 default
                kv_w=_w(next(keys), (C, 2 * C)),
                proj_w=_w(next(keys), (C, C)), proj_b=jnp.zeros((1, C), jnp.float32),
                ln2_g=jnp.ones((1, C), jnp.float32), ln2_b=jnp.zeros((1, C), jnp.float32),
                fc1_w=_w(next(keys), (C, hidden)), fc1_b=jnp.zeros((1, hidden), jnp.float32),
                dw_w=_w(next(keys), (9, hidden)), dw_b=jnp.zeros((1, hidden), jnp.float32),
                fc2_w=_w(next(keys), (hidden, C)), fc2_b=jnp.zeros((1, C), jnp.float32),
            )
            if sr > 1:
                bp.update(
                    sr_w=_w(next(keys), (sr * sr * C, C)),
                    sr_b=jnp.zeros((1, C), jnp.float32),
                    sr_ln_g=jnp.ones((1, C), jnp.float32),
                    sr_ln_b=jnp.zeros((1, C), jnp.float32),
                )
            sp["blocks"].append(bp)
        stages.append(sp)
        cin = C
        key = jax.random.fold_in(key, s + 1)
    return dict(stages=stages)


# ----------------------------------------------------------------------------
# PVTv2 forward (one backbone call on the concatenated batch)
# ----------------------------------------------------------------------------
def pvt_backbone_forward(params, x_nhwc, cfg):
    B = x_nhwc.shape[0]
    x = x_nhwc
    outs = []
    for s, sp in enumerate(params["stages"]):
        C = cfg["EMBED_DIM"][s]
        k, stride, pad = (7, 4, 3) if s == 0 else (3, 2, 1)
        pat, H, W = im2col(x, k, k, stride, pad)           # TODO(synk): patch-embed im2col stays in JAX (once/stage, tiny)
        N = H * W
        nsplit = 2 if (B % 2 == 0 and ((B // 2) * N) % 8 == 0) else 1
        Bs = B // nsplit

        tokens = pallas_patch_embed(pat.reshape(B * N, -1),
                                    sp["pe_w"], sp["pe_b"], sp["pe_ln_g"], sp["pe_ln_b"],
                                    nsplit)                # (B*N, C)

        heads = cfg["NUM_HEADS"][s]
        sr = cfg["SR_RATIOS"][s]
        hidden = C * cfg["MLP_RATIOS"][s]
        consts = _build_stage_consts(Bs, H, W, sr)

        nb = len(sp["blocks"])
        for bi, bp in enumerate(sp["blocks"]):
            tokens = pallas_block(tokens, bp, sp, consts,
                                  C=C, heads=heads, hidden=hidden, sr=sr,
                                  nsplit=nsplit, final_ln=(bi == nb - 1))

        feat = tokens.reshape(B, H, W, C)                  # NHWC
        outs.append(feat)
        x = feat                                           # next stage input (NHWC)
    return outs


# ----------------------------------------------------------------------------
# PVTNetV2 wrapper: one backbone pass on concatenated search + template batch
# ----------------------------------------------------------------------------
@jax.jit
def pvt_netv2_forward(params, x_spatial_features, t_spatial_features):
    B = x_spatial_features.shape[0]
    xt = jnp.concatenate([x_spatial_features, t_spatial_features], axis=0)  # (2B, C, H, W)
    xt = jnp.transpose(xt.astype(jnp.float32), (0, 2, 3, 1))                # NCHW -> NHWC
    feats = pvt_backbone_forward(params, xt, CFG)
    search_list, template_list = [], []
    for f in feats:                                        # f: (2B, H, W, C)
        f_nchw = jnp.transpose(f, (0, 3, 1, 2))            # reshape_back: NCHW out
        search_list.append(f_nchw[:B])
        template_list.append(f_nchw[B:])
    return {"search_feats_lists": search_list, "template_feats_lists": template_list}


if __name__ == "__main__":
    key = jax.random.PRNGKey(0)
    kx, kt, kp = jax.random.split(key, 3)
    B, Cin, S = 2, IN_CHANNELS, CFG["FEATURE_SIZE"]
    x_feat = jax.random.normal(kx, (B, Cin, S, S), dtype=jnp.float32)   # NCHW (PyTorch conv layout)
    t_feat = jax.random.normal(kt, (B, Cin, S, S), dtype=jnp.float32)

    params = init_params(kp, Cin, CFG)
    batch_dict = pvt_netv2_forward(params, x_feat, t_feat)

    for feats in (batch_dict["search_feats_lists"], batch_dict["template_feats_lists"]):
        for f in feats:
            jax.block_until_ready(f)
    print("KERNEL_OK")
</pallas_src>

<mosaic_0001>
module attributes {stable_mosaic.version = 11 : i64} {
  func.func @_patch_embed_kernel(%arg0: i32, %arg1: memref<32x196xf32, #tpu.memory_space<vmem>>, %arg2: memref<196x8xf32, #tpu.memory_space<vmem>>, %arg3: memref<1x8xf32, #tpu.memory_space<vmem>>, %arg4: memref<1x8xf32, #tpu.memory_space<vmem>>, %arg5: memref<1x8xf32, #tpu.memory_space<vmem>>, %arg6: memref<32x8xf32, #tpu.memory_space<vmem>>) attributes {dimension_semantics = [#tpu.dimension_semantics<parallel>], iteration_bounds = array<i64: 2>, scalar_prefetch = 0 : i64, scratch_operands = 0 : i64, tpu.core_type = #tpu.core_type<tc>, window_params = [{transform_indices = @transform_0, window_bounds = array<i64: 32, 196>}, {pipeline_mode = #tpu.pipeline_mode<synchronous>, transform_indices = @transform_1, window_bounds = array<i64: 196, 8>}, {pipeline_mode = #tpu.pipeline_mode<synchronous>, transform_indices = @transform_2, window_bounds = array<i64: 1, 8>}, {pipeline_mode = #tpu.pipeline_mode<synchronous>, transform_indices = @transform_3, window_bounds = array<i64: 1, 8>}, {pipeline_mode = #tpu.pipeline_mode<synchronous>, transform_indices = @transform_4, window_bounds = array<i64: 1, 8>}, {transform_indices = @transform_5, window_bounds = array<i64: 32, 8>}]} {
    %c0 = arith.constant 0 : index
    %c0_0 = arith.constant 0 : index
    %0 = vector.load %arg1[%c0, %c0_0] : memref<32x196xf32, #tpu.memory_space<vmem>>, vector<32x196xf32>
    %c0_1 = arith.constant 0 : index
    %c0_2 = arith.constant 0 : index
    %1 = vector.load %arg2[%c0_1, %c0_2] : memref<196x8xf32, #tpu.memory_space<vmem>>, vector<196x8xf32>
    %cst = arith.constant dense<0.000000e+00> : vector<32x8xf32>
    %2 = tpu.matmul %0, %1, %cst {dimension_numbers = #tpu.dot_dimension_numbers<[1], [0], [0], [1], [0, 0, 1, 1], [], []>} : vector<32x196xf32>, vector<196x8xf32>, vector<32x8xf32> -> vector<32x8xf32>
    %c0_3 = arith.constant 0 : index
    %c0_4 = arith.constant 0 : index
    %3 = vector.load %arg3[%c0_3, %c0_4] : memref<1x8xf32, #tpu.memory_space<vmem>>, vector<1x8xf32>
    %4 = vector.broadcast %3 : vector<1x8xf32> to vector<32x8xf32>
    %5 = arith.addf %2, %4 : vector<32x8xf32>
    %c0_5 = arith.constant 0 : index
    %c0_6 = arith.constant 0 : index
    %6 = vector.load %arg4[%c0_5, %c0_6] : memref<1x8xf32, #tpu.memory_space<vmem>>, vector<1x8xf32>
    %c0_7 = arith.constant 0 : index
    %c0_8 = arith.constant 0 : index
    %7 = vector.load %arg5[%c0_7, %c0_8] : memref<1x8xf32, #tpu.memory_space<vmem>>, vector<1x8xf32>
    %cst_9 = arith.constant dense<0.000000e+00> : vector<32xf32>
    %8 = vector.multi_reduction <add>, %5, %cst_9 [1] : vector<32x8xf32> to vector<32xf32>
    %9 = vector.shape_cast %8 : vector<32xf32> to vector<32x1xf32>
    %cst_10 = arith.constant 8.000000e+00 : f32
    %10 = vector.broadcast %cst_10 : f32 to vector<32x1xf32>
    %11 = arith.divf %9, %10 : vector<32x1xf32>
    %12 = vector.broadcast %11 : vector<32x1xf32> to vector<32x8xf32>
    %13 = arith.subf %5, %12 : vector<32x8xf32>
    %14 = arith.mulf %13, %13 : vector<32x8xf32>
    %cst_11 = arith.constant dense<0.000000e+00> : vector<32xf32>
    %15 = vector.multi_reduction <add>, %14, %cst_11 [1] : vector<32x8xf32> to vector<32xf32>
    %16 = vector.shape_cast %15 : vector<32xf32> to vector<32x1xf32>
    %cst_12 = arith.constant 8.000000e+00 : f32
    %17 = vector.broadcast %cst_12 : f32 to vector<32x1xf32>
    %18 = arith.divf %16, %17 : vector<32x1xf32>
    %19 = vector.broadcast %11 : vector<32x1xf32> to vector<32x8xf32>
    %20 = arith.subf %5, %19 : vector<32x8xf32>
    %cst_13 = arith.constant 9.99999997E-7 : f32
    %21 = vector.broadcast %cst_13 : f32 to vector<32x1xf32>
    %22 = arith.addf %18, %21 : vector<32x1xf32>
    %23 = math.rsqrt %22 : vector<32x1xf32>
    %24 = vector.broadcast %23 : vector<32x1xf32> to vector<32x8xf32>
    %25 = arith.mulf %20, %24 : vector<32x8xf32>
    %26 = vector.broadcast %6 : vector<1x8xf32> to vector<32x8xf32>
    %27 = arith.mulf %25, %26 : vector<32x8xf32>
    %28 = vector.broadcast %7 : vector<1x8xf32> to vector<32x8xf32>
    %29 = arith.addf %27, %28 : vector<32x8xf32>
    %c0_14 = arith.constant 0 : index
    %c0_15 = arith.constant 0 : index
    %30 = vector.load %arg6[%c0_14, %c0_15] : memref<32x8xf32, #tpu.memory_space<vmem>>, vector<32x8xf32>
    tpu.vector_store %arg6[%c0_14, %c0_15], %29 {strides = array<i32>} : memref<32x8xf32, #tpu.memory_space<vmem>>, vector<32x8xf32>,
    return
  }
  func.func @transform_0(%arg0: i32) -> (i32, i32) {
    %c0_i32 = arith.constant 0 : i32
    %c0_i32_0 = arith.constant 0 : i32
    return %arg0, %c0_i32 : i32, i32
  }
  func.func @transform_1(%arg0: i32) -> (i32, i32) {
    %c0_i32 = arith.constant 0 : i32
    %c0_i32_0 = arith.constant 0 : i32
    %c0_i32_1 = arith.constant 0 : i32
    return %c0_i32, %c0_i32_0 : i32, i32
  }
  func.func @transform_2(%arg0: i32) -> (i32, i32) {
    %c0_i32 = arith.constant 0 : i32
    %c0_i32_0 = arith.constant 0 : i32
    %c0_i32_1 = arith.constant 0 : i32
    return %c0_i32, %c0_i32_0 : i32, i32
  }
  func.func @transform_3(%arg0: i32) -> (i32, i32) {
    %c0_i32 = arith.constant 0 : i32
    %c0_i32_0 = arith.constant 0 : i32
    %c0_i32_1 = arith.constant 0 : i32
    return %c0_i32, %c0_i32_0 : i32, i32
  }
  func.func @transform_4(%arg0: i32) -> (i32, i32) {
    %c0_i32 = arith.constant 0 : i32
    %c0_i32_0 = arith.constant 0 : i32
    %c0_i32_1 = arith.constant 0 : i32
    return %c0_i32, %c0_i32_0 : i32, i32
  }
  func.func @transform_5(%arg0: i32) -> (i32, i32) {
    %c0_i32 = arith.constant 0 : i32
    %c0_i32_0 = arith.constant 0 : i32
    return %arg0, %c0_i32 : i32, i32
  }
}

module attributes {stable_mosaic.version = 11 : i64} {
  func.func @kernel(%arg0: i32, %arg1: memref<32x8xf32, #tpu.memory_space<vmem>>, %arg2: memref<32x8xf32, #tpu.memory_space<vmem>>, %arg3: memref<9x32x32xf32, #tpu.memory_space<vmem>>, %arg4: memref<4x8x32xf32, #tpu.memory_space<vmem>>, %arg5: memref<4x8x8xf32, #tpu.memory_space<vmem>>, %arg6: memref<1x8xf32, #tpu.memory_space<vmem>>, %arg7: memref<1x8xf32, #tpu.memory_space<vmem>>, %arg8: memref<1x8xf32, #tpu.memory_space<vmem>>, %arg9: memref<1x8xf32, #tpu.memory_space<vmem>>, %arg10: memref<1x8xf32, #tpu.memory_space<vmem>>, %arg11: memref<1x8x8xf32, #tpu.memory_space<vmem>>, %arg12: memref<1x8x8xf32, #tpu.memory_space<vmem>>, %arg13: memref<1x8x8xf32, #tpu.memory_space<vmem>>, %arg14: memref<1x8x8xf32, #tpu.memory_space<vmem>>, %arg15: memref<1x8xf32, #tpu.memory_space<vmem>>, %arg16: memref<1x8xf32, #tpu.memory_space<vmem>>, %arg17: memref<1x8xf32, #tpu.memory_space<vmem>>, %arg18: memref<8x16xf32, #tpu.memory_space<vmem>>, %arg19: memref<1x16xf32, #tpu.memory_space<vmem>>, %arg20: memref<9x16xf32, #tpu.memory_space<vmem>>, %arg21: memref<1x16xf32, #tpu.memory_space<vmem>>, %arg22: memref<16x8xf32, #tpu.memory_space<vmem>>, %arg23: memref<1x8xf32, #tpu.memory_space<vmem>>, %arg24: memref<1x8xf32, #tpu.memory_space<vmem>>, %arg25: memref<1x8xf32, #tpu.memory_space<vmem>>, %arg26: memref<32x8xf32, #tpu.memory_space<vmem>>) attributes {dimension_semantics = [#tpu.dimension_semantics<parallel>], iteration_bounds = array<i64: 2>, scalar_prefetch = 0 : i64, scratch_operands = 0 : i64, tpu.core_type = #tpu.core_type<tc>, window_params = [{transform_indices = @transform_0, window_bounds = array<i64: 32, 8>}, {pipeline_mode = #tpu.pipeline_mode<synchronous>, transform_indices = @transform_1, window_bounds = array<i64: 32, 8>}, {pipeline_mode = #tpu.pipeline_mode<synchronous>, transform_indices = @transform_2, window_bounds = array<i64: 9, 32, 32>}, {pipeline_mode = #tpu.pipeline_mode<synchronous>, transform_indices = @transform_3, window_bounds = array<i64: 4, 8, 32>}, {pipeline_mode = #tpu.pipeline_mode<synchronous>, transform_indices = @transform_4, window_bounds = array<i64: 4, 8, 8>}, {pipeline_mode = #tpu.pipeline_mode<synchronous>, transform_indices = @transform_5, window_bounds = array<i64: 1, 8>}, {pipeline_mode = #tpu.pipeline_mode<synchronous>, transform_indices = @transform_6, window_bounds = array<i64: 1, 8>}, {pipeline_mode = #tpu.pipeline_mode<synchronous>, transform_indices = @transform_7, window_bounds = array<i64: 1, 8>}, {pipeline_mode = #tpu.pipeline_mode<synchronous>, transform_indices = @transform_8, window_bounds = array<i64: 1, 8>}, {pipeline_mode = #tpu.pipeline_mode<synchronous>, transform_indices = @transform_9, window_bounds = array<i64: 1, 8>}, {pipeline_mode = #tpu.pipeline_mode<synchronous>, transform_indices = @transform_10, window_bounds = array<i64: 1, 8, 8>}, {pipeline_mode = #tpu.pipeline_mode<synchronous>, transform_indices = @transform_11, window_bounds = array<i64: 1, 8, 8>}, {pipeline_mode = #tpu.pipeline_mode<synchronous>, transform_indices = @transform_12, window_bounds = array<i64: 1, 8, 8>}, {pipeline_mode = #tpu.pipeline_mode<synchronous>, transform_indices = @transform_13, window_bounds = array<i64: 1, 8, 8>}, {pipeline_mode = #tpu.pipeline_mode<synchronous>, transform_indices = @transform_14, window_bounds = array<i64: 1, 8>}, {pipeline_mode = #tpu.pipeline_mode<synchronous>, transform_indices = @transform_15, window_bounds = array<i64: 1, 8>}, {pipeline_mode = #tpu.pipeline_mode<synchronous>, transform_indices = @transform_16, window_bounds = array<i64: 1, 8>}, {pipeline_mode = #tpu.pipeline_mode<synchronous>, transform_indices = @transform_17, window_bounds = array<i64: 8, 16>}, {pipeline_mode = #tpu.pipeline_mode<synchronous>, transform_indices = @transform_18, window_bounds = array<i64: 1, 16>}, {pipeline_mode = #tpu.pipeline_mode<synchronous>, transform_indices = @transform_19, window_bounds = array<i64: 9, 16>}, {pipeline_mode = #tpu.pipeline_mode<synchronous>, transform_indices = @transform_20, window_bounds = array<i64: 1, 16>}, {pipeline_mode = #tpu.pipeline_mode<synchronous>, transform_indices = @transform_21, window_bounds = array<i64: 16, 8>}, {pipeline_mode = #tpu.pipeline_mode<synchronous>, transform_indices = @transform_22, window_bounds = array<i64: 1, 8>}, {pipeline_mode = #tpu.pipeline_mode<synchronous>, transform_indices = @transform_23, window_bounds = array<i64: 1, 8>}, {pipeline_mode = #tpu.pipeline_mode<synchronous>, transform_indices = @transform_24, window_bounds = array<i64: 1, 8>}, {transform_indices = @transform_25, window_bounds = array<i64: 32, 8>}]} {
    %c0 = arith.constant 0 : index
    %c0_0 = arith.constant 0 : index
    %0 = vector.load %arg1[%c0, %c0_0] : memref<32x8xf32, #tpu.memory_space<vmem>>, vector<32x8xf32>
    %c0_1 = arith.constant 0 : index
    %c0_2 = arith.constant 0 : index
    %1 = vector.load %arg9[%c0_1, %c0_2] : memref<1x8xf32, #tpu.memory_space<vmem>>, vector<1x8xf32>
    %c0_3 = arith.constant 0 : index
    %c0_4 = arith.constant 0 : index
    %2 = vector.load %arg10[%c0_3, %c0_4] : memref<1x8xf32, #tpu.memory_space<vmem>>, vector<1x8xf32>
    %cst = arith.constant dense<0.000000e+00> : vector<32xf32>
    %3 = vector.multi_reduction <add>, %0, %cst [1] : vector<32x8xf32> to vector<32xf32>
    %4 = vector.shape_cast %3 : vector<32xf32> to vector<32x1xf32>
    %cst_5 = arith.constant 8.000000e+00 : f32
    %5 = vector.broadcast %cst_5 : f32 to vector<32x1xf32>
    %6 = arith.divf %4, %5 : vector<32x1xf32>
    %7 = vector.broadcast %6 : vector<32x1xf32> to vector<32x8xf32>
    %8 = arith.subf %0, %7 : vector<32x8xf32>
    %9 = arith.mulf %8, %8 : vector<32x8xf32>
    %cst_6 = arith.constant dense<0.000000e+00> : vector<32xf32>
    %10 = vector.multi_reduction <add>, %9, %cst_6 [1] : vector<32x8xf32> to vector<32xf32>
    %11 = vector.shape_cast %10 : vector<32xf32> to vector<32x1xf32>
    %cst_7 = arith.constant 8.000000e+00 : f32
    %12 = vector.broadcast %cst_7 : f32 to vector<32x1xf32>
    %13 = arith.divf %11, %12 : vector<32x1xf32>
    %14 = vector.broadcast %6 : vector<32x1xf32> to vector<32x8xf32>
    %15 = arith.subf %0, %14 : vector<32x8xf32>
    %cst_8 = arith.constant 9.99999997E-7 : f32
    %16 = vector.broadcast %cst_8 : f32 to vector<32x1xf32>
    %17 = arith.addf %13, %16 : vector<32x1xf32>
    %18 = math.rsqrt %17 : vector<32x1xf32>
    %19 = vector.broadcast %18 : vector<32x1xf32> to vector<32x8xf32>
    %20 = arith.mulf %15, %19 : vector<32x8xf32>
    %21 = vector.broadcast %1 : vector<1x8xf32> to vector<32x8xf32>
    %22 = arith.mulf %20, %21 : vector<32x8xf32>
    %23 = vector.broadcast %2 : vector<1x8xf32> to vector<32x8xf32>
    %24 = arith.addf %22, %23 : vector<32x8xf32>
    %cst_9 = arith.constant 0.000000e+00 : f32
    %25 = vector.broadcast %cst_9 : f32 to vector<8x8xf32>
    %c0_10 = arith.constant 0 : index
    %c0_11 = arith.constant 0 : index
    %c0_12 = arith.constant 0 : index
    %26 = vector.load %arg4[%c0_10, %c0_11, %c0_12] : memref<4x8x32xf32, #tpu.memory_space<vmem>>, vector<1x8x32xf32>
    %27 = vector.shape_cast %26 : vector<1x8x32xf32> to vector<8x32xf32>
    %cst_13 = arith.constant dense<0.000000e+00> : vector<8x8xf32>
    %28 = tpu.matmul %27, %24, %cst_13 {dimension_numbers = #tpu.dot_dimension_numbers<[1], [0], [0], [1], [0, 0, 1, 1], [], []>} : vector<8x32xf32>, vector<32x8xf32>, vector<8x8xf32> -> vector<8x8xf32>
    %c0_14 = arith.constant 0 : index
    %c0_15 = arith.constant 0 : index
    %c0_16 = arith.constant 0 : index
    %29 = vector.load %arg5[%c0_14, %c0_15, %c0_16] : memref<4x8x8xf32, #tpu.memory_space<vmem>>, vector<1x8x8xf32>
    %30 = vector.shape_cast %29 : vector<1x8x8xf32> to vector<8x8xf32>
    %cst_17 = arith.constant dense<0.000000e+00> : vector<8x8xf32>
    %31 = tpu.matmul %28, %30, %cst_17 {dimension_numbers = #tpu.dot_dimension_numbers<[1], [0], [0], [1], [0, 0, 1, 1], [], []>} : vector<8x8xf32>, vector<8x8xf32>, vector<8x8xf32> -> vector<8x8xf32>
    %32 = arith.addf %25, %31 : vector<8x8xf32>
    %c1 = arith.constant 1 : index
    %c0_18 = arith.constant 0 : index
    %c0_19 = arith.constant 0 : index
    %33 = vector.load %arg4[%c1, %c0_18, %c0_19] : memref<4x8x32xf32, #tpu.memory_space<vmem>>, vector<1x8x32xf32>
    %34 = vector.shape_cast %33 : vector<1x8x32xf32> to vector<8x32xf32>
    %cst_20 = arith.constant dense<0.000000e+00> : vector<8x8xf32>
    %35 = tpu.matmul %34, %24, %cst_20 {dimension_numbers = #tpu.dot_dimension_numbers<[1], [0], [0], [1], [0, 0, 1, 1], [], []>} : vector<8x32xf32>, vector<32x8xf32>, vector<8x8xf32> -> vector<8x8xf32>
    %c1_21 = arith.constant 1 : index
    %c0_22 = arith.constant 0 : index
    %c0_23 = arith.constant 0 : index
    %36 = vector.load %arg5[%c1_21, %c0_22, %c0_23] : memref<4x8x8xf32, #tpu.memory_space<vmem>>, vector<1x8x8xf32>
    %37 = vector.shape_cast %36 : vector<1x8x8xf32> to vector<8x8xf32>
    %cst_24 = arith.constant dense<0.000000e+00> : vector<8x8xf32>
    %38 = tpu.matmul %35, %37, %cst_24 {dimension_numbers = #tpu.dot_dimension_numbers<[1], [0], [0], [1], [0, 0, 1, 1], [], []>} : vector<8x8xf32>, vector<8x8xf32>, vector<8x8xf32> -> vector<8x8xf32>
    %39 = arith.addf %32, %38 : vector<8x8xf32>
    %c2 = arith.constant 2 : index
    %c0_25 = arith.constant 0 : index
    %c0_26 = arith.constant 0 : index
    %40 = vector.load %arg4[%c2, %c0_25, %c0_26] : memref<4x8x32xf32, #tpu.memory_space<vmem>>, vector<1x8x32xf32>
    %41 = vector.shape_cast %40 : vector<1x8x32xf32> to vector<8x32xf32>
    %cst_27 = arith.constant dense<0.000000e+00> : vector<8x8xf32>
    %42 = tpu.matmul %41, %24, %cst_27 {dimension_numbers = #tpu.dot_dimension_numbers<[1], [0], [0], [1], [0, 0, 1, 1], [], []>} : vector<8x32xf32>, vector<32x8xf32>, vector<8x8xf32> -> vector<8x8xf32>
    %c2_28 = arith.constant 2 : index
    %c0_29 = arith.constant 0 : index
    %c0_30 = arith.constant 0 : index
    %43 = vector.load %arg5[%c2_28, %c0_29, %c0_30] : memref<4x8x8xf32, #tpu.memory_space<vmem>>, vector<1x8x8xf32>
    %44 = vector.shape_cast %43 : vector<1x8x8xf32> to vector<8x8xf32>
    %cst_31 = arith.constant dense<0.000000e+00> : vector<8x8xf32>
    %45 = tpu.matmul %42, %44, %cst_31 {dimension_numbers = #tpu.dot_dimension_numbers<[1], [0], [0], [1], [0, 0, 1, 1], [], []>} : vector<8x8xf32>, vector<8x8xf32>, vector<8x8xf32> -> vector<8x8xf32>
    %46 = arith.addf %39, %45 : vector<8x8xf32>
    %c3 = arith.constant 3 : index
    %c0_32 = arith.constant 0 : index
    %c0_33 = arith.constant 0 : index
    %47 = vector.load %arg4[%c3, %c0_32, %c0_33] : memref<4x8x32xf32, #tpu.memory_space<vmem>>, vector<1x8x32xf32>
    %48 = vector.shape_cast %47 : vector<1x8x32xf32> to vector<8x32xf32>
    %cst_34 = arith.constant dense<0.000000e+00> : vector<8x8xf32>
    %49 = tpu.matmul %48, %24, %cst_34 {dimension_numbers = #tpu.dot_dimension_numbers<[1], [0], [0], [1], [0, 0, 1, 1], [], []>} : vector<8x32xf32>, vector<32x8xf32>, vector<8x8xf32> -> vector<8x8xf32>
    %c3_35 = arith.constant 3 : index
    %c0_36 = arith.constant 0 : index
    %c0_37 = arith.constant 0 : index
    %50 = vector.load %arg5[%c3_35, %c0_36, %c0_37] : memref<4x8x8xf32, #tpu.memory_space<vmem>>, vector<1x8x8xf32>
    %51 = vector.shape_cast %50 : vector<1x8x8xf32> to vector<8x8xf32>
    %cst_38 = arith.constant dense<0.000000e+00> : vector<8x8xf32>
    %52 = tpu.matmul %49, %51, %cst_38 {dimension_numbers = #tpu.dot_dimension_numbers<[1], [0], [0], [1], [0, 0, 1, 1], [], []>} : vector<8x8xf32>, vector<8x8xf32>, vector<8x8xf32> -> vector<8x8xf32>
    %53 = arith.addf %46, %52 : vector<8x8xf32>
    %c0_39 = arith.constant 0 : index
    %c0_40 = arith.constant 0 : index
    %54 = vector.load %arg6[%c0_39, %c0_40] : memref<1x8xf32, #tpu.memory_space<vmem>>, vector<1x8xf32>
    %55 = vector.broadcast %54 : vector<1x8xf32> to vector<8x8xf32>
    %56 = arith.addf %53, %55 : vector<8x8xf32>
    %c0_41 = arith.constant 0 : index
    %c0_42 = arith.constant 0 : index
    %57 = vector.load %arg7[%c0_41, %c0_42] : memref<1x8xf32, #tpu.memory_space<vmem>>, vector<1x8xf32>
    %c0_43 = arith.constant 0 : index
    %c0_44 = arith.constant 0 : index
    %58 = vector.load %arg8[%c0_43, %c0_44] : memref<1x8xf32, #tpu.memory_space<vmem>>, vector<1x8xf32>
    %cst_45 = arith.constant dense<0.000000e+00> : vector<8xf32>
    %59 = vector.multi_reduction <add>, %56, %cst_45 [1] : vector<8x8xf32> to vector<8xf32>
    %60 = vector.shape_cast %59 : vector<8xf32> to vector<8x1xf32>
    %cst_46 = arith.constant 8.000000e+00 : f32
    %61 = vector.broadcast %cst_46 : f32 to vector<8x1xf32>
    %62 = arith.divf %60, %61 : vector<8x1xf32>
    %63 = vector.broadcast %62 : vector<8x1xf32> to vector<8x8xf32>
    %64 = arith.subf %56, %63 : vector<8x8xf32>
    %65 = arith.mulf %64, %64 : vector<8x8xf32>
    %cst_47 = arith.constant dense<0.000000e+00> : vector<8xf32>
    %66 = vector.multi_reduction <add>, %65, %cst_47 [1] : vector<8x8xf32> to vector<8xf32>
    %67 = vector.shape_cast %66 : vector<8xf32> to vector<8x1xf32>
    %cst_48 = arith.constant 8.000000e+00 : f32
    %68 = vector.broadcast %cst_48 : f32 to vector<8x1xf32>
    %69 = arith.divf %67, %68 : vector<8x1xf32>
    %70 = vector.broadcast %62 : vector<8x1xf32> to vector<8x8xf32>
    %71 = arith.subf %56, %70 : vector<8x8xf32>
    %cst_49 = arith.constant 9.99999997E-7 : f32
    %72 = vector.broadcast %cst_49 : f32 to vector<8x1xf32>
    %73 = arith.addf %69, %72 : vector<8x1xf32>
    %74 = math.rsqrt %73 : vector<8x1xf32>
    %75 = vector.broadcast %74 : vector<8x1xf32> to vector<8x8xf32>
    %76 = arith.mulf %71, %75 : vector<8x8xf32>
    %77 = vector.broadcast %57 : vector<1x8xf32> to vector<8x8xf32>
    %78 = arith.mulf %76, %77 : vector<8x8xf32>
    %79 = vector.broadcast %58 : vector<1x8xf32> to vector<8x8xf32>
    %80 = arith.addf %78, %79 : vector<8x8xf32>
    %c0_50 = arith.constant 0 : index
    %c0_51 = arith.constant 0 : index
    %81 = vector.load %arg2[%c0_50, %c0_51] : memref<32x8xf32, #tpu.memory_space<vmem>>, vector<32x8xf32>
    %cst_52 = arith.constant 0.000000e+00 : f32
    %82 = vector.broadcast %cst_52 : f32 to vector<32x8xf32>
    %c0_53 = arith.constant 0 : index
    %c0_54 = arith.constant 0 : index
    %c0_55 = arith.constant 0 : index
    %83 = vector.load %arg11[%c0_53, %c0_54, %c0_55] : memref<1x8x8xf32, #tpu.memory_space<vmem>>, vector<1x8x8xf32>
    %84 = vector.shape_cast %83 : vector<1x8x8xf32> to vector<8x8xf32>
    %cst_56 = arith.constant dense<0.000000e+00> : vector<32x8xf32>
    %85 = tpu.matmul %24, %84, %cst_56 {dimension_numbers = #tpu.dot_dimension_numbers<[1], [0], [0], [1], [0, 0, 1, 1], [], []>} : vector<32x8xf32>, vector<8x8xf32>, vector<32x8xf32> -> vector<32x8xf32>
    %c0_57 = arith.constant 0 : index
    %c0_58 = arith.constant 0 : index
    %c0_59 = arith.constant 0 : index
    %86 = vector.load %arg12[%c0_57, %c0_58, %c0_59] : memref<1x8x8xf32, #tpu.memory_space<vmem>>, vector<1x8x8xf32>
    %87 = vector.shape_cast %86 : vector<1x8x8xf32> to vector<8x8xf32>
    %cst_60 = arith.constant dense<0.000000e+00> : vector<8x8xf32>
    %88 = tpu.matmul %80, %87, %cst_60 {dimension_numbers = #tpu.dot_dimension_numbers<[1], [0], [0], [1], [0, 0, 1, 1], [], []>} : vector<8x8xf32>, vector<8x8xf32>, vector<8x8xf32> -> vector<8x8xf32>
    %c0_61 = arith.constant 0 : index
    %c0_62 = arith.constant 0 : index
    %c0_63 = arith.constant 0 : index
    %89 = vector.load %arg13[%c0_61, %c0_62, %c0_63] : memref<1x8x8xf32, #tpu.memory_space<vmem>>, vector<1x8x8xf32>
    %90 = vector.shape_cast %89 : vector<1x8x8xf32> to vector<8x8xf32>
    %cst_64 = arith.constant dense<0.000000e+00> : vector<8x8xf32>
    %91 = tpu.matmul %80, %90, %cst_64 {dimension_numbers = #tpu.dot_dimension_numbers<[1], [0], [0], [1], [0, 0, 1, 1], [], []>} : vector<8x8xf32>, vector<8x8xf32>, vector<8x8xf32> -> vector<8x8xf32>
    %cst_65 = arith.constant dense<0.000000e+00> : vector<32x8xf32>
    %92 = tpu.matmul %85, %88, %cst_65 {dimension_numbers = #tpu.dot_dimension_numbers<[1], [1], [0], [0], [0, 0, 1, 0], [], []>} : vector<32x8xf32>, vector<8x8xf32>, vector<32x8xf32> -> vector<32x8xf32>
    %cst_66 = arith.constant 0.353553385 : f32
    %93 = vector.broadcast %cst_66 : f32 to vector<32x8xf32>
    %94 = arith.mulf %92, %93 : vector<32x8xf32>
    %95 = arith.addf %94, %81 : vector<32x8xf32>
    %cst_67 = arith.constant dense<0xFF800000> : vector<32xf32>
    %96 = vector.multi_reduction <maximumf>, %95, %cst_67 [1] : vector<32x8xf32> to vector<32xf32>
    %97 = vector.shape_cast %96 : vector<32xf32> to vector<32x1xf32>
    %98 = vector.broadcast %97 : vector<32x1xf32> to vector<32x8xf32>
    %99 = arith.subf %95, %98 : vector<32x8xf32>
    %100 = math.exp %99 : vector<32x8xf32>
    %cst_68 = arith.constant dense<0.000000e+00> : vector<32xf32>
    %101 = vector.multi_reduction <add>, %100, %cst_68 [1] : vector<32x8xf32> to vector<32xf32>
    %102 = vector.shape_cast %101 : vector<32xf32> to vector<32x1xf32>
    %103 = tpu.reciprocal %102 {approx = true} : vector<32x1xf32> -> vector<32x1xf32>
    %104 = vector.broadcast %103 : vector<32x1xf32> to vector<32x8xf32>
    %105 = arith.mulf %100, %104 : vector<32x8xf32>
    %cst_69 = arith.constant dense<0.000000e+00> : vector<32x8xf32>
    %106 = tpu.matmul %105, %91, %cst_69 {dimension_numbers = #tpu.dot_dimension_numbers<[1], [0], [0], [1], [0, 0, 1, 1], [], []>} : vector<32x8xf32>, vector<8x8xf32>, vector<32x8xf32> -> vector<32x8xf32>
    %c0_70 = arith.constant 0 : index
    %c0_71 = arith.constant 0 : index
    %c0_72 = arith.constant 0 : index
    %107 = vector.load %arg14[%c0_70, %c0_71, %c0_72] : memref<1x8x8xf32, #tpu.memory_space<vmem>>, vector<1x8x8xf32>
    %108 = vector.shape_cast %107 : vector<1x8x8xf32> to vector<8x8xf32>
    %cst_73 = arith.constant dense<0.000000e+00> : vector<32x8xf32>
    %109 = tpu.matmul %106, %108, %cst_73 {dimension_numbers = #tpu.dot_dimension_numbers<[1], [0], [0], [1], [0, 0, 1, 1], [], []>} : vector<32x8xf32>, vector<8x8xf32>, vector<32x8xf32> -> vector<32x8xf32>
    %110 = arith.addf %82, %109 : vector<32x8xf32>
    %111 = arith.addf %0, %110 : vector<32x8xf32>
    %c0_74 = arith.constant 0 : index
    %c0_75 = arith.constant 0 : index
    %112 = vector.load %arg15[%c0_74, %c0_75] : memref<1x8xf32, #tpu.memory_space<vmem>>, vector<1x8xf32>
    %113 = vector.broadcast %112 : vector<1x8xf32> to vector<32x8xf32>
    %114 = arith.addf %111, %113 : vector<32x8xf32>
    %c0_76 = arith.constant 0 : index
    %c0_77 = arith.constant 0 : index
    %115 = vector.load %arg16[%c0_76, %c0_77] : memref<1x8xf32, #tpu.memory_space<vmem>>, vector<1x8xf32>
    %c0_78 = arith.constant 0 : index
    %c0_79 = arith.constant 0 : index
    %116 = vector.load %arg17[%c0_78, %c0_79] : memref<1x8xf32, #tpu.memory_space<vmem>>, vector<1x8xf32>
    %cst_80 = arith.constant dense<0.000000e+00> : vector<32xf32>
    %117 = vector.multi_reduction <add>, %114, %cst_80 [1] : vector<32x8xf32> to vector<32xf32>
    %118 = vector.shape_cast %117 : vector<32xf32> to vector<32x1xf32>
    %cst_81 = arith.constant 8.000000e+00 : f32
    %119 = vector.broadcast %cst_81 : f32 to vector<32x1xf32>
    %120 = arith.divf %118, %119 : vector<32x1xf32>
    %121 = vector.broadcast %120 : vector<32x1xf32> to vector<32x8xf32>
    %122 = arith.subf %114, %121 : vector<32x8xf32>
    %123 = arith.mulf %122, %122 : vector<32x8xf32>
    %cst_82 = arith.constant dense<0.000000e+00> : vector<32xf32>
    %124 = vector.multi_reduction <add>, %123, %cst_82 [1] : vector<32x8xf32> to vector<32xf32>
    %125 = vector.shape_cast %124 : vector<32xf32> to vector<32x1xf32>
    %cst_83 = arith.constant 8.000000e+00 : f32
    %126 = vector.broadcast %cst_83 : f32 to vector<32x1xf32>
    %127 = arith.divf %125, %126 : vector<32x1xf32>
    %128 = vector.broadcast %120 : vector<32x1xf32> to vector<32x8xf32>
    %129 = arith.subf %114, %128 : vector<32x8xf32>
    %cst_84 = arith.constant 9.99999997E-7 : f32
    %130 = vector.broadcast %cst_84 : f32 to vector<32x1xf32>
    %131 = arith.addf %127, %130 : vector<32x1xf32>
    %132 = math.rsqrt %131 : vector<32x1xf32>
    %133 = vector.broadcast %132 : vector<32x1xf32> to vector<32x8xf32>
    %134 = arith.mulf %129, %133 : vector<32x8xf32>
    %135 = vector.broadcast %115 : vector<1x8xf32> to vector<32x8xf32>
    %136 = arith.mulf %134, %135 : vector<32x8xf32>
    %137 = vector.broadcast %116 : vector<1x8xf32> to vector<32x8xf32>
    %138 = arith.addf %136, %137 : vector<32x8xf32>
    %c0_85 = arith.constant 0 : index
    %c0_86 = arith.constant 0 : index
    %139 = vector.load %arg18[%c0_85, %c0_86] : memref<8x16xf32, #tpu.memory_space<vmem>>, vector<8x16xf32>
    %cst_87 = arith.constant dense<0.000000e+00> : vector<32x16xf32>
    %140 = tpu.matmul %138, %139, %cst_87 {dimension_numbers = #tpu.dot_dimension_numbers<[1], [0], [0], [1], [0, 0, 1, 1], [], []>} : vector<32x8xf32>, vector<8x16xf32>, vector<32x16xf32> -> vector<32x16xf32>
    %c0_88 = arith.constant 0 : index
    %c0_89 = arith.constant 0 : index
    %141 = vector.load %arg19[%c0_88, %c0_89] : memref<1x16xf32, #tpu.memory_space<vmem>>, vector<1x16xf32>
    %142 = vector.broadcast %141 : vector<1x16xf32> to vector<32x16xf32>
    %143 = arith.addf %140, %142 : vector<32x16xf32>
    %c0_90 = arith.constant 0 : index
    %c0_91 = arith.constant 0 : index
    %144 = vector.load %arg20[%c0_90, %c0_91] : memref<9x16xf32, #tpu.memory_space<vmem>>, vector<9x16xf32>
    %cst_92 = arith.constant 0.000000e+00 : f32
    %145 = vector.broadcast %cst_92 : f32 to vector<32x16xf32>
    %c0_93 = arith.constant 0 : index
    %c0_94 = arith.constant 0 : index
    %c0_95 = arith.constant 0 : index
    %146 = vector.load %arg3[%c0_93, %c0_94, %c0_95] : memref<9x32x32xf32, #tpu.memory_space<vmem>>, vector<1x32x32xf32>
    %147 = vector.shape_cast %146 : vector<1x32x32xf32> to vector<32x32xf32>
    %cst_96 = arith.constant dense<0.000000e+00> : vector<32x16xf32>
    %148 = tpu.matmul %147, %143, %cst_96 {dimension_numbers = #tpu.dot_dimension_numbers<[1], [0], [0], [1], [0, 0, 1, 1], [], []>} : vector<32x32xf32>, vector<32x16xf32>, vector<32x16xf32> -> vector<32x16xf32>
    %149 = vector.extract_strided_slice %144 {offsets = [0, 0], sizes = [1, 16], strides = [1, 1]} : vector<9x16xf32> to vector<1x16xf32>
    %150 = vector.broadcast %149 : vector<1x16xf32> to vector<32x16xf32>
    %151 = arith.mulf %148, %150 : vector<32x16xf32>
    %152 = arith.addf %145, %151 : vector<32x16xf32>
    %c1_97 = arith.constant 1 : index
    %c0_98 = arith.constant 0 : index
    %c0_99 = arith.constant 0 : index
    %153 = vector.load %arg3[%c1_97, %c0_98, %c0_99] : memref<9x32x32xf32, #tpu.memory_space<vmem>>, vector<1x32x32xf32>
    %154 = vector.shape_cast %153 : vector<1x32x32xf32> to vector<32x32xf32>
    %cst_100 = arith.constant dense<0.000000e+00> : vector<32x16xf32>
    %155 = tpu.matmul %154, %143, %cst_100 {dimension_numbers = #tpu.dot_dimension_numbers<[1], [0], [0], [1], [0, 0, 1, 1], [], []>} : vector<32x32xf32>, vector<32x16xf32>, vector<32x16xf32> -> vector<32x16xf32>
    %156 = vector.extract_strided_slice %144 {offsets = [1, 0], sizes = [1, 16], strides = [1, 1]} : vector<9x16xf32> to vector<1x16xf32>
    %157 = vector.broadcast %156 : vector<1x16xf32> to vector<32x16xf32>
    %158 = arith.mulf %155, %157 : vector<32x16xf32>
    %159 = arith.addf %152, %158 : vector<32x16xf32>
    %c2_101 = arith.constant 2 : index
    %c0_102 = arith.constant 0 : index
    %c0_103 = arith.constant 0 : index
    %160 = vector.load %arg3[%c2_101, %c0_102, %c0_103] : memref<9x32x32xf32, #tpu.memory_space<vmem>>, vector<1x32x32xf32>
    %161 = vector.shape_cast %160 : vector<1x32x32xf32> to vector<32x32xf32>
    %cst_104 = arith.constant dense<0.000000e+00> : vector<32x16xf32>
    %162 = tpu.matmul %161, %143, %cst_104 {dimension_numbers = #tpu.dot_dimension_numbers<[1], [0], [0], [1], [0, 0, 1, 1], [], []>} : vector<32x32xf32>, vector<32x16xf32>, vector<32x16xf32> -> vector<32x16xf32>
    %163 = vector.extract_strided_slice %144 {offsets = [2, 0], sizes = [1, 16], strides = [1, 1]} : vector<9x16xf32> to vector<1x16xf32>
    %164 = vector.broadcast %163 : vector<1x16xf32> to vector<32x16xf32>
    %165 = arith.mulf %162, %164 : vector<32x16xf32>
    %166 = arith.addf %159, %165 : vector<32x16xf32>
    %c3_105 = arith.constant 3 : index
    %c0_106 = arith.constant 0 : index
    %c0_107 = arith.constant 0 : index
    %167 = vector.load %arg3[%c3_105, %c0_106, %c0_107] : memref<9x32x32xf32, #tpu.memory_space<vmem>>, vector<1x32x32xf32>
    %168 = vector.shape_cast %167 : vector<1x32x32xf32> to vector<32x32xf32>
    %cst_108 = arith.constant dense<0.000000e+00> : vector<32x16xf32>
    %169 = tpu.matmul %168, %143, %cst_108 {dimension_numbers = #tpu.dot_dimension_numbers<[1], [0], [0], [1], [0, 0, 1, 1], [], []>} : vector<32x32xf32>, vector<32x16xf32>, vector<32x16xf32> -> vector<32x16xf32>
    %170 = vector.extract_strided_slice %144 {offsets = [3, 0], sizes = [1, 16], strides = [1, 1]} : vector<9x16xf32> to vector<1x16xf32>
    %171 = vector.broadcast %170 : vector<1x16xf32> to vector<32x16xf32>
    %172 = arith.mulf %169, %171 : vector<32x16xf32>
    %173 = arith.addf %166, %172 : vector<32x16xf32>
    %c4 = arith.constant 4 : index
    %c0_109 = arith.constant 0 : index
    %c0_110 = arith.constant 0 : index
    %174 = vector.load %arg3[%c4, %c0_109, %c0_110] : memref<9x32x32xf32, #tpu.memory_space<vmem>>, vector<1x32x32xf32>
    %175 = vector.shape_cast %174 : vector<1x32x32xf32> to vector<32x32xf32>
    %cst_111 = arith.constant dense<0.000000e+00> : vector<32x16xf32>
    %176 = tpu.matmul %175, %143, %cst_111 {dimension_numbers = #tpu.dot_dimension_numbers<[1], [0], [0], [1], [0, 0, 1, 1], [], []>} : vector<32x32xf32>, vector<32x16xf32>, vector<32x16xf32> -> vector<32x16xf32>
    %177 = vector.extract_strided_slice %144 {offsets = [4, 0], sizes = [1, 16], strides = [1, 1]} : vector<9x16xf32> to vector<1x16xf32>
    %178 = vector.broadcast %177 : vector<1x16xf32> to vector<32x16xf32>
    %179 = arith.mulf %176, %178 : vector<32x16xf32>
    %180 = arith.addf %173, %179 : vector<32x16xf32>
    %c5 = arith.constant 5 : index
    %c0_112 = arith.constant 0 : index
    %c0_113 = arith.constant 0 : index
    %181 = vector.load %arg3[%c5, %c0_112, %c0_113] : memref<9x32x32xf32, #tpu.memory_space<vmem>>, vector<1x32x32xf32>
    %182 = vector.shape_cast %181 : vector<1x32x32xf32> to vector<32x32xf32>
    %cst_114 = arith.constant dense<0.000000e+00> : vector<32x16xf32>
    %183 = tpu.matmul %182, %143, %cst_114 {dimension_numbers = #tpu.dot_dimension_numbers<[1], [0], [0], [1], [0, 0, 1, 1], [], []>} : vector<32x32xf32>, vector<32x16xf32>, vector<32x16xf32> -> vector<32x16xf32>
    %184 = vector.extract_strided_slice %144 {offsets = [5, 0], sizes = [1, 16], strides = [1, 1]} : vector<9x16xf32> to vector<1x16xf32>
    %185 = vector.broadcast %184 : vector<1x16xf32> to vector<32x16xf32>
    %186 = arith.mulf %183, %185 : vector<32x16xf32>
    %187 = arith.addf %180, %186 : vector<32x16xf32>
    %c6 = arith.constant 6 : index
    %c0_115 = arith.constant 0 : index
    %c0_116 = arith.constant 0 : index
    %188 = vector.load %arg3[%c6, %c0_115, %c0_116] : memref<9x32x32xf32, #tpu.memory_space<vmem>>, vector<1x32x32xf32>
    %189 = vector.shape_cast %188 : vector<1x32x32xf32> to vector<32x32xf32>
    %cst_117 = arith.constant dense<0.000000e+00> : vector<32x16xf32>
    %190 = tpu.matmul %189, %143, %cst_117 {dimension_numbers = #tpu.dot_dimension_numbers<[1], [0], [0], [1], [0, 0, 1, 1], [], []>} : vector<32x32xf32>, vector<32x16xf32>, vector<32x16xf32> -> vector<32x16xf32>
    %191 = vector.extract_strided_slice %144 {offsets = [6, 0], sizes = [1, 16], strides = [1, 1]} : vector<9x16xf32> to vector<1x16xf32>
    %192 = vector.broadcast %191 : vector<1x16xf32> to vector<32x16xf32>
    %193 = arith.mulf %190, %192 : vector<32x16xf32>
    %194 = arith.addf %187, %193 : vector<32x16xf32>
    %c7 = arith.constant 7 : index
    %c0_118 = arith.constant 0 : index
    %c0_119 = arith.constant 0 : index
    %195 = vector.load %arg3[%c7, %c0_118, %c0_119] : memref<9x32x32xf32, #tpu.memory_space<vmem>>, vector<1x32x32xf32>
    %196 = vector.shape_cast %195 : vector<1x32x32xf32> to vector<32x32xf32>
    %cst_120 = arith.constant dense<0.000000e+00> : vector<32x16xf32>
    %197 = tpu.matmul %196, %143, %cst_120 {dimension_numbers = #tpu.dot_dimension_numbers<[1], [0], [0], [1], [0, 0, 1, 1], [], []>} : vector<32x32xf32>, vector<32x16xf32>, vector<32x16xf32> -> vector<32x16xf32>
    %198 = vector.extract_strided_slice %144 {offsets = [7, 0], sizes = [1, 16], strides = [1, 1]} : vector<9x16xf32> to vector<1x16xf32>
    %199 = vector.broadcast %198 : vector<1x16xf32> to vector<32x16xf32>
    %200 = arith.mulf %197, %199 : vector<32x16xf32>
    %201 = arith.addf %194, %200 : vector<32x16xf32>
    %c8 = arith.constant 8 : index
    %c0_121 = arith.constant 0 : index
    %c0_122 = arith.constant 0 : index
    %202 = vector.load %arg3[%c8, %c0_121, %c0_122] : memref<9x32x32xf32, #tpu.memory_space<vmem>>, vector<1x32x32xf32>
    %203 = vector.shape_cast %202 : vector<1x32x32xf32> to vector<32x32xf32>
    %cst_123 = arith.constant dense<0.000000e+00> : vector<32x16xf32>
    %204 = tpu.matmul %203, %143, %cst_123 {dimension_numbers = #tpu.dot_dimension_numbers<[1], [0], [0], [1], [0, 0, 1, 1], [], []>} : vector<32x32xf32>, vector<32x16xf32>, vector<32x16xf32> -> vector<32x16xf32>
    %205 = vector.extract_strided_slice %144 {offsets = [8, 0], sizes = [1, 16], strides = [1, 1]} : vector<9x16xf32> to vector<1x16xf32>
    %206 = vector.broadcast %205 : vector<1x16xf32> to vector<32x16xf32>
    %207 = arith.mulf %204, %206 : vector<32x16xf32>
    %208 = arith.addf %201, %207 : vector<32x16xf32>
    %c0_124 = arith.constant 0 : index
    %c0_125 = arith.constant 0 : index
    %209 = vector.load %arg21[%c0_124, %c0_125] : memref<1x16xf32, #tpu.memory_space<vmem>>, vector<1x16xf32>
    %210 = vector.broadcast %209 : vector<1x16xf32> to vector<32x16xf32>
    %211 = arith.addf %208, %210 : vector<32x16xf32>
    %cst_126 = arith.constant 5.000000e-01 : f32
    %212 = vector.broadcast %cst_126 : f32 to vector<32x16xf32>
    %213 = arith.mulf %212, %211 : vector<32x16xf32>
    %cst_127 = arith.constant 0.707106769 : f32
    %214 = vector.broadcast %cst_127 : f32 to vector<32x16xf32>
    %215 = arith.mulf %211, %214 : vector<32x16xf32>
    %216 = math.absf %215 : vector<32x16xf32>
    %cst_128 = arith.constant 0.327591091 : f32
    %217 = vector.broadcast %cst_128 : f32 to vector<32x16xf32>
    %218 = arith.mulf %217, %216 : vector<32x16xf32>
    %cst_129 = arith.constant 1.000000e+00 : f32
    %219 = vector.broadcast %cst_129 : f32 to vector<32x16xf32>
    %220 = arith.addf %219, %218 : vector<32x16xf32>
    %cst_130 = arith.constant 1.000000e+00 : f32
    %221 = vector.broadcast %cst_130 : f32 to vector<32x16xf32>
    %222 = arith.divf %221, %220 : vector<32x16xf32>
    %cst_131 = arith.constant 1.06140542 : f32
    %223 = vector.broadcast %cst_131 : f32 to vector<32x16xf32>
    %224 = arith.mulf %222, %223 : vector<32x16xf32>
    %cst_132 = arith.constant -1.45315206 : f32
    %225 = vector.broadcast %cst_132 : f32 to vector<32x16xf32>
    %226 = arith.addf %225, %224 : vector<32x16xf32>
    %227 = arith.mulf %222, %226 : vector<32x16xf32>
    %cst_133 = arith.constant 1.42141378 : f32
    %228 = vector.broadcast %cst_133 : f32 to vector<32x16xf32>
    %229 = arith.addf %228, %227 : vector<32x16xf32>
    %230 = arith.mulf %222, %229 : vector<32x16xf32>
    %cst_134 = arith.constant -0.284496725 : f32
    %231 = vector.broadcast %cst_134 : f32 to vector<32x16xf32>
    %232 = arith.addf %231, %230 : vector<32x16xf32>
    %233 = arith.mulf %222, %232 : vector<32x16xf32>
    %cst_135 = arith.constant 0.254829586 : f32
    %234 = vector.broadcast %cst_135 : f32 to vector<32x16xf32>
    %235 = arith.addf %234, %233 : vector<32x16xf32>
    %236 = arith.mulf %222, %235 : vector<32x16xf32>
    %cst_136 = arith.constant 0.000000e+00 : f32
    %237 = vector.broadcast %cst_136 : f32 to vector<32x16xf32>
    %238 = arith.subf %237, %216 : vector<32x16xf32>
    %239 = arith.mulf %238, %216 : vector<32x16xf32>
    %240 = math.exp %239 : vector<32x16xf32>
    %241 = arith.mulf %236, %240 : vector<32x16xf32>
    %cst_137 = arith.constant 1.000000e+00 : f32
    %242 = vector.broadcast %cst_137 : f32 to vector<32x16xf32>
    %243 = arith.subf %242, %241 : vector<32x16xf32>
    %cst_138 = arith.constant 0.000000e+00 : f32
    %244 = vector.broadcast %cst_138 : f32 to vector<32x16xf32>
    %245 = arith.cmpf oge, %215, %244 : vector<32x16xf32>
    %cst_139 = arith.constant 0.000000e+00 : f32
    %246 = vector.broadcast %cst_139 : f32 to vector<32x16xf32>
    %247 = arith.subf %246, %243 : vector<32x16xf32>
    %248 = arith.select %245, %243, %247 : vector<32x16xi1>, vector<32x16xf32>
    %cst_140 = arith.constant 1.000000e+00 : f32
    %249 = vector.broadcast %cst_140 : f32 to vector<32x16xf32>
    %250 = arith.addf %249, %248 : vector<32x16xf32>
    %251 = arith.mulf %213, %250 : vector<32x16xf32>
    %c0_141 = arith.constant 0 : index
    %c0_142 = arith.constant 0 : index
    %252 = vector.load %arg22[%c0_141, %c0_142] : memref<16x8xf32, #tpu.memory_space<vmem>>, vector<16x8xf32>
    %cst_143 = arith.constant dense<0.000000e+00> : vector<32x8xf32>
    %253 = tpu.matmul %251, %252, %cst_143 {dimension_numbers = #tpu.dot_dimension_numbers<[1], [0], [0], [1], [0, 0, 1, 1], [], []>} : vector<32x16xf32>, vector<16x8xf32>, vector<32x8xf32> -> vector<32x8xf32>
    %254 = arith.addf %114, %253 : vector<32x8xf32>
    %c0_144 = arith.constant 0 : index
    %c0_145 = arith.constant 0 : index
    %255 = vector.load %arg23[%c0_144, %c0_145] : memref<1x8xf32, #tpu.memory_space<vmem>>, vector<1x8xf32>
    %256 = vector.broadcast %255 : vector<1x8xf32> to vector<32x8xf32>
    %257 = arith.addf %254, %256 : vector<32x8xf32>
    %c0_146 = arith.constant 0 : index
    %c0_147 = arith.constant 0 : index
    %258 = vector.load %arg24[%c0_146, %c0_147] : memref<1x8xf32, #tpu.memory_space<vmem>>, vector<1x8xf32>
    %c0_148 = arith.constant 0 : index
    %c0_149 = arith.constant 0 : index
    %259 = vector.load %arg25[%c0_148, %c0_149] : memref<1x8xf32, #tpu.memory_space<vmem>>, vector<1x8xf32>
    %cst_150 = arith.constant dense<0.000000e+00> : vector<32xf32>
    %260 = vector.multi_reduction <add>, %257, %cst_150 [1] : vector<32x8xf32> to vector<32xf32>
    %261 = vector.shape_cast %260 : vector<32xf32> to vector<32x1xf32>
    %cst_151 = arith.constant 8.000000e+00 : f32
    %262 = vector.broadcast %cst_151 : f32 to vector<32x1xf32>
    %263 = arith.divf %261, %262 : vector<32x1xf32>
    %264 = vector.broadcast %263 : vector<32x1xf32> to vector<32x8xf32>
    %265 = arith.subf %257, %264 : vector<32x8xf32>
    %266 = arith.mulf %265, %265 : vector<32x8xf32>
    %cst_152 = arith.constant dense<0.000000e+00> : vector<32xf32>
    %267 = vector.multi_reduction <add>, %266, %cst_152 [1] : vector<32x8xf32> to vector<32xf32>
    %268 = vector.shape_cast %267 : vector<32xf32> to vector<32x1xf32>
    %cst_153 = arith.constant 8.000000e+00 : f32
    %269 = vector.broadcast %cst_153 : f32 to vector<32x1xf32>
    %270 = arith.divf %268, %269 : vector<32x1xf32>
    %271 = vector.broadcast %263 : vector<32x1xf32> to vector<32x8xf32>
    %272 = arith.subf %257, %271 : vector<32x8xf32>
    %cst_154 = arith.constant 9.99999997E-7 : f32
    %273 = vector.broadcast %cst_154 : f32 to vector<32x1xf32>
    %274 = arith.addf %270, %273 : vector<32x1xf32>
    %275 = math.rsqrt %274 : vector<32x1xf32>
    %276 = vector.broadcast %275 : vector<32x1xf32> to vector<32x8xf32>
    %277 = arith.mulf %272, %276 : vector<32x8xf32>
    %278 = vector.broadcast %258 : vector<1x8xf32> to vector<32x8xf32>
    %279 = arith.mulf %277, %278 : vector<32x8xf32>
    %280 = vector.broadcast %259 : vector<1x8xf32> to vector<32x8xf32>
    %281 = arith.addf %279, %280 : vector<32x8xf32>
    %c0_155 = arith.constant 0 : index
    %c0_156 = arith.constant 0 : index
    %282 = vector.load %arg26[%c0_155, %c0_156] : memref<32x8xf32, #tpu.memory_space<vmem>>, vector<32x8xf32>
    tpu.vector_store %arg26[%c0_155, %c0_156], %281 {strides = array<i32>} : memref<32x8xf32, #tpu.memory_space<vmem>>, vector<32x8xf32>,
    return
  }
  func.func @transform_0(%arg0: i32) -> (i32, i32) {
    %c0_i32 = arith.constant 0 : i32
    %c0_i32_0 = arith.constant 0 : i32
    return %arg0, %c0_i32 : i32, i32
  }
  func.func @transform_1(%arg0: i32) -> (i32, i32) {
    %c0_i32 = arith.constant 0 : i32
    %c0_i32_0 = arith.constant 0 : i32
    %c0_i32_1 = arith.constant 0 : i32
    return %c0_i32, %c0_i32_0 : i32, i32
  }
  func.func @transform_2(%arg0: i32) -> (i32, i32, i32) {
    %c0_i32 = arith.constant 0 : i32
    %c0_i32_0 = arith.constant 0 : i32
    %c0_i32_1 = arith.constant 0 : i32
    %c0_i32_2 = arith.constant 0 : i32
    return %c0_i32, %c0_i32_0, %c0_i32_1 : i32, i32, i32
  }
  func.func @transform_3(%arg0: i32) -> (i32, i32, i32) {
    %c0_i32 = arith.constant 0 : i32
    %c0_i32_0 = arith.constant 0 : i32
    %c0_i32_1 = arith.constant 0 : i32
    %c0_i32_2 = arith.constant 0 : i32
    return %c0_i32, %c0_i32_0, %c0_i32_1 : i32, i32, i32
  }
  func.func @transform_4(%arg0: i32) -> (i32, i32, i32) {
    %c0_i32 = arith.constant 0 : i32
    %c0_i32_0 = arith.constant 0 : i32
    %c0_i32_1 = arith.constant 0 : i32
    %c0_i32_2 = arith.constant 0 : i32
    return %c0_i32, %c0_i32_0, %c0_i32_1 : i32, i32, i32
  }
  func.func @transform_5(%arg0: i32) -> (i32, i32) {
    %c0_i32 = arith.constant 0 : i32
    %c0_i32_0 = arith.constant 0 : i32
    %c0_i32_1 = arith.constant 0 : i32
    return %c0_i32, %c0_i32_0 : i32, i32
  }
  func.func @transform_6(%arg0: i32) -> (i32, i32) {
    %c0_i32 = arith.constant 0 : i32
    %c0_i32_0 = arith.constant 0 : i32
    %c0_i32_1 = arith.constant 0 : i32
    return %c0_i32, %c0_i32_0 : i32, i32
  }
  func.func @transform_7(%arg0: i32) -> (i32, i32) {
    %c0_i32 = arith.constant 0 : i32
    %c0_i32_0 = arith.constant 0 : i32
    %c0_i32_1 = arith.constant 0 : i32
    return %c0_i32, %c0_i32_0 : i32, i32
  }
  func.func @transform_8(%arg0: i32) -> (i32, i32) {
    %c0_i32 = arith.constant 0 : i32
    %c0_i32_0 = arith.constant 0 : i32
    %c0_i32_1 = arith.constant 0 : i32
    return %c0_i32, %c0_i32_0 : i32, i32
  }
  func.func @transform_9(%arg0: i32) -> (i32, i32) {
    %c0_i32 = arith.constant 0 : i32
    %c0_i32_0 = arith.constant 0 : i32
    %c0_i32_1 = arith.constant 0 : i32
    return %c0_i32, %c0_i32_0 : i32, i32
  }
  func.func @transform_10(%arg0: i32) -> (i32, i32, i32) {
    %c0_i32 = arith.constant 0 : i32
    %c0_i32_0 = arith.constant 0 : i32
    %c0_i32_1 = arith.constant 0 : i32
    %c0_i32_2 = arith.constant 0 : i32
    return %c0_i32, %c0_i32_0, %c0_i32_1 : i32, i32, i32
  }
  func.func @transform_11(%arg0: i32) -> (i32, i32, i32) {
    %c0_i32 = arith.constant 0 : i32
    %c0_i32_0 = arith.constant 0 : i32
    %c0_i32_1 = arith.constant 0 : i32
    %c0_i32_2 = arith.constant 0 : i32
    return %c0_i32, %c0_i32_0, %c0_i32_1 : i32, i32, i32
  }
  func.func @transform_12(%arg0: i32) -> (i32, i32, i32) {
    %c0_i32 = arith.constant 0 : i32
    %c0_i32_0 = arith.constant 0 : i32
    %c0_i32_1 = arith.constant 0 : i32
    %c0_i32_2 = arith.constant 0 : i32
    return %c0_i32, %c0_i32_0, %c0_i32_1 : i32, i32, i32
  }
  func.func @transform_13(%arg0: i32) -> (i32, i32, i32) {
    %c0_i32 = arith.constant 0 : i32
    %c0_i32_0 = arith.constant 0 : i32
    %c0_i32_1 = arith.constant 0 : i32
    %c0_i32_2 = arith.constant 0 : i32
    return %c0_i32, %c0_i32_0, %c0_i32_1 : i32, i32, i32
  }
  func.func @transform_14(%arg0: i32) -> (i32, i32) {
    %c0_i32 = arith.constant 0 : i32
    %c0_i32_0 = arith.constant 0 : i32
    %c0_i32_1 = arith.constant 0 : i32
    return %c0_i32, %c0_i32_0 : i32, i32
  }
  func.func @transform_15(%arg0: i32) -> (i32, i32) {
    %c0_i32 = arith.constant 0 : i32
    %c0_i32_0 = arith.constant 0 : i32
    %c0_i32_1 = arith.constant 0 : i32
    return %c0_i32, %c0_i32_0 : i32, i32
  }
  func.func @transform_16(%arg0: i32) -> (i32, i32) {
    %c0_i32 = arith.constant 0 : i32
    %c0_i32_0 = arith.constant 0 : i32
    %c0_i32_1 = arith.constant 0 : i32
    return %c0_i32, %c0_i32_0 : i32, i32
  }
  func.func @transform_17(%arg0: i32) -> (i32, i32) {
    %c0_i32 = arith.constant 0 : i32
    %c0_i32_0 = arith.constant 0 : i32
    %c0_i32_1 = arith.constant 0 : i32
    return %c0_i32, %c0_i32_0 : i32, i32
  }
  func.func @transform_18(%arg0: i32) -> (i32, i32) {
    %c0_i32 = arith.constant 0 : i32
    %c0_i32_0 = arith.constant 0 : i32
    %c0_i32_1 = arith.constant 0 : i32
    return %c0_i32, %c0_i32_0 : i32, i32
  }
  func.func @transform_19(%arg0: i32) -> (i32, i32) {
    %c0_i32 = arith.constant 0 : i32
    %c0_i32_0 = arith.constant 0 : i32
    %c0_i32_1 = arith.constant 0 : i32
    return %c0_i32, %c0_i32_0 : i32, i32
  }
  func.func @transform_20(%arg0: i32) -> (i32, i32) {
    %c0_i32 = arith.constant 0 : i32
    %c0_i32_0 = arith.constant 0 : i32
    %c0_i32_1 = arith.constant 0 : i32
    return %c0_i32, %c0_i32_0 : i32, i32
  }
  func.func @transform_21(%arg0: i32) -> (i32, i32) {
    %c0_i32 = arith.constant 0 : i32
    %c0_i32_0 = arith.constant 0 : i32
    %c0_i32_1 = arith.constant 0 : i32
    return %c0_i32, %c0_i32_0 : i32, i32
  }
  func.func @transform_22(%arg0: i32) -> (i32, i32) {
    %c0_i32 = arith.constant 0 : i32
    %c0_i32_0 = arith.constant 0 : i32
    %c0_i32_1 = arith.constant 0 : i32
    return %c0_i32, %c0_i32_0 : i32, i32
  }
  func.func @transform_23(%arg0: i32) -> (i32, i32) {
    %c0_i32 = arith.constant 0 : i32
    %c0_i32_0 = arith.constant 0 : i32
    %c0_i32_1 = arith.constant 0 : i32
    return %c0_i32, %c0_i32_0 : i32, i32
  }
  func.func @transform_24(%arg0: i32) -> (i32, i32) {
    %c0_i32 = arith.constant 0 : i32
    %c0_i32_0 = arith.constant 0 : i32
    %c0_i32_1 = arith.constant 0 : i32
    return %c0_i32, %c0_i32_0 : i32, i32
  }
  func.func @transform_25(%arg0: i32) -> (i32, i32) {
    %c0_i32 = arith.constant 0 : i32
    %c0_i32_0 = arith.constant 0 : i32
    return %arg0, %c0_i32 : i32, i32
  }
}

module attributes {stable_mosaic.version = 11 : i64} {
  func.func @_patch_embed_kernel(%arg0: i32, %arg1: memref<8x72xf32, #tpu.memory_space<vmem>>, %arg2: memref<72x16xf32, #tpu.memory_space<vmem>>, %arg3: memref<1x16xf32, #tpu.memory_space<vmem>>, %arg4: memref<1x16xf32, #tpu.memory_space<vmem>>, %arg5: memref<1x16xf32, #tpu.memory_space<vmem>>, %arg6: memref<8x16xf32, #tpu.memory_space<vmem>>) attributes {dimension_semantics = [#tpu.dimension_semantics<parallel>], iteration_bounds = array<i64: 2>, scalar_prefetch = 0 : i64, scratch_operands = 0 : i64, tpu.core_type = #tpu.core_type<tc>, window_params = [{transform_indices = @transform_0, window_bounds = array<i64: 8, 72>}, {pipeline_mode = #tpu.pipeline_mode<synchronous>, transform_indices = @transform_1, window_bounds = array<i64: 72, 16>}, {pipeline_mode = #tpu.pipeline_mode<synchronous>, transform_indices = @transform_2, window_bounds = array<i64: 1, 16>}, {pipeline_mode = #tpu.pipeline_mode<synchronous>, transform_indices = @transform_3, window_bounds = array<i64: 1, 16>}, {pipeline_mode = #tpu.pipeline_mode<synchronous>, transform_indices = @transform_4, window_bounds = array<i64: 1, 16>}, {transform_indices = @transform_5, window_bounds = array<i64: 8, 16>}]} {
    %c0 = arith.constant 0 : index
    %c0_0 = arith.constant 0 : index
    %0 = vector.load %arg1[%c0, %c0_0] : memref<8x72xf32, #tpu.memory_space<vmem>>, vector<8x72xf32>
    %c0_1 = arith.constant 0 : index
    %c0_2 = arith.constant 0 : index
    %1 = vector.load %arg2[%c0_1, %c0_2] : memref<72x16xf32, #tpu.memory_space<vmem>>, vector<72x16xf32>
    %cst = arith.constant dense<0.000000e+00> : vector<8x16xf32>
    %2 = tpu.matmul %0, %1, %cst {dimension_numbers = #tpu.dot_dimension_numbers<[1], [0], [0], [1], [0, 0, 1, 1], [], []>} : vector<8x72xf32>, vector<72x16xf32>, vector<8x16xf32> -> vector<8x16xf32>
    %c0_3 = arith.constant 0 : index
    %c0_4 = arith.constant 0 : index
    %3 = vector.load %arg3[%c0_3, %c0_4] : memref<1x16xf32, #tpu.memory_space<vmem>>, vector<1x16xf32>
    %4 = vector.broadcast %3 : vector<1x16xf32> to vector<8x16xf32>
    %5 = arith.addf %2, %4 : vector<8x16xf32>
    %c0_5 = arith.constant 0 : index
    %c0_6 = arith.constant 0 : index
    %6 = vector.load %arg4[%c0_5, %c0_6] : memref<1x16xf32, #tpu.memory_space<vmem>>, vector<1x16xf32>
    %c0_7 = arith.constant 0 : index
    %c0_8 = arith.constant 0 : index
    %7 = vector.load %arg5[%c0_7, %c0_8] : memref<1x16xf32, #tpu.memory_space<vmem>>, vector<1x16xf32>
    %cst_9 = arith.constant dense<0.000000e+00> : vector<8xf32>
    %8 = vector.multi_reduction <add>, %5, %cst_9 [1] : vector<8x16xf32> to vector<8xf32>
    %9 = vector.shape_cast %8 : vector<8xf32> to vector<8x1xf32>
    %cst_10 = arith.constant 1.600000e+01 : f32
    %10 = vector.broadcast %cst_10 : f32 to vector<8x1xf32>
    %11 = arith.divf %9, %10 : vector<8x1xf32>
    %12 = vector.broadcast %11 : vector<8x1xf32> to vector<8x16xf32>
    %13 = arith.subf %5, %12 : vector<8x16xf32>
    %14 = arith.mulf %13, %13 : vector<8x16xf32>
    %cst_11 = arith.constant dense<0.000000e+00> : vector<8xf32>
    %15 = vector.multi_reduction <add>, %14, %cst_11 [1] : vector<8x16xf32> to vector<8xf32>
    %16 = vector.shape_cast %15 : vector<8xf32> to vector<8x1xf32>
    %cst_12 = arith.constant 1.600000e+01 : f32
    %17 = vector.broadcast %cst_12 : f32 to vector<8x1xf32>
    %18 = arith.divf %16, %17 : vector<8x1xf32>
    %19 = vector.broadcast %11 : vector<8x1xf32> to vector<8x16xf32>
    %20 = arith.subf %5, %19 : vector<8x16xf32>
    %cst_13 = arith.constant 9.99999997E-7 : f32
    %21 = vector.broadcast %cst_13 : f32 to vector<8x1xf32>
    %22 = arith.addf %18, %21 : vector<8x1xf32>
    %23 = math.rsqrt %22 : vector<8x1xf32>
    %24 = vector.broadcast %23 : vector<8x1xf32> to vector<8x16xf32>
    %25 = arith.mulf %20, %24 : vector<8x16xf32>
    %26 = vector.broadcast %6 : vector<1x16xf32> to vector<8x16xf32>
    %27 = arith.mulf %25, %26 : vector<8x16xf32>
    %28 = vector.broadcast %7 : vector<1x16xf32> to vector<8x16xf32>
    %29 = arith.addf %27, %28 : vector<8x16xf32>
    %c0_14 = arith.constant 0 : index
    %c0_15 = arith.constant 0 : index
    %30 = vector.load %arg6[%c0_14, %c0_15] : memref<8x16xf32, #tpu.memory_space<vmem>>, vector<8x16xf32>
    tpu.vector_store %arg6[%c0_14, %c0_15], %29 {strides = array<i32>} : memref<8x16xf32, #tpu.memory_space<vmem>>, vector<8x16xf32>,
    return
  }
  func.func @transform_0(%arg0: i32) -> (i32, i32) {
    %c0_i32 = arith.constant 0 : i32
    %c0_i32_0 = arith.constant 0 : i32
    return %arg0, %c0_i32 : i32, i32
  }
  func.func @transform_1(%arg0: i32) -> (i32, i32) {
    %c0_i32 = arith.constant 0 : i32
    %c0_i32_0 = arith.constant 0 : i32
    %c0_i32_1 = arith.constant 0 : i32
    return %c0_i32, %c0_i32_0 : i32, i32
  }
  func.func @transform_2(%arg0: i32) -> (i32, i32) {
    %c0_i32 = arith.constant 0 : i32
    %c0_i32_0 = arith.constant 0 : i32
    %c0_i32_1 = arith.constant 0 : i32
    return %c0_i32, %c0_i32_0 : i32, i32
  }
  func.func @transform_3(%arg0: i32) -> (i32, i32) {
    %c0_i32 = arith.constant 0 : i32
    %c0_i32_0 = arith.constant 0 : i32
    %c0_i32_1 = arith.constant 0 : i32
    return %c0_i32, %c0_i32_0 : i32, i32
  }
  func.func @transform_4(%arg0: i32) -> (i32, i32) {
    %c0_i32 = arith.constant 0 : i32
    %c0_i32_0 = arith.constant 0 : i32
    %c0_i32_1 = arith.constant 0 : i32
    return %c0_i32, %c0_i32_0 : i32, i32
  }
  func.func @transform_5(%arg0: i32) -> (i32, i32) {
    %c0_i32 = arith.constant 0 : i32
    %c0_i32_0 = arith.constant 0 : i32
    return %arg0, %c0_i32 : i32, i32
  }
}

module attributes {stable_mosaic.version = 11 : i64} {
  func.func @kernel(%arg0: i32, %arg1: memref<8x16xf32, #tpu.memory_space<vmem>>, %arg2: memref<8x8xf32, #tpu.memory_space<vmem>>, %arg3: memref<9x8x8xf32, #tpu.memory_space<vmem>>, %arg4: memref<1x16xf32, #tpu.memory_space<vmem>>, %arg5: memref<1x16xf32, #tpu.memory_space<vmem>>, %arg6: memref<2x16x8xf32, #tpu.memory_space<vmem>>, %arg7: memref<2x16x8xf32, #tpu.memory_space<vmem>>, %arg8: memref<2x16x8xf32, #tpu.memory_space<vmem>>, %arg9: memref<2x8x16xf32, #tpu.memory_space<vmem>>, %arg10: memref<1x16xf32, #tpu.memory_space<vmem>>, %arg11: memref<1x16xf32, #tpu.memory_space<vmem>>, %arg12: memref<1x16xf32, #tpu.memory_space<vmem>>, %arg13: memref<16x32xf32, #tpu.memory_space<vmem>>, %arg14: memref<1x32xf32, #tpu.memory_space<vmem>>, %arg15: memref<9x32xf32, #tpu.memory_space<vmem>>, %arg16: memref<1x32xf32, #tpu.memory_space<vmem>>, %arg17: memref<32x16xf32, #tpu.memory_space<vmem>>, %arg18: memref<1x16xf32, #tpu.memory_space<vmem>>, %arg19: memref<1x16xf32, #tpu.memory_space<vmem>>, %arg20: memref<1x16xf32, #tpu.memory_space<vmem>>, %arg21: memref<8x16xf32, #tpu.memory_space<vmem>>) attributes {dimension_semantics = [#tpu.dimension_semantics<parallel>], iteration_bounds = array<i64: 2>, scalar_prefetch = 0 : i64, scratch_operands = 0 : i64, tpu.core_type = #tpu.core_type<tc>, window_params = [{transform_indices = @transform_0, window_bounds = array<i64: 8, 16>}, {pipeline_mode = #tpu.pipeline_mode<synchronous>, transform_indices = @transform_1, window_bounds = array<i64: 8, 8>}, {pipeline_mode = #tpu.pipeline_mode<synchronous>, transform_indices = @transform_2, window_bounds = array<i64: 9, 8, 8>}, {pipeline_mode = #tpu.pipeline_mode<synchronous>, transform_indices = @transform_3, window_bounds = array<i64: 1, 16>}, {pipeline_mode = #tpu.pipeline_mode<synchronous>, transform_indices = @transform_4, window_bounds = array<i64: 1, 16>}, {pipeline_mode = #tpu.pipeline_mode<synchronous>, transform_indices = @transform_5, window_bounds = array<i64: 2, 16, 8>}, {pipeline_mode = #tpu.pipeline_mode<synchronous>, transform_indices = @transform_6, window_bounds = array<i64: 2, 16, 8>}, {pipeline_mode = #tpu.pipeline_mode<synchronous>, transform_indices = @transform_7, window_bounds = array<i64: 2, 16, 8>}, {pipeline_mode = #tpu.pipeline_mode<synchronous>, transform_indices = @transform_8, window_bounds = array<i64: 2, 8, 16>}, {pipeline_mode = #tpu.pipeline_mode<synchronous>, transform_indices = @transform_9, window_bounds = array<i64: 1, 16>}, {pipeline_mode = #tpu.pipeline_mode<synchronous>, transform_indices = @transform_10, window_bounds = array<i64: 1, 16>}, {pipeline_mode = #tpu.pipeline_mode<synchronous>, transform_indices = @transform_11, window_bounds = array<i64: 1, 16>}, {pipeline_mode = #tpu.pipeline_mode<synchronous>, transform_indices = @transform_12, window_bounds = array<i64: 16, 32>}, {pipeline_mode = #tpu.pipeline_mode<synchronous>, transform_indices = @transform_13, window_bounds = array<i64: 1, 32>}, {pipeline_mode = #tpu.pipeline_mode<synchronous>, transform_indices = @transform_14, window_bounds = array<i64: 9, 32>}, {pipeline_mode = #tpu.pipeline_mode<synchronous>, transform_indices = @transform_15, window_bounds = array<i64: 1, 32>}, {pipeline_mode = #tpu.pipeline_mode<synchronous>, transform_indices = @transform_16, window_bounds = array<i64: 32, 16>}, {pipeline_mode = #tpu.pipeline_mode<synchronous>, transform_indices = @transform_17, window_bounds = array<i64: 1, 16>}, {pipeline_mode = #tpu.pipeline_mode<synchronous>, transform_indices = @transform_18, window_bounds = array<i64: 1, 16>}, {pipeline_mode = #tpu.pipeline_mode<synchronous>, transform_indices = @transform_19, window_bounds = array<i64: 1, 16>}, {transform_indices = @transform_20, window_bounds = array<i64: 8, 16>}]} {
    %c0 = arith.constant 0 : index
    %c0_0 = arith.constant 0 : index
    %0 = vector.load %arg1[%c0, %c0_0] : memref<8x16xf32, #tpu.memory_space<vmem>>, vector<8x16xf32>
    %c0_1 = arith.constant 0 : index
    %c0_2 = arith.constant 0 : index
    %1 = vector.load %arg4[%c0_1, %c0_2] : memref<1x16xf32, #tpu.memory_space<vmem>>, vector<1x16xf32>
    %c0_3 = arith.constant 0 : index
    %c0_4 = arith.constant 0 : index
    %2 = vector.load %arg5[%c0_3, %c0_4] : memref<1x16xf32, #tpu.memory_space<vmem>>, vector<1x16xf32>
    %cst = arith.constant dense<0.000000e+00> : vector<8xf32>
    %3 = vector.multi_reduction <add>, %0, %cst [1] : vector<8x16xf32> to vector<8xf32>
    %4 = vector.shape_cast %3 : vector<8xf32> to vector<8x1xf32>
    %cst_5 = arith.constant 1.600000e+01 : f32
    %5 = vector.broadcast %cst_5 : f32 to vector<8x1xf32>
    %6 = arith.divf %4, %5 : vector<8x1xf32>
    %7 = vector.broadcast %6 : vector<8x1xf32> to vector<8x16xf32>
    %8 = arith.subf %0, %7 : vector<8x16xf32>
    %9 = arith.mulf %8, %8 : vector<8x16xf32>
    %cst_6 = arith.constant dense<0.000000e+00> : vector<8xf32>
    %10 = vector.multi_reduction <add>, %9, %cst_6 [1] : vector<8x16xf32> to vector<8xf32>
    %11 = vector.shape_cast %10 : vector<8xf32> to vector<8x1xf32>
    %cst_7 = arith.constant 1.600000e+01 : f32
    %12 = vector.broadcast %cst_7 : f32 to vector<8x1xf32>
    %13 = arith.divf %11, %12 : vector<8x1xf32>
    %14 = vector.broadcast %6 : vector<8x1xf32> to vector<8x16xf32>
    %15 = arith.subf %0, %14 : vector<8x16xf32>
    %cst_8 = arith.constant 9.99999997E-7 : f32
    %16 = vector.broadcast %cst_8 : f32 to vector<8x1xf32>
    %17 = arith.addf %13, %16 : vector<8x1xf32>
    %18 = math.rsqrt %17 : vector<8x1xf32>
    %19 = vector.broadcast %18 : vector<8x1xf32> to vector<8x16xf32>
    %20 = arith.mulf %15, %19 : vector<8x16xf32>
    %21 = vector.broadcast %1 : vector<1x16xf32> to vector<8x16xf32>
    %22 = arith.mulf %20, %21 : vector<8x16xf32>
    %23 = vector.broadcast %2 : vector<1x16xf32> to vector<8x16xf32>
    %24 = arith.addf %22, %23 : vector<8x16xf32>
    %c0_9 = arith.constant 0 : index
    %c0_10 = arith.constant 0 : index
    %25 = vector.load %arg2[%c0_9, %c0_10] : memref<8x8xf32, #tpu.memory_space<vmem>>, vector<8x8xf32>
    %cst_11 = arith.constant 0.000000e+00 : f32
    %26 = vector.broadcast %cst_11 : f32 to vector<8x16xf32>
    %c0_12 = arith.constant 0 : index
    %c0_13 = arith.constant 0 : index
    %c0_14 = arith.constant 0 : index
    %27 = vector.load %arg6[%c0_12, %c0_13, %c0_14] : memref<2x16x8xf32, #tpu.memory_space<vmem>>, vector<1x16x8xf32>
    %28 = vector.shape_cast %27 : vector<1x16x8xf32> to vector<16x8xf32>
    %cst_15 = arith.constant dense<0.000000e+00> : vector<8x8xf32>
    %29 = tpu.matmul %24, %28, %cst_15 {dimension_numbers = #tpu.dot_dimension_numbers<[1], [0], [0], [1], [0, 0, 1, 1], [], []>} : vector<8x16xf32>, vector<16x8xf32>, vector<8x8xf32> -> vector<8x8xf32>
    %c0_16 = arith.constant 0 : index
    %c0_17 = arith.constant 0 : index
    %c0_18 = arith.constant 0 : index
    %30 = vector.load %arg7[%c0_16, %c0_17, %c0_18] : memref<2x16x8xf32, #tpu.memory_space<vmem>>, vector<1x16x8xf32>
    %31 = vector.shape_cast %30 : vector<1x16x8xf32> to vector<16x8xf32>
    %cst_19 = arith.constant dense<0.000000e+00> : vector<8x8xf32>
    %32 = tpu.matmul %24, %31, %cst_19 {dimension_numbers = #tpu.dot_dimension_numbers<[1], [0], [0], [1], [0, 0, 1, 1], [], []>} : vector<8x16xf32>, vector<16x8xf32>, vector<8x8xf32> -> vector<8x8xf32>
    %c0_20 = arith.constant 0 : index
    %c0_21 = arith.constant 0 : index
    %c0_22 = arith.constant 0 : index
    %33 = vector.load %arg8[%c0_20, %c0_21, %c0_22] : memref<2x16x8xf32, #tpu.memory_space<vmem>>, vector<1x16x8xf32>
    %34 = vector.shape_cast %33 : vector<1x16x8xf32> to vector<16x8xf32>
    %cst_23 = arith.constant dense<0.000000e+00> : vector<8x8xf32>
    %35 = tpu.matmul %24, %34, %cst_23 {dimension_numbers = #tpu.dot_dimension_numbers<[1], [0], [0], [1], [0, 0, 1, 1], [], []>} : vector<8x16xf32>, vector<16x8xf32>, vector<8x8xf32> -> vector<8x8xf32>
    %cst_24 = arith.constant dense<0.000000e+00> : vector<8x8xf32>
    %36 = tpu.matmul %29, %32, %cst_24 {dimension_numbers = #tpu.dot_dimension_numbers<[1], [1], [0], [0], [0, 0, 1, 0], [], []>} : vector<8x8xf32>, vector<8x8xf32>, vector<8x8xf32> -> vector<8x8xf32>
    %cst_25 = arith.constant 0.353553385 : f32
    %37 = vector.broadcast %cst_25 : f32 to vector<8x8xf32>
    %38 = arith.mulf %36, %37 : vector<8x8xf32>
    %39 = arith.addf %38, %25 : vector<8x8xf32>
    %cst_26 = arith.constant dense<0xFF800000> : vector<8xf32>
    %40 = vector.multi_reduction <maximumf>, %39, %cst_26 [1] : vector<8x8xf32> to vector<8xf32>
    %41 = vector.shape_cast %40 : vector<8xf32> to vector<8x1xf32>
    %42 = vector.broadcast %41 : vector<8x1xf32> to vector<8x8xf32>
    %43 = arith.subf %39, %42 : vector<8x8xf32>
    %44 = math.exp %43 : vector<8x8xf32>
    %cst_27 = arith.constant dense<0.000000e+00> : vector<8xf32>
    %45 = vector.multi_reduction <add>, %44, %cst_27 [1] : vector<8x8xf32> to vector<8xf32>
    %46 = vector.shape_cast %45 : vector<8xf32> to vector<8x1xf32>
    %47 = tpu.reciprocal %46 {approx = true} : vector<8x1xf32> -> vector<8x1xf32>
    %48 = vector.broadcast %47 : vector<8x1xf32> to vector<8x8xf32>
    %49 = arith.mulf %44, %48 : vector<8x8xf32>
    %cst_28 = arith.constant dense<0.000000e+00> : vector<8x8xf32>
    %50 = tpu.matmul %49, %35, %cst_28 {dimension_numbers = #tpu.dot_dimension_numbers<[1], [0], [0], [1], [0, 0, 1, 1], [], []>} : vector<8x8xf32>, vector<8x8xf32>, vector<8x8xf32> -> vector<8x8xf32>
    %c0_29 = arith.constant 0 : index
    %c0_30 = arith.constant 0 : index
    %c0_31 = arith.constant 0 : index
    %51 = vector.load %arg9[%c0_29, %c0_30, %c0_31] : memref<2x8x16xf32, #tpu.memory_space<vmem>>, vector<1x8x16xf32>
    %52 = vector.shape_cast %51 : vector<1x8x16xf32> to vector<8x16xf32>
    %cst_32 = arith.constant dense<0.000000e+00> : vector<8x16xf32>
    %53 = tpu.matmul %50, %52, %cst_32 {dimension_numbers = #tpu.dot_dimension_numbers<[1], [0], [0], [1], [0, 0, 1, 1], [], []>} : vector<8x8xf32>, vector<8x16xf32>, vector<8x16xf32> -> vector<8x16xf32>
    %54 = arith.addf %26, %53 : vector<8x16xf32>
    %c1 = arith.constant 1 : index
    %c0_33 = arith.constant 0 : index
    %c0_34 = arith.constant 0 : index
    %55 = vector.load %arg6[%c1, %c0_33, %c0_34] : memref<2x16x8xf32, #tpu.memory_space<vmem>>, vector<1x16x8xf32>
    %56 = vector.shape_cast %55 : vector<1x16x8xf32> to vector<16x8xf32>
    %cst_35 = arith.constant dense<0.000000e+00> : vector<8x8xf32>
    %57 = tpu.matmul %24, %56, %cst_35 {dimension_numbers = #tpu.dot_dimension_numbers<[1], [0], [0], [1], [0, 0, 1, 1], [], []>} : vector<8x16xf32>, vector<16x8xf32>, vector<8x8xf32> -> vector<8x8xf32>
    %c1_36 = arith.constant 1 : index
    %c0_37 = arith.constant 0 : index
    %c0_38 = arith.constant 0 : index
    %58 = vector.load %arg7[%c1_36, %c0_37, %c0_38] : memref<2x16x8xf32, #tpu.memory_space<vmem>>, vector<1x16x8xf32>
    %59 = vector.shape_cast %58 : vector<1x16x8xf32> to vector<16x8xf32>
    %cst_39 = arith.constant dense<0.000000e+00> : vector<8x8xf32>
    %60 = tpu.matmul %24, %59, %cst_39 {dimension_numbers = #tpu.dot_dimension_numbers<[1], [0], [0], [1], [0, 0, 1, 1], [], []>} : vector<8x16xf32>, vector<16x8xf32>, vector<8x8xf32> -> vector<8x8xf32>
    %c1_40 = arith.constant 1 : index
    %c0_41 = arith.constant 0 : index
    %c0_42 = arith.constant 0 : index
    %61 = vector.load %arg8[%c1_40, %c0_41, %c0_42] : memref<2x16x8xf32, #tpu.memory_space<vmem>>, vector<1x16x8xf32>
    %62 = vector.shape_cast %61 : vector<1x16x8xf32> to vector<16x8xf32>
    %cst_43 = arith.constant dense<0.000000e+00> : vector<8x8xf32>
    %63 = tpu.matmul %24, %62, %cst_43 {dimension_numbers = #tpu.dot_dimension_numbers<[1], [0], [0], [1], [0, 0, 1, 1], [], []>} : vector<8x16xf32>, vector<16x8xf32>, vector<8x8xf32> -> vector<8x8xf32>
    %cst_44 = arith.constant dense<0.000000e+00> : vector<8x8xf32>
    %64 = tpu.matmul %57, %60, %cst_44 {dimension_numbers = #tpu.dot_dimension_numbers<[1], [1], [0], [0], [0, 0, 1, 0], [], []>} : vector<8x8xf32>, vector<8x8xf32>, vector<8x8xf32> -> vector<8x8xf32>
    %cst_45 = arith.constant 0.353553385 : f32
    %65 = vector.broadcast %cst_45 : f32 to vector<8x8xf32>
    %66 = arith.mulf %64, %65 : vector<8x8xf32>
    %67 = arith.addf %66, %25 : vector<8x8xf32>
    %cst_46 = arith.constant dense<0xFF800000> : vector<8xf32>
    %68 = vector.multi_reduction <maximumf>, %67, %cst_46 [1] : vector<8x8xf32> to vector<8xf32>
    %69 = vector.shape_cast %68 : vector<8xf32> to vector<8x1xf32>
    %70 = vector.broadcast %69 : vector<8x1xf32> to vector<8x8xf32>
    %71 = arith.subf %67, %70 : vector<8x8xf32>
    %72 = math.exp %71 : vector<8x8xf32>
    %cst_47 = arith.constant dense<0.000000e+00> : vector<8xf32>
    %73 = vector.multi_reduction <add>, %72, %cst_47 [1] : vector<8x8xf32> to vector<8xf32>
    %74 = vector.shape_cast %73 : vector<8xf32> to vector<8x1xf32>
    %75 = tpu.reciprocal %74 {approx = true} : vector<8x1xf32> -> vector<8x1xf32>
    %76 = vector.broadcast %75 : vector<8x1xf32> to vector<8x8xf32>
    %77 = arith.mulf %72, %76 : vector<8x8xf32>
    %cst_48 = arith.constant dense<0.000000e+00> : vector<8x8xf32>
    %78 = tpu.matmul %77, %63, %cst_48 {dimension_numbers = #tpu.dot_dimension_numbers<[1], [0], [0], [1], [0, 0, 1, 1], [], []>} : vector<8x8xf32>, vector<8x8xf32>, vector<8x8xf32> -> vector<8x8xf32>
    %c1_49 = arith.constant 1 : index
    %c0_50 = arith.constant 0 : index
    %c0_51 = arith.constant 0 : index
    %79 = vector.load %arg9[%c1_49, %c0_50, %c0_51] : memref<2x8x16xf32, #tpu.memory_space<vmem>>, vector<1x8x16xf32>
    %80 = vector.shape_cast %79 : vector<1x8x16xf32> to vector<8x16xf32>
    %cst_52 = arith.constant dense<0.000000e+00> : vector<8x16xf32>
    %81 = tpu.matmul %78, %80, %cst_52 {dimension_numbers = #tpu.dot_dimension_numbers<[1], [0], [0], [1], [0, 0, 1, 1], [], []>} : vector<8x8xf32>, vector<8x16xf32>, vector<8x16xf32> -> vector<8x16xf32>
    %82 = arith.addf %54, %81 : vector<8x16xf32>
    %83 = arith.addf %0, %82 : vector<8x16xf32>
    %c0_53 = arith.constant 0 : index
    %c0_54 = arith.constant 0 : index
    %84 = vector.load %arg10[%c0_53, %c0_54] : memref<1x16xf32, #tpu.memory_space<vmem>>, vector<1x16xf32>
    %85 = vector.broadcast %84 : vector<1x16xf32> to vector<8x16xf32>
    %86 = arith.addf %83, %85 : vector<8x16xf32>
    %c0_55 = arith.constant 0 : index
    %c0_56 = arith.constant 0 : index
    %87 = vector.load %arg11[%c0_55, %c0_56] : memref<1x16xf32, #tpu.memory_space<vmem>>, vector<1x16xf32>
    %c0_57 = arith.constant 0 : index
    %c0_58 = arith.constant 0 : index
    %88 = vector.load %arg12[%c0_57, %c0_58] : memref<1x16xf32, #tpu.memory_space<vmem>>, vector<1x16xf32>
    %cst_59 = arith.constant dense<0.000000e+00> : vector<8xf32>
    %89 = vector.multi_reduction <add>, %86, %cst_59 [1] : vector<8x16xf32> to vector<8xf32>
    %90 = vector.shape_cast %89 : vector<8xf32> to vector<8x1xf32>
    %cst_60 = arith.constant 1.600000e+01 : f32
    %91 = vector.broadcast %cst_60 : f32 to vector<8x1xf32>
    %92 = arith.divf %90, %91 : vector<8x1xf32>
    %93 = vector.broadcast %92 : vector<8x1xf32> to vector<8x16xf32>
    %94 = arith.subf %86, %93 : vector<8x16xf32>
    %95 = arith.mulf %94, %94 : vector<8x16xf32>
    %cst_61 = arith.constant dense<0.000000e+00> : vector<8xf32>
    %96 = vector.multi_reduction <add>, %95, %cst_61 [1] : vector<8x16xf32> to vector<8xf32>
    %97 = vector.shape_cast %96 : vector<8xf32> to vector<8x1xf32>
    %cst_62 = arith.constant 1.600000e+01 : f32
    %98 = vector.broadcast %cst_62 : f32 to vector<8x1xf32>
    %99 = arith.divf %97, %98 : vector<8x1xf32>
    %100 = vector.broadcast %92 : vector<8x1xf32> to vector<8x16xf32>
    %101 = arith.subf %86, %100 : vector<8x16xf32>
    %cst_63 = arith.constant 9.99999997E-7 : f32
    %102 = vector.broadcast %cst_63 : f32 to vector<8x1xf32>
    %103 = arith.addf %99, %102 : vector<8x1xf32>
    %104 = math.rsqrt %103 : vector<8x1xf32>
    %105 = vector.broadcast %104 : vector<8x1xf32> to vector<8x16xf32>
    %106 = arith.mulf %101, %105 : vector<8x16xf32>
    %107 = vector.broadcast %87 : vector<1x16xf32> to vector<8x16xf32>
    %108 = arith.mulf %106, %107 : vector<8x16xf32>
    %109 = vector.broadcast %88 : vector<1x16xf32> to vector<8x16xf32>
    %110 = arith.addf %108, %109 : vector<8x16xf32>
    %c0_64 = arith.constant 0 : index
    %c0_65 = arith.constant 0 : index
    %111 = vector.load %arg13[%c0_64, %c0_65] : memref<16x32xf32, #tpu.memory_space<vmem>>, vector<16x32xf32>
    %cst_66 = arith.constant dense<0.000000e+00> : vector<8x32xf32>
    %112 = tpu.matmul %110, %111, %cst_66 {dimension_numbers = #tpu.dot_dimension_numbers<[1], [0], [0], [1], [0, 0, 1, 1], [], []>} : vector<8x16xf32>, vector<16x32xf32>, vector<8x32xf32> -> vector<8x32xf32>
    %c0_67 = arith.constant 0 : index
    %c0_68 = arith.constant 0 : index
    %113 = vector.load %arg14[%c0_67, %c0_68] : memref<1x32xf32, #tpu.memory_space<vmem>>, vector<1x32xf32>
    %114 = vector.broadcast %113 : vector<1x32xf32> to vector<8x32xf32>
    %115 = arith.addf %112, %114 : vector<8x32xf32>
    %c0_69 = arith.constant 0 : index
    %c0_70 = arith.constant 0 : index
    %116 = vector.load %arg15[%c0_69, %c0_70] : memref<9x32xf32, #tpu.memory_space<vmem>>, vector<9x32xf32>
    %cst_71 = arith.constant 0.000000e+00 : f32
    %117 = vector.broadcast %cst_71 : f32 to vector<8x32xf32>
    %c0_72 = arith.constant 0 : index
    %c0_73 = arith.constant 0 : index
    %c0_74 = arith.constant 0 : index
    %118 = vector.load %arg3[%c0_72, %c0_73, %c0_74] : memref<9x8x8xf32, #tpu.memory_space<vmem>>, vector<1x8x8xf32>
    %119 = vector.shape_cast %118 : vector<1x8x8xf32> to vector<8x8xf32>
    %cst_75 = arith.constant dense<0.000000e+00> : vector<8x32xf32>
    %120 = tpu.matmul %119, %115, %cst_75 {dimension_numbers = #tpu.dot_dimension_numbers<[1], [0], [0], [1], [0, 0, 1, 1], [], []>} : vector<8x8xf32>, vector<8x32xf32>, vector<8x32xf32> -> vector<8x32xf32>
    %121 = vector.extract_strided_slice %116 {offsets = [0, 0], sizes = [1, 32], strides = [1, 1]} : vector<9x32xf32> to vector<1x32xf32>
    %122 = vector.broadcast %121 : vector<1x32xf32> to vector<8x32xf32>
    %123 = arith.mulf %120, %122 : vector<8x32xf32>
    %124 = arith.addf %117, %123 : vector<8x32xf32>
    %c1_76 = arith.constant 1 : index
    %c0_77 = arith.constant 0 : index
    %c0_78 = arith.constant 0 : index
    %125 = vector.load %arg3[%c1_76, %c0_77, %c0_78] : memref<9x8x8xf32, #tpu.memory_space<vmem>>, vector<1x8x8xf32>
    %126 = vector.shape_cast %125 : vector<1x8x8xf32> to vector<8x8xf32>
    %cst_79 = arith.constant dense<0.000000e+00> : vector<8x32xf32>
    %127 = tpu.matmul %126, %115, %cst_79 {dimension_numbers = #tpu.dot_dimension_numbers<[1], [0], [0], [1], [0, 0, 1, 1], [], []>} : vector<8x8xf32>, vector<8x32xf32>, vector<8x32xf32> -> vector<8x32xf32>
    %128 = vector.extract_strided_slice %116 {offsets = [1, 0], sizes = [1, 32], strides = [1, 1]} : vector<9x32xf32> to vector<1x32xf32>
    %129 = vector.broadcast %128 : vector<1x32xf32> to vector<8x32xf32>
    %130 = arith.mulf %127, %129 : vector<8x32xf32>
    %131 = arith.addf %124, %130 : vector<8x32xf32>
    %c2 = arith.constant 2 : index
    %c0_80 = arith.constant 0 : index
    %c0_81 = arith.constant 0 : index
    %132 = vector.load %arg3[%c2, %c0_80, %c0_81] : memref<9x8x8xf32, #tpu.memory_space<vmem>>, vector<1x8x8xf32>
    %133 = vector.shape_cast %132 : vector<1x8x8xf32> to vector<8x8xf32>
    %cst_82 = arith.constant dense<0.000000e+00> : vector<8x32xf32>
    %134 = tpu.matmul %133, %115, %cst_82 {dimension_numbers = #tpu.dot_dimension_numbers<[1], [0], [0], [1], [0, 0, 1, 1], [], []>} : vector<8x8xf32>, vector<8x32xf32>, vector<8x32xf32> -> vector<8x32xf32>
    %135 = vector.extract_strided_slice %116 {offsets = [2, 0], sizes = [1, 32], strides = [1, 1]} : vector<9x32xf32> to vector<1x32xf32>
    %136 = vector.broadcast %135 : vector<1x32xf32> to vector<8x32xf32>
    %137 = arith.mulf %134, %136 : vector<8x32xf32>
    %138 = arith.addf %131, %137 : vector<8x32xf32>
    %c3 = arith.constant 3 : index
    %c0_83 = arith.constant 0 : index
    %c0_84 = arith.constant 0 : index
    %139 = vector.load %arg3[%c3, %c0_83, %c0_84] : memref<9x8x8xf32, #tpu.memory_space<vmem>>, vector<1x8x8xf32>
    %140 = vector.shape_cast %139 : vector<1x8x8xf32> to vector<8x8xf32>
    %cst_85 = arith.constant dense<0.000000e+00> : vector<8x32xf32>
    %141 = tpu.matmul %140, %115, %cst_85 {dimension_numbers = #tpu.dot_dimension_numbers<[1], [0], [0], [1], [0, 0, 1, 1], [], []>} : vector<8x8xf32>, vector<8x32xf32>, vector<8x32xf32> -> vector<8x32xf32>
    %142 = vector.extract_strided_slice %116 {offsets = [3, 0], sizes = [1, 32], strides = [1, 1]} : vector<9x32xf32> to vector<1x32xf32>
    %143 = vector.broadcast %142 : vector<1x32xf32> to vector<8x32xf32>
    %144 = arith.mulf %141, %143 : vector<8x32xf32>
    %145 = arith.addf %138, %144 : vector<8x32xf32>
    %c4 = arith.constant 4 : index
    %c0_86 = arith.constant 0 : index
    %c0_87 = arith.constant 0 : index
    %146 = vector.load %arg3[%c4, %c0_86, %c0_87] : memref<9x8x8xf32, #tpu.memory_space<vmem>>, vector<1x8x8xf32>
    %147 = vector.shape_cast %146 : vector<1x8x8xf32> to vector<8x8xf32>
    %cst_88 = arith.constant dense<0.000000e+00> : vector<8x32xf32>
    %148 = tpu.matmul %147, %115, %cst_88 {dimension_numbers = #tpu.dot_dimension_numbers<[1], [0], [0], [1], [0, 0, 1, 1], [], []>} : vector<8x8xf32>, vector<8x32xf32>, vector<8x32xf32> -> vector<8x32xf32>
    %149 = vector.extract_strided_slice %116 {offsets = [4, 0], sizes = [1, 32], strides = [1, 1]} : vector<9x32xf32> to vector<1x32xf32>
    %150 = vector.broadcast %149 : vector<1x32xf32> to vector<8x32xf32>
    %151 = arith.mulf %148, %150 : vector<8x32xf32>
    %152 = arith.addf %145, %151 : vector<8x32xf32>
    %c5 = arith.constant 5 : index
    %c0_89 = arith.constant 0 : index
    %c0_90 = arith.constant 0 : index
    %153 = vector.load %arg3[%c5, %c0_89, %c0_90] : memref<9x8x8xf32, #tpu.memory_space<vmem>>, vector<1x8x8xf32>
    %154 = vector.shape_cast %153 : vector<1x8x8xf32> to vector<8x8xf32>
    %cst_91 = arith.constant dense<0.000000e+00> : vector<8x32xf32>
    %155 = tpu.matmul %154, %115, %cst_91 {dimension_numbers = #tpu.dot_dimension_numbers<[1], [0], [0], [1], [0, 0, 1, 1], [], []>} : vector<8x8xf32>, vector<8x32xf32>, vector<8x32xf32> -> vector<8x32xf32>
    %156 = vector.extract_strided_slice %116 {offsets = [5, 0], sizes = [1, 32], strides = [1, 1]} : vector<9x32xf32> to vector<1x32xf32>
    %157 = vector.broadcast %156 : vector<1x32xf32> to vector<8x32xf32>
    %158 = arith.mulf %155, %157 : vector<8x32xf32>
    %159 = arith.addf %152, %158 : vector<8x32xf32>
    %c6 = arith.constant 6 : index
    %c0_92 = arith.constant 0 : index
    %c0_93 = arith.constant 0 : index
    %160 = vector.load %arg3[%c6, %c0_92, %c0_93] : memref<9x8x8xf32, #tpu.memory_space<vmem>>, vector<1x8x8xf32>
    %161 = vector.shape_cast %160 : vector<1x8x8xf32> to vector<8x8xf32>
    %cst_94 = arith.constant dense<0.000000e+00> : vector<8x32xf32>
    %162 = tpu.matmul %161, %115, %cst_94 {dimension_numbers = #tpu.dot_dimension_numbers<[1], [0], [0], [1], [0, 0, 1, 1], [], []>} : vector<8x8xf32>, vector<8x32xf32>, vector<8x32xf32> -> vector<8x32xf32>
    %163 = vector.extract_strided_slice %116 {offsets = [6, 0], sizes = [1, 32], strides = [1, 1]} : vector<9x32xf32> to vector<1x32xf32>
    %164 = vector.broadcast %163 : vector<1x32xf32> to vector<8x32xf32>
    %165 = arith.mulf %162, %164 : vector<8x32xf32>
    %166 = arith.addf %159, %165 : vector<8x32xf32>
    %c7 = arith.constant 7 : index
    %c0_95 = arith.constant 0 : index
    %c0_96 = arith.constant 0 : index
    %167 = vector.load %arg3[%c7, %c0_95, %c0_96] : memref<9x8x8xf32, #tpu.memory_space<vmem>>, vector<1x8x8xf32>
    %168 = vector.shape_cast %167 : vector<1x8x8xf32> to vector<8x8xf32>
    %cst_97 = arith.constant dense<0.000000e+00> : vector<8x32xf32>
    %169 = tpu.matmul %168, %115, %cst_97 {dimension_numbers = #tpu.dot_dimension_numbers<[1], [0], [0], [1], [0, 0, 1, 1], [], []>} : vector<8x8xf32>, vector<8x32xf32>, vector<8x32xf32> -> vector<8x32xf32>
    %170 = vector.extract_strided_slice %116 {offsets = [7, 0], sizes = [1, 32], strides = [1, 1]} : vector<9x32xf32> to vector<1x32xf32>
    %171 = vector.broadcast %170 : vector<1x32xf32> to vector<8x32xf32>
    %172 = arith.mulf %169, %171 : vector<8x32xf32>
    %173 = arith.addf %166, %172 : vector<8x32xf32>
    %c8 = arith.constant 8 : index
    %c0_98 = arith.constant 0 : index
    %c0_99 = arith.constant 0 : index
    %174 = vector.load %arg3[%c8, %c0_98, %c0_99] : memref<9x8x8xf32, #tpu.memory_space<vmem>>, vector<1x8x8xf32>
    %175 = vector.shape_cast %174 : vector<1x8x8xf32> to vector<8x8xf32>
    %cst_100 = arith.constant dense<0.000000e+00> : vector<8x32xf32>
    %176 = tpu.matmul %175, %115, %cst_100 {dimension_numbers = #tpu.dot_dimension_numbers<[1], [0], [0], [1], [0, 0, 1, 1], [], []>} : vector<8x8xf32>, vector<8x32xf32>, vector<8x32xf32> -> vector<8x32xf32>
    %177 = vector.extract_strided_slice %116 {offsets = [8, 0], sizes = [1, 32], strides = [1, 1]} : vector<9x32xf32> to vector<1x32xf32>
    %178 = vector.broadcast %177 : vector<1x32xf32> to vector<8x32xf32>
    %179 = arith.mulf %176, %178 : vector<8x32xf32>
    %180 = arith.addf %173, %179 : vector<8x32xf32>
    %c0_101 = arith.constant 0 : index
    %c0_102 = arith.constant 0 : index
    %181 = vector.load %arg16[%c0_101, %c0_102] : memref<1x32xf32, #tpu.memory_space<vmem>>, vector<1x32xf32>
    %182 = vector.broadcast %181 : vector<1x32xf32> to vector<8x32xf32>
    %183 = arith.addf %180, %182 : vector<8x32xf32>
    %cst_103 = arith.constant 5.000000e-01 : f32
    %184 = vector.broadcast %cst_103 : f32 to vector<8x32xf32>
    %185 = arith.mulf %184, %183 : vector<8x32xf32>
    %cst_104 = arith.constant 0.707106769 : f32
    %186 = vector.broadcast %cst_104 : f32 to vector<8x32xf32>
    %187 = arith.mulf %183, %186 : vector<8x32xf32>
    %188 = math.absf %187 : vector<8x32xf32>
    %cst_105 = arith.constant 0.327591091 : f32
    %189 = vector.broadcast %cst_105 : f32 to vector<8x32xf32>
    %190 = arith.mulf %189, %188 : vector<8x32xf32>
    %cst_106 = arith.constant 1.000000e+00 : f32
    %191 = vector.broadcast %cst_106 : f32 to vector<8x32xf32>
    %192 = arith.addf %191, %190 : vector<8x32xf32>
    %cst_107 = arith.constant 1.000000e+00 : f32
    %193 = vector.broadcast %cst_107 : f32 to vector<8x32xf32>
    %194 = arith.divf %193, %192 : vector<8x32xf32>
    %cst_108 = arith.constant 1.06140542 : f32
    %195 = vector.broadcast %cst_108 : f32 to vector<8x32xf32>
    %196 = arith.mulf %194, %195 : vector<8x32xf32>
    %cst_109 = arith.constant -1.45315206 : f32
    %197 = vector.broadcast %cst_109 : f32 to vector<8x32xf32>
    %198 = arith.addf %197, %196 : vector<8x32xf32>
    %199 = arith.mulf %194, %198 : vector<8x32xf32>
    %cst_110 = arith.constant 1.42141378 : f32
    %200 = vector.broadcast %cst_110 : f32 to vector<8x32xf32>
    %201 = arith.addf %200, %199 : vector<8x32xf32>
    %202 = arith.mulf %194, %201 : vector<8x32xf32>
    %cst_111 = arith.constant -0.284496725 : f32
    %203 = vector.broadcast %cst_111 : f32 to vector<8x32xf32>
    %204 = arith.addf %203, %202 : vector<8x32xf32>
    %205 = arith.mulf %194, %204 : vector<8x32xf32>
    %cst_112 = arith.constant 0.254829586 : f32
    %206 = vector.broadcast %cst_112 : f32 to vector<8x32xf32>
    %207 = arith.addf %206, %205 : vector<8x32xf32>
    %208 = arith.mulf %194, %207 : vector<8x32xf32>
    %cst_113 = arith.constant 0.000000e+00 : f32
    %209 = vector.broadcast %cst_113 : f32 to vector<8x32xf32>
    %210 = arith.subf %209, %188 : vector<8x32xf32>
    %211 = arith.mulf %210, %188 : vector<8x32xf32>
    %212 = math.exp %211 : vector<8x32xf32>
    %213 = arith.mulf %208, %212 : vector<8x32xf32>
    %cst_114 = arith.constant 1.000000e+00 : f32
    %214 = vector.broadcast %cst_114 : f32 to vector<8x32xf32>
    %215 = arith.subf %214, %213 : vector<8x32xf32>
    %cst_115 = arith.constant 0.000000e+00 : f32
    %216 = vector.broadcast %cst_115 : f32 to vector<8x32xf32>
    %217 = arith.cmpf oge, %187, %216 : vector<8x32xf32>
    %cst_116 = arith.constant 0.000000e+00 : f32
    %218 = vector.broadcast %cst_116 : f32 to vector<8x32xf32>
    %219 = arith.subf %218, %215 : vector<8x32xf32>
    %220 = arith.select %217, %215, %219 : vector<8x32xi1>, vector<8x32xf32>
    %cst_117 = arith.constant 1.000000e+00 : f32
    %221 = vector.broadcast %cst_117 : f32 to vector<8x32xf32>
    %222 = arith.addf %221, %220 : vector<8x32xf32>
    %223 = arith.mulf %185, %222 : vector<8x32xf32>
    %c0_118 = arith.constant 0 : index
    %c0_119 = arith.constant 0 : index
    %224 = vector.load %arg17[%c0_118, %c0_119] : memref<32x16xf32, #tpu.memory_space<vmem>>, vector<32x16xf32>
    %cst_120 = arith.constant dense<0.000000e+00> : vector<8x16xf32>
    %225 = tpu.matmul %223, %224, %cst_120 {dimension_numbers = #tpu.dot_dimension_numbers<[1], [0], [0], [1], [0, 0, 1, 1], [], []>} : vector<8x32xf32>, vector<32x16xf32>, vector<8x16xf32> -> vector<8x16xf32>
    %226 = arith.addf %86, %225 : vector<8x16xf32>
    %c0_121 = arith.constant 0 : index
    %c0_122 = arith.constant 0 : index
    %227 = vector.load %arg18[%c0_121, %c0_122] : memref<1x16xf32, #tpu.memory_space<vmem>>, vector<1x16xf32>
    %228 = vector.broadcast %227 : vector<1x16xf32> to vector<8x16xf32>
    %229 = arith.addf %226, %228 : vector<8x16xf32>
    %c0_123 = arith.constant 0 : index
    %c0_124 = arith.constant 0 : index
    %230 = vector.load %arg19[%c0_123, %c0_124] : memref<1x16xf32, #tpu.memory_space<vmem>>, vector<1x16xf32>
    %c0_125 = arith.constant 0 : index
    %c0_126 = arith.constant 0 : index
    %231 = vector.load %arg20[%c0_125, %c0_126] : memref<1x16xf32, #tpu.memory_space<vmem>>, vector<1x16xf32>
    %cst_127 = arith.constant dense<0.000000e+00> : vector<8xf32>
    %232 = vector.multi_reduction <add>, %229, %cst_127 [1] : vector<8x16xf32> to vector<8xf32>
    %233 = vector.shape_cast %232 : vector<8xf32> to vector<8x1xf32>
    %cst_128 = arith.constant 1.600000e+01 : f32
    %234 = vector.broadcast %cst_128 : f32 to vector<8x1xf32>
    %235 = arith.divf %233, %234 : vector<8x1xf32>
    %236 = vector.broadcast %235 : vector<8x1xf32> to vector<8x16xf32>
    %237 = arith.subf %229, %236 : vector<8x16xf32>
    %238 = arith.mulf %237, %237 : vector<8x16xf32>
    %cst_129 = arith.constant dense<0.000000e+00> : vector<8xf32>
    %239 = vector.multi_reduction <add>, %238, %cst_129 [1] : vector<8x16xf32> to vector<8xf32>
    %240 = vector.shape_cast %239 : vector<8xf32> to vector<8x1xf32>
    %cst_130 = arith.constant 1.600000e+01 : f32
    %241 = vector.broadcast %cst_130 : f32 to vector<8x1xf32>
    %242 = arith.divf %240, %241 : vector<8x1xf32>
    %243 = vector.broadcast %235 : vector<8x1xf32> to vector<8x16xf32>
    %244 = arith.subf %229, %243 : vector<8x16xf32>
    %cst_131 = arith.constant 9.99999997E-7 : f32
    %245 = vector.broadcast %cst_131 : f32 to vector<8x1xf32>
    %246 = arith.addf %242, %245 : vector<8x1xf32>
    %247 = math.rsqrt %246 : vector<8x1xf32>
    %248 = vector.broadcast %247 : vector<8x1xf32> to vector<8x16xf32>
    %249 = arith.mulf %244, %248 : vector<8x16xf32>
    %250 = vector.broadcast %230 : vector<1x16xf32> to vector<8x16xf32>
    %251 = arith.mulf %249, %250 : vector<8x16xf32>
    %252 = vector.broadcast %231 : vector<1x16xf32> to vector<8x16xf32>
    %253 = arith.addf %251, %252 : vector<8x16xf32>
    %c0_132 = arith.constant 0 : index
    %c0_133 = arith.constant 0 : index
    %254 = vector.load %arg21[%c0_132, %c0_133] : memref<8x16xf32, #tpu.memory_space<vmem>>, vector<8x16xf32>
    tpu.vector_store %arg21[%c0_132, %c0_133], %253 {strides = array<i32>} : memref<8x16xf32, #tpu.memory_space<vmem>>, vector<8x16xf32>,
    return
  }
  func.func @transform_0(%arg0: i32) -> (i32, i32) {
    %c0_i32 = arith.constant 0 : i32
    %c0_i32_0 = arith.constant 0 : i32
    return %arg0, %c0_i32 : i32, i32
  }
  func.func @transform_1(%arg0: i32) -> (i32, i32) {
    %c0_i32 = arith.constant 0 : i32
    %c0_i32_0 = arith.constant 0 : i32
    %c0_i32_1 = arith.constant 0 : i32
    return %c0_i32, %c0_i32_0 : i32, i32
  }
  func.func @transform_2(%arg0: i32) -> (i32, i32, i32) {
    %c0_i32 = arith.constant 0 : i32
    %c0_i32_0 = arith.constant 0 : i32
    %c0_i32_1 = arith.constant 0 : i32
    %c0_i32_2 = arith.constant 0 : i32
    return %c0_i32, %c0_i32_0, %c0_i32_1 : i32, i32, i32
  }
  func.func @transform_3(%arg0: i32) -> (i32, i32) {
    %c0_i32 = arith.constant 0 : i32
    %c0_i32_0 = arith.constant 0 : i32
    %c0_i32_1 = arith.constant 0 : i32
    return %c0_i32, %c0_i32_0 : i32, i32
  }
  func.func @transform_4(%arg0: i32) -> (i32, i32) {
    %c0_i32 = arith.constant 0 : i32
    %c0_i32_0 = arith.constant 0 : i32
    %c0_i32_1 = arith.constant 0 : i32
    return %c0_i32, %c0_i32_0 : i32, i32
  }
  func.func @transform_5(%arg0: i32) -> (i32, i32, i32) {
    %c0_i32 = arith.constant 0 : i32
    %c0_i32_0 = arith.constant 0 : i32
    %c0_i32_1 = arith.constant 0 : i32
    %c0_i32_2 = arith.constant 0 : i32
    return %c0_i32, %c0_i32_0, %c0_i32_1 : i32, i32, i32
  }
  func.func @transform_6(%arg0: i32) -> (i32, i32, i32) {
    %c0_i32 = arith.constant 0 : i32
    %c0_i32_0 = arith.constant 0 : i32
    %c0_i32_1 = arith.constant 0 : i32
    %c0_i32_2 = arith.constant 0 : i32
    return %c0_i32, %c0_i32_0, %c0_i32_1 : i32, i32, i32
  }
  func.func @transform_7(%arg0: i32) -> (i32, i32, i32) {
    %c0_i32 = arith.constant 0 : i32
    %c0_i32_0 = arith.constant 0 : i32
    %c0_i32_1 = arith.constant 0 : i32
    %c0_i32_2 = arith.constant 0 : i32
    return %c0_i32, %c0_i32_0, %c0_i32_1 : i32, i32, i32
  }
  func.func @transform_8(%arg0: i32) -> (i32, i32, i32) {
    %c0_i32 = arith.constant 0 : i32
    %c0_i32_0 = arith.constant 0 : i32
    %c0_i32_1 = arith.constant 0 : i32
    %c0_i32_2 = arith.constant 0 : i32
    return %c0_i32, %c0_i32_0, %c0_i32_1 : i32, i32, i32
  }
  func.func @transform_9(%arg0: i32) -> (i32, i32) {
    %c0_i32 = arith.constant 0 : i32
    %c0_i32_0 = arith.constant 0 : i32
    %c0_i32_1 = arith.constant 0 : i32
    return %c0_i32, %c0_i32_0 : i32, i32
  }
  func.func @transform_10(%arg0: i32) -> (i32, i32) {
    %c0_i32 = arith.constant 0 : i32
    %c0_i32_0 = arith.constant 0 : i32
    %c0_i32_1 = arith.constant 0 : i32
    return %c0_i32, %c0_i32_0 : i32, i32
  }
  func.func @transform_11(%arg0: i32) -> (i32, i32) {
    %c0_i32 = arith.constant 0 : i32
    %c0_i32_0 = arith.constant 0 : i32
    %c0_i32_1 = arith.constant 0 : i32
    return %c0_i32, %c0_i32_0 : i32, i32
  }
  func.func @transform_12(%arg0: i32) -> (i32, i32) {
    %c0_i32 = arith.constant 0 : i32
    %c0_i32_0 = arith.constant 0 : i32
    %c0_i32_1 = arith.constant 0 : i32
    return %c0_i32, %c0_i32_0 : i32, i32
  }
  func.func @transform_13(%arg0: i32) -> (i32, i32) {
    %c0_i32 = arith.constant 0 : i32
    %c0_i32_0 = arith.constant 0 : i32
    %c0_i32_1 = arith.constant 0 : i32
    return %c0_i32, %c0_i32_0 : i32, i32
  }
  func.func @transform_14(%arg0: i32) -> (i32, i32) {
    %c0_i32 = arith.constant 0 : i32
    %c0_i32_0 = arith.constant 0 : i32
    %c0_i32_1 = arith.constant 0 : i32
    return %c0_i32, %c0_i32_0 : i32, i32
  }
  func.func @transform_15(%arg0: i32) -> (i32, i32) {
    %c0_i32 = arith.constant 0 : i32
    %c0_i32_0 = arith.constant 0 : i32
    %c0_i32_1 = arith.constant 0 : i32
    return %c0_i32, %c0_i32_0 : i32, i32
  }
  func.func @transform_16(%arg0: i32) -> (i32, i32) {
    %c0_i32 = arith.constant 0 : i32
    %c0_i32_0 = arith.constant 0 : i32
    %c0_i32_1 = arith.constant 0 : i32
    return %c0_i32, %c0_i32_0 : i32, i32
  }
  func.func @transform_17(%arg0: i32) -> (i32, i32) {
    %c0_i32 = arith.constant 0 : i32
    %c0_i32_0 = arith.constant 0 : i32
    %c0_i32_1 = arith.constant 0 : i32
    return %c0_i32, %c0_i32_0 : i32, i32
  }
  func.func @transform_18(%arg0: i32) -> (i32, i32) {
    %c0_i32 = arith.constant 0 : i32
    %c0_i32_0 = arith.constant 0 : i32
    %c0_i32_1 = arith.constant 0 : i32
    return %c0_i32, %c0_i32_0 : i32, i32
  }
  func.func @transform_19(%arg0: i32) -> (i32, i32) {
    %c0_i32 = arith.constant 0 : i32
    %c0_i32_0 = arith.constant 0 : i32
    %c0_i32_1 = arith.constant 0 : i32
    return %c0_i32, %c0_i32_0 : i32, i32
  }
  func.func @transform_20(%arg0: i32) -> (i32, i32) {
    %c0_i32 = arith.constant 0 : i32
    %c0_i32_0 = arith.constant 0 : i32
    return %arg0, %c0_i32 : i32, i32
  }
}

</mosaic_0001>

<bundles_post_ra>
// kernel: pvt_netv2_forward.4
= control target key start
LH: loop header
LB: loop body
LE: loop exit
PB: predicated region body
PF: predicated region fallthrough
CT: control target
= control target key end

     0   :  { %s650_s18 = smov 0   ;;  %s805_s0 = inlined_call_operand.vmem [shape: f32[64,196], index: 0, kind: input, shape index: {}]   ;;  %s806_s1 = inlined_call_operand.vmem [shape: f32[196,8], index: 1, kind: input, shape index: {}]   ;;  %s807_s2 = inlined_call_operand.vmem [shape: f32[1,8], index: 2, kind: input, shape index: {}]   ;;  %s808_s3 = inlined_call_operand.vmem [shape: f32[1,8], index: 3, kind: input, shape index: {}]   ;;  %s809_s4 = inlined_call_operand.vmem [shape: f32[1,8], index: 4, kind: input, shape index: {}]   ;;  %s810_s5 = inlined_call_operand.vmem [shape: f32[64,8], index: 5, kind: output, shape index: {}]  }
   0x1 LB: > { %s509_s19 = sadd.s32 4294967295, %s616_s18   ;;  %p513_p0 = scmp.ge.s32.totalorder %s616_s18, 1  ;;  %s616_s18 = sphi %s650_s18, %s15_s18  }
   0x2   : > { %p189_p1 = scmp.lt.s32.totalorder %s616_s18, 3 }
   0x4   : > { %p190_p2 = pnand %p513_p0, %p189_p1 }
   0x5   : > { %v239_v0 = vld [vmem:[%s806_s1] sm:$0xff] (!%p190_p2)  ;;  %v240_v1 = vld [vmem:[%s806_s1 + $0x8] sm:$0xff] (!%p190_p2)  ;;  %v241_v2 = vld [vmem:[%s806_s1 + $0x10] sm:$0xff] (!%p190_p2)  ;;  %v618_v3 = vmov (!%p190_p2), 0.0|0.0   ;;  %s514_s28 = sshll.u32 (!%p190_p2), %s509_s19, 2  ;;  %vm271_vm0 = vcmask (!%p190_p2), 556032  }
   0x6   : > { %193 = sbr.rel (%p190_p2) target bundleno = 593 (0x251), region = 40  ;;  %530 = vmatprep.subr.bf16.mxu0 (!%p190_p2), %v618_v3  ;;  %566 = vmatprep.subr.bf16.mxu1 (!%p190_p2), %v618_v3  ;;  %v531_v4 = vpack.c.bf16 (!%p190_p2), %v240_v1, %v239_v0  ;;  %v242_v5 = vld [vmem:[%s806_s1 + $0x18] sm:$0xff] (!%p190_p2)  ;;  %p219_p3 = scmp.lt.s32.totalorder (!%p190_p2), %s514_s28, 7  ;;  %v243_v7 = vld [vmem:[%s806_s1 + $0x20] sm:$0xff] (!%p190_p2)  ;;  %v244_v8 = vld [vmem:[%s806_s1 + $0x28] sm:$0xff] (!%p190_p2)  ;;  %v619_v39 = vmov (!%p190_p2), 0.0  }
   0x7   : > { %v534_v6 = vpack.c.bf16 (!%p190_p2), %v242_v5, %v241_v2  ;;  %v537_v9 = vpack.c.bf16 (!%p190_p2), %v244_v8, %v243_v7  ;;  %v245_v10 = vld [vmem:[%s806_s1 + $0x30] sm:$0xff] (!%p190_p2)  ;;  %v246_v11 = vld [vmem:[%s806_s1 + $0x38] sm:$0xff] (!%p190_p2)  ;;  %v247_v15 = vld [vmem:[%s806_s1 + $0x40] sm:$0xff] (!%p190_p2)  ;;  %vm284_vm1 = vcmask (!%p190_p2), 1043456   ;;  %vm375_vm2 = vcmask (!%p190_p2), 64512  }
   0x8   : > { %532 = vmatpush1.bf16.msra.mxu0 (!%p190_p2), %v531_v4  ;;  %579 = vmatpush1.bf16.msra.mxu1 (!%p190_p2), %v531_v4  ;;  %v540_v14 = vpack.c.bf16 (!%p190_p2), %v246_v11, %v245_v10  ;;  %v248_v16 = vld [vmem:[%s806_s1 + $0x48] sm:$0xff] (!%p190_p2)  ;;  %v249_v18 = vld [vmem:[%s806_s1 + $0x50] sm:$0xff] (!%p190_p2)  ;;  %v250_v19 = vld [vmem:[%s806_s1 + $0x58] sm:$0xff] (!%p190_p2) }
   0x9   : > { %533 = vmatprep.subr.bf16.mxu0 (!%p190_p2), %v618_v3  ;;  %567 = vmatprep.subr.bf16.mxu1 (!%p190_p2), %v618_v3  ;;  %v543_v17 = vpack.c.bf16 (!%p190_p2), %v248_v16, %v247_v15  ;;  %v546_v20 = vpack.c.bf16 (!%p190_p2), %v250_v19, %v249_v18  ;;  %v251_v21 = vld [vmem:[%s806_s1 + $0x60] sm:$0xff] (!%p190_p2)  ;;  %v252_v22 = vld [vmem:[%s806_s1 + $0x68] sm:$0xff] (!%p190_p2)  ;;  %v253_v24 = vld [vmem:[%s806_s1 + $0x70] sm:$0xff] (!%p190_p2) }
   0xa   : > { %v549_v23 = vpack.c.bf16 (!%p190_p2), %v252_v22, %v251_v21  ;;  %v254_v25 = vld [vmem:[%s806_s1 + $0x78] sm:$0xff] (!%p190_p2)  ;;  %v255_v27 = vld [vmem:[%s806_s1 + $0x80] sm:$0xff] (!%p190_p2)  ;;  %v256_v28 = vld [vmem:[%s806_s1 + $0x88] sm:$0xff] (!%p190_p2) }
   0xb   : > { %v552_v26 = vpack.c.bf16 (!%p190_p2), %v254_v25, %v253_v24  ;;  %v555_v29 = vpack.c.bf16 (!%p190_p2), %v256_v28, %v255_v27  ;;  %v257_v30 = vld [vmem:[%s806_s1 + $0x90] sm:$0xff] (!%p190_p2)  ;;  %v258_v31 = vld [vmem:[%s806_s1 + $0x98] sm:$0xff] (!%p190_p2)  ;;  %v259_v33 = vld [vmem:[%s806_s1 + $0xa0] sm:$0xff] (!%p190_p2) }
   0xc   : > { %535 = vmatpush1.bf16.msra.mxu0 (!%p190_p2), %v534_v6  ;;  %580 = vmatpush1.bf16.msra.mxu1 (!%p190_p2), %v534_v6  ;;  %v558_v32 = vpack.c.bf16 (!%p190_p2), %v258_v31, %v257_v30  ;;  %v260_v34 = vld [vmem:[%s806_s1 + $0xa8] sm:$0xff] (!%p190_p2)  ;;  %v261_v36 = vld [vmem:[%s806_s1 + $0xb0] sm:$0xff] (!%p190_p2)  ;;  %v262_v37 = vld [vmem:[%s806_s1 + $0xb8] sm:$0xff] (!%p190_p2) }
   0xd   : > { %s812_s28 = smov (!%p219_p3, %s514_s28), 7  ;;  %536 = vmatprep.subr.bf16.mxu0 %v618_v3  ;;  %568 = vmatprep.subr.bf16.mxu1 %v618_v3  ;;  %v561_v35 = vpack.c.bf16 %v260_v34, %v259_v33  ;;  %v564_v38 = vpack.c.bf16 %v262_v37, %v261_v36  ;;  %v263_v40 = vld [vmem:[%s806_s1 + $0xc0] sm:$0xf] }
   0xe   : > { %s529_s8 = sshll.u32 %s812_s28, 4  ;;  %v519_v47 = vld [vmem:[%s807_s2] ss:$0 sm:$0xff] }
   0xf   : > { %s689_s13 = scalar_lea.vmem %s805_s0, %s529_s8  ;;  %v525_v33 = vld [vmem:[%s808_s3] ss:$0 sm:$0xff]  ;;  %s518_s8 = sshll.u32 %s812_s28, 3 }
  0x10   : > { %v232_v12 = vld [vmem:[%s689_s13 + $0x8] sm:$0xff]  ;;  %538 = vmatpush1.bf16.msra.mxu0 %v537_v9  ;;  %581 = vmatpush1.bf16.msra.mxu1 %v537_v9  ;;  %v231_v41 = vld [vmem:[%s689_s13] sm:$0xff]  ;;  %v234_v43 = vld [vmem:[%s689_s13 + $0x18] sm:$0xff]  ;;  %s229_s14 = scalar_lea.vmem %s810_s5, %s518_s8 }
  0x11   : > { %v236_v13 = vld [vmem:[%s689_s13 + $0x28] sm:$0xff]  ;;  %521 = vmatprep.mubr.msk.f32.mxu0 %vm271_vm0, %v232_v12  ;;  %539 = vmatprep.subr.bf16.mxu0 %v618_v3  ;;  %v235_v42 = vld [vmem:[%s689_s13 + $0x20] sm:$0xff]  ;;  %v238_v44 = vld [vmem:[%s689_s13 + $0x38] sm:$0xff] }
  0x12   : > { %523 = vmatprep.mubr.msk.f32.mxu1 %vm271_vm0, %v236_v13  ;;  %569 = vmatprep.subr.bf16.mxu1 %v618_v3  ;;  %v233_v45 = vld [vmem:[%s689_s13 + $0x10] sm:$0xff] }
  0x13   : > { %v237_v46 = vld [vmem:[%s689_s13 + $0x30] sm:$0xff] }
  0x14   : > { %541 = vmatpush1.bf16.msra.mxu0 %v540_v14  ;;  %582 = vmatpush1.bf16.msra.mxu1 %v540_v14 }
  0x15   : > { %542 = vmatprep.subr.bf16.mxu0 %v618_v3  ;;  %570 = vmatprep.subr.bf16.mxu1 %v618_v3 }
  0x18   : > { %544 = vmatpush1.bf16.msra.mxu0 %v543_v17  ;;  %583 = vmatpush1.bf16.msra.mxu1 %v543_v17 }
  0x19   : > { %545 = vmatprep.subr.bf16.mxu0 %v618_v3  ;;  %571 = vmatprep.subr.bf16.mxu1 %v618_v3 }
  0x1c   : > { %547 = vmatpush1.bf16.msra.mxu0 %v546_v20  ;;  %584 = vmatpush1.bf16.msra.mxu1 %v546_v20 }
  0x1d   : > { %548 = vmatprep.subr.bf16.mxu0 %v618_v3  ;;  %572 = vmatprep.subr.bf16.mxu1 %v618_v3 }
  0x20   : > { %550 = vmatpush1.bf16.msra.mxu0 %v549_v23  ;;  %585 = vmatpush1.bf16.msra.mxu1 %v549_v23 }
  0x21   : > { %551 = vmatprep.subr.bf16.mxu0 %v618_v3  ;;  %573 = vmatprep.subr.bf16.mxu1 %v618_v3 }
  0x24   : > { %553 = vmatpush1.bf16.msra.mxu0 %v552_v26  ;;  %586 = vmatpush1.bf16.msra.mxu1 %v552_v26 }
  0x25   : > { %554 = vmatprep.subr.bf16.mxu0 %v618_v3  ;;  %574 = vmatprep.subr.bf16.mxu1 %v618_v3 }
  0x28   : > { %556 = vmatpush1.bf16.msra.mxu0 %v555_v29  ;;  %587 = vmatpush1.bf16.msra.mxu1 %v555_v29 }
  0x29   : > { %557 = vmatprep.subr.bf16.mxu0 %v618_v3  ;;  %575 = vmatprep.subr.bf16.mxu1 %v618_v3 }
  0x2c   : > { %559 = vmatpush1.bf16.msra.mxu0 %v558_v32  ;;  %588 = vmatpush1.bf16.msra.mxu1 %v558_v32 }
  0x2d   : > { %560 = vmatprep.subr.bf16.mxu0 %v618_v3  ;;  %576 = vmatprep.subr.bf16.mxu1 %v618_v3 }
  0x30   : > { %562 = vmatpush1.bf16.msra.mxu0 %v561_v35  ;;  %589 = vmatpush1.bf16.msra.mxu1 %v561_v35  ;;  %v526_v35 = vld [vmem:[%s809_s4] ss:$0 sm:$0xff] }
  0x31   : > { %563 = vmatprep.subr.bf16.mxu0 %v618_v3  ;;  %577 = vmatprep.subr.bf16.mxu1 %v618_v3 }
  0x34   : > { %565 = vmatpush1.bf16.msra.mxu0 %v564_v38  ;;  %590 = vmatpush1.bf16.msra.mxu1 %v564_v38 }
  0x35   : > { %336 = vmatprep.subr.mxu0 %v619_v39  ;;  %578 = vmatprep.subr.mxu1 %v619_v39 }
  0x38   : > { %520 = vmatpush1.msk.msra.mxu0 %vm284_vm1, %v263_v40  ;;  %591 = vmatpush1.msk.msra.mxu1 %vm284_vm1, %v263_v40 }
  0x39   : > { %353 = vmatmul.mubr.f32.vlgmr.msra.gmra.mrb[0].mxu0 %v231_v41  ;;  %363 = vmatmul.mubr.f32.vlgmr.msra.gmra.mrb[0].mxu1 %v235_v42 }
  0x3a   : > { %522 = vmatprep.mubr.msk.f32.mxu0 %vm271_vm0, %v234_v43  ;;  %524 = vmatprep.mubr.msk.f32.mxu1 %vm271_vm0, %v238_v44 }
  0x3d   : > { %358 = vmatmul.mubr.f32.gmra.mrb[2].mxu0 %v233_v45  ;;  %368 = vmatmul.mubr.f32.gmra.mrb[2].mxu1 %v237_v46 }
 0x10c   : > { %v354_v48 = vpop.f32.mrb[0].mxu0  ;;  %v364_v49 = vpop.f32.mrb[0].mxu1 }
 0x10d   : > { %v355_v50 = vadd.f32 %v519_v47, %v354_v48  ;;  %v365_v51 = vadd.f32 %v519_v47, %v364_v49  ;;  %v356_v52 = vpop.f32.mrb[1].mxu0  ;;  %v366_v53 = vpop.f32.mrb[1].mxu1 }
 0x10f   : > { %v382_v54 = vsel %vm375_vm2, %v365_v51, 0.0  ;;  %v376_v55 = vsel %vm375_vm2, %v355_v50, 0.0 }
 0x110   : > { %v369_v56 = vpop.f32.mrb[2].mxu1  ;;  %383 = vadd.xlane.f32.xlu1 %v382_v54  ;;  %v359_v57 = vpop.f32.mrb[2].mxu0  ;;  %377 = vadd.xlane.f32.xlu0 %v376_v55 }
 0x111   : > { %v370_v58 = vadd.f32 %v519_v47, %v369_v56  ;;  %v360_v59 = vadd.f32 %v519_v47, %v359_v57  ;;  %v361_v60 = vpop.f32.mrb[3].mxu0  ;;  %v371_v61 = vpop.f32.mrb[3].mxu1 }
 0x113   : > { %v385_v62 = vsel %vm375_vm2, %v370_v58, 0.0  ;;  %v379_v63 = vsel %vm375_vm2, %v360_v59, 0.0 }
 0x114   : > { %386 = vadd.xlane.f32.xlu1 %v385_v62  ;;  %380 = vadd.xlane.f32.xlu0 %v379_v63 }
 0x19d   : > { %v384_v0 = vpop.xlane.xlu1 %383  ;;  %v378_v1 = vpop.xlane.xlu0 %377 }
 0x19e   : > { %v391_v2 = vmul.f32 0.125, %v384_v0  ;;  %v389_v3 = vmul.f32 0.125, %v378_v1 }
 0x1a0   : > { %v395_v4 = vsub.f32 %v365_v51, %v391_v2  ;;  %v393_v5 = vsub.f32 %v355_v50, %v389_v3 }
 0x1a1   : > { %v387_v6 = vpop.xlane.xlu1 %386  ;;  %v381_v7 = vpop.xlane.xlu0 %380 }
 0x1a2   : > { %v392_v8 = vmul.f32 0.125, %v387_v6  ;;  %v390_v9 = vmul.f32 0.125, %v381_v7  ;;  %v397_v10 = vmul.f32 %v393_v5, %v393_v5  ;;  %v399_v14 = vmul.f32 %v395_v4, %v395_v4 }
 0x1a4   : > { %v396_v11 = vsub.f32 %v370_v58, %v392_v8  ;;  %v394_v12 = vsub.f32 %v360_v59, %v390_v9  ;;  %v401_v13 = vsel %vm375_vm2, %v397_v10, 0.0  ;;  %v407_v16 = vsel %vm375_vm2, %v399_v14, 0.0 }
 0x1a5   : > { %402 = vadd.xlane.f32.xlu0 %v401_v13 }
 0x1a6   : > { %v398_v15 = vmul.f32 %v394_v12, %v394_v12  ;;  %v400_v18 = vmul.f32 %v396_v11, %v396_v11 }
 0x1a8   : > { %v404_v17 = vsel %vm375_vm2, %v398_v15, 0.0  ;;  %v410_v19 = vsel %vm375_vm2, %v400_v18, 0.0 }
 0x1a9   : > { %408 = vadd.xlane.f32.xlu0 %v407_v16  ;;  %405 = vadd.xlane.f32.xlu1 %v404_v17 }
 0x1ad   : > { %411 = vadd.xlane.f32.xlu1 %v410_v19 }
 0x232   : > { %v403_v20 = vpop.xlane.xlu0 %402 }
 0x233   : > { %v413_v21 = vmul.f32 0.125, %v403_v20 }
 0x235   : > { %v417_v22 = vadd.f32 1e-06, %v413_v21 }
 0x236   : > { %v406_v23 = vpop.xlane.xlu1 %405  ;;  %v409_v24 = vpop.xlane.xlu0 %408 }
 0x237   : > { %602 = vrsqrt.f32 %v417_v22  ;;  %v414_v25 = vmul.f32 0.125, %v406_v23  ;;  %v415_v26 = vmul.f32 0.125, %v409_v24 }
 0x239   : > { %v418_v27 = vadd.f32 1e-06, %v414_v25  ;;  %v419_v28 = vadd.f32 1e-06, %v415_v26 }
 0x23a   : > { %v412_v29 = vpop.xlane.xlu1 %411 }
 0x23b   : > { %604 = vrsqrt.f32 %v418_v27  ;;  %v416_v30 = vmul.f32 0.125, %v412_v29 }
 0x23c   : > { %606 = vrsqrt.f32 %v419_v28 }
 0x23d   : > { %v420_v31 = vadd.f32 1e-06, %v416_v30 }
 0x23f   : > { %608 = vrsqrt.f32 %v420_v31 }
 0x241   : > { %v603_v32 = vpop.eup %602 }
 0x242   : > { %v425_v34 = vmul.f32 %v603_v32, %v393_v5 }
 0x244   : > { %v435_v36 = vmul.f32 %v525_v33, %v425_v34 }
 0x245   : > { %v605_v37 = vpop.eup %604 }
 0x246   : > { %v607_v38 = vpop.eup %606  ;;  %v445_v39 = vadd.f32 %v526_v35, %v435_v36  ;;  %v426_v40 = vmul.f32 %v605_v37, %v394_v12 }
 0x247   : > { %v427_v41 = vmul.f32 %v607_v38, %v395_v4 }
 0x248   : > { %449 = vst.msk [vmem:[%s229_s14] sm:$0xff] %vm375_vm2, %v445_v39  ;;  %v436_v42 = vmul.f32 %v525_v33, %v426_v40 }
 0x249   : > { %v609_v43 = vpop.eup %608  ;;  %v437_v44 = vmul.f32 %v525_v33, %v427_v41 }
 0x24a   : > { %v446_v45 = vadd.f32 %v526_v35, %v436_v42  ;;  %v428_v46 = vmul.f32 %v609_v43, %v396_v11 }
 0x24b   : > { %v447_v47 = vadd.f32 %v526_v35, %v437_v44 }
 0x24c   : > { %450 = vst.msk [vmem:[%s229_s14 + $0x8] sm:$0xff] %vm375_vm2, %v446_v45  ;;  %v438_v48 = vmul.f32 %v525_v33, %v428_v46 }
 0x24d   : > { %451 = vst.msk [vmem:[%s229_s14 + $0x10] sm:$0xff] %vm375_vm2, %v447_v47 }
 0x24e   : > { %v448_v49 = vadd.f32 %v526_v35, %v438_v48 }
 0x250   : > { %452 = vst.msk [vmem:[%s229_s14 + $0x18] sm:$0xff] %vm375_vm2, %v448_v49 }
 0x251 PF: > { %s15_s18 = sadd.s32 1, %s616_s18  }
 0x252   : > { %p12_p4 = scmp.ge.s32.totalorder %s15_s18, 4  }
 0x254   :  { %14 = sbr.rel (!%p12_p4) target bundleno = 1 (0x1), region = 70 }

// kernel: pvt_netv2_forward.5
= control target key start
LH: loop header
LB: loop body
LE: loop exit
PB: predicated region body
PF: predicated region fallthrough
CT: control target
= control target key end

     0   :  { %s4498_s29 = smov 0   ;;  %s5024_s0 = inlined_call_operand.vmem [shape: f32[64,8], index: 0, kind: input, shape index: {}]   ;;  %s5025_s1 = inlined_call_operand.vmem [shape: f32[32,8], index: 1, kind: input, shape index: {}]   ;;  %s5026_s2 = inlined_call_operand.vmem [shape: f32[9,32,32], index: 2, kind: input, shape index: {}]   ;;  %s5027_s3 = inlined_call_operand.vmem [shape: f32[4,8,32], index: 3, kind: input, shape index: {}]   ;;  %s5028_s4 = inlined_call_operand.vmem [shape: f32[4,8,8], index: 4, kind: input, shape index: {}]   ;;  %s5029_s5 = inlined_call_operand.vmem [shape: f32[1,8], index: 5, kind: input, shape index: {}]   ;;  %s5030_s6 = inlined_call_operand.vmem [shape: f32[1,8], index: 6, kind: input, shape index: {}]   ;;  %s5031_s7 = inlined_call_operand.vmem [shape: f32[1,8], index: 7, kind: input, shape index: {}]   ;;  %s5032_s8 = inlined_call_operand.vmem [shape: f32[1,8], index: 8, kind: input, shape index: {}]   ;;  %s5033_s9 = inlined_call_operand.vmem [shape: f32[1,8], index: 9, kind: input, shape index: {}]   ;;  %s5034_s10 = inlined_call_operand.vmem [shape: f32[1,8,8], index: 10, kind: input, shape index: {}]   ;;  %s5035_s11 = inlined_call_operand.vmem [shape: f32[1,8,8], index: 11, kind: input, shape index: {}]   ;;  %s5036_s12 = inlined_call_operand.vmem [shape: f32[1,8,8], index: 12, kind: input, shape index: {}]   ;;  %s5037_s13 = inlined_call_operand.vmem [shape: f32[1,8,8], index: 13, kind: input, shape index: {}]   ;;  %s5038_s14 = inlined_call_operand.vmem [shape: f32[1,8], index: 14, kind: input, shape index: {}]   ;;  %s5039_s15 = inlined_call_operand.vmem [shape: f32[1,8], index: 15, kind: input, shape index: {}]   ;;  %s5040_s16 = inlined_call_operand.vmem [shape: f32[1,8], index: 16, kind: input, shape index: {}]   ;;  %s5041_s17 = inlined_call_operand.vmem [shape: f32[8,16], index: 17, kind: input, shape index: {}]   ;;  %s5042_s18 = inlined_call_operand.vmem [shape: f32[1,16], index: 18, kind: input, shape index: {}]   ;;  %s5043_s19 = inlined_call_operand.vmem [shape: f32[9,16], index: 19, kind: input, shape index: {}]   ;;  %s5044_s20 = inlined_call_operand.vmem [shape: f32[1,16], index: 20, kind: input, shape index: {}]   ;;  %s5045_s21 = inlined_call_operand.vmem [shape: f32[16,8], index: 21, kind: input, shape index: {}]   ;;  %s5046_s22 = inlined_call_operand.vmem [shape: f32[1,8], index: 22, kind: input, shape index: {}]   ;;  %s5047_s23 = inlined_call_operand.vmem [shape: f32[1,8], index: 23, kind: input, shape index: {}]   ;;  %s5048_s24 = inlined_call_operand.vmem [shape: f32[1,8], index: 24, kind: input, shape index: {}]   ;;  %s5049_s25 = inlined_call_operand.vmem [shape: f32[64,8], index: 25, kind: output, shape index: {}]  }
   0x1   :  { %5054 = sst [smem:[#allocation2_spill]] %s5024_s0 }
   0x2   :  { %5055 = sst [smem:[#allocation3_spill]] %s5025_s1 }
   0x3   :  { %5056 = sst [smem:[#allocation4_spill]] %s5026_s2 }
   0x4   :  { %5057 = sst [smem:[#allocation5_spill]] %s5027_s3 }
   0x5   :  { %5058 = sst [smem:[#allocation6_spill]] %s5028_s4 }
   0x6   :  { %5059 = sst [smem:[#allocation7_spill]] %s5029_s5 }
   0x7   :  { %5060 = sst [smem:[#allocation8_spill]] %s5030_s6 }
   0x8   :  { %5061 = sst [smem:[#allocation9_spill]] %s5031_s7 }
   0x9   :  { %5062 = sst [smem:[#allocation10_spill]] %s5032_s8 }
   0xa   :  { %5063 = sst [smem:[#allocation11_spill]] %s5033_s9 }
   0xb LB: > { %s3669_s2 = sadd.s32 4294967295, %s4363_s29   ;;  %p3673_p0 = scmp.ge.s32.totalorder %s4363_s29, 1  ;;  %s4363_s29 = sphi %s4498_s29, %s35_s29  }
   0xc   : > { %p688_p1 = scmp.lt.s32.totalorder %s4363_s29, 3 }
   0xe   : > { %p689_p2 = pnand %p3673_p0, %p688_p1 }
   0xf   : > { %s3674_s6 = sshll.u32 (!%p689_p2), %s3669_s2, 2  ;;  %vm774_vm0 = vcmask (!%p689_p2), 64512   ;;  %s5064_s26 = sld [smem:[#allocation2_spill]] (!%p689_p2)  ;;  %v4365_v28 = vmov (!%p689_p2), 0.0|0.0   ;;  %vm4366_vm1 = vmmov (!%p689_p2), 0   ;;  %v4367_v29 = vmov (!%p689_p2), 0.0  }
  0x10   : > { %692 = sbr.rel (%p689_p2) target bundleno = 4087 (0xff7), region = 120  ;;  %p757_p3 = scmp.lt.s32.totalorder (!%p689_p2), %s3674_s6, 7  ;;  %4188 = vmatprep.subr.bf16.mxu0 (!%p689_p2), %v4365_v28  ;;  %4194 = vmatprep.subr.bf16.mxu1 (!%p689_p2), %v4365_v28  ;;  %vm849_vm2 = vcmask (!%p689_p2), 261120   ;;  %vm3422_vm6 = vcmask (!%p689_p2), 130048  }
  0x11   : > { %3946 = vmatprep.mubr.msk.f32.mxu0 (!%p689_p2), %vm4366_vm1, %v4367_v29  ;;  %3957 = vmatprep.mubr.msk.f32.mxu1 (!%p689_p2), %vm4366_vm1, %v4367_v29  ;;  %s5065_s4 = sld [smem:[#allocation10_spill]] (!%p689_p2)  ;;  %s5066_s5 = sld [smem:[#allocation11_spill]] (!%p689_p2) }
  0x12   : > { %s5067_s7 = sld [smem:[#allocation5_spill]] (!%p689_p2)  ;;  %s5068_s27 = sld [smem:[#allocation6_spill]] (!%p689_p2) }
  0x13   : > { %s5069_s0 = sld [smem:[#allocation7_spill]] (!%p689_p2)  ;;  %s5070_s8 = sld [smem:[#allocation8_spill]] (!%p689_p2) }
  0x14   : > { %s5071_s9 = sld [smem:[#allocation9_spill]] (!%p689_p2) }
  0x17   : > { %s5075_s6 = smov (!%p757_p3, %s3674_s6), 7  ;;  %v3678_v44 = vld [vmem:[%s5065_s4] ss:$0 sm:$0xff] }
  0x18   : > { %s3675_s30 = sshll.u32 %s5075_s6, 3  ;;  %v3679_v50 = vld [vmem:[%s5066_s5] ss:$0 sm:$0xff]  ;;  %v3681_v63 = vld [vmem:[%s5067_s7 + $0x8] sm:$0xff] }
  0x19   : > { %s760_s1 = scalar_lea.vmem %s5064_s26, %s3675_s30  ;;  %v848_v62 = vld [vmem:[%s5067_s7] sm:$0xff]  ;;  %s5072_s26 = sld [smem:[#allocation3_spill]] }
  0x1a   : > { %v4514_v0 = vld [vmem:[%s760_s1] sm:$0xff]  ;;  %v4516_v1 = vld [vmem:[%s760_s1 + $0x10] sm:$0xff]  ;;  %v4518_v2 = vld [vmem:[%s760_s1 + $0x8] sm:$0xff]  ;;  %s766_s28 = scalar_lea.vmem %s5049_s25, %s3675_s30 }
  0x1b   : > { %v775_v3 = vsel %vm774_vm0, %v4514_v0, 0.0  ;;  %v781_v4 = vsel %vm774_vm0, %v4516_v1, 0.0  ;;  %v4524_v5 = vld [vmem:[%s760_s1 + $0x18] sm:$0xff]  ;;  %v778_v6 = vsel %vm774_vm0, %v4518_v2, 0.0  ;;  %s5073_s1 = sld [smem:[#allocation4_spill]] }
  0x1c   : > { %776 = vadd.xlane.f32.xlu0 %v775_v3  ;;  %782 = vadd.xlane.f32.xlu1 %v781_v4  ;;  %v784_v7 = vsel %vm774_vm0, %v4524_v5, 0.0  ;;  %v3683_v3 = vld [vmem:[%s5068_s27 + $0x8] sm:$0xff]  ;;  %v923_v4 = vld [vmem:[%s5068_s27] sm:$0xff] }
  0x20   : > { %779 = vadd.xlane.f32.xlu0 %v778_v6  ;;  %785 = vadd.xlane.f32.xlu1 %v784_v7 }
  0xa9   : > { %v777_v8 = vpop.xlane.xlu0 %776  ;;  %v783_v9 = vpop.xlane.xlu1 %782 }
  0xaa   : > { %v788_v10 = vmul.f32 0.125, %v777_v8  ;;  %v790_v11 = vmul.f32 0.125, %v783_v9 }
  0xac   : > { %v792_v12 = vsub.f32 %v4514_v0, %v788_v10  ;;  %v794_v13 = vsub.f32 %v4516_v1, %v790_v11  ;;  %v3686_v10 = vld [vmem:[%s5067_s7 + $0x10] sm:$0xff] }
  0xad   : > { %v780_v14 = vpop.xlane.xlu0 %779  ;;  %v786_v15 = vpop.xlane.xlu1 %785  ;;  %v3688_v11 = vld [vmem:[%s5068_s27 + $0x10] sm:$0xff] }
  0xae   : > { %v789_v16 = vmul.f32 0.125, %v780_v14  ;;  %v791_v17 = vmul.f32 0.125, %v786_v15  ;;  %v796_v18 = vmul.f32 %v792_v12, %v792_v12  ;;  %v798_v19 = vmul.f32 %v794_v13, %v794_v13 }
  0xb0   : > { %v793_v20 = vsub.f32 %v4518_v2, %v789_v16  ;;  %v795_v21 = vsub.f32 %v4524_v5, %v791_v17  ;;  %v800_v22 = vsel %vm774_vm0, %v796_v18, 0.0  ;;  %v806_v23 = vsel %vm774_vm0, %v798_v19, 0.0  ;;  %v3690_v19 = vld [vmem:[%s5067_s7 + $0x18] sm:$0xff] }
  0xb1   : > { %801 = vadd.xlane.f32.xlu0 %v800_v22 }
  0xb2   : > { %v797_v24 = vmul.f32 %v793_v20, %v793_v20  ;;  %v799_v25 = vmul.f32 %v795_v21, %v795_v21 }
  0xb4   : > { %v803_v26 = vsel %vm774_vm0, %v797_v24, 0.0  ;;  %v809_v27 = vsel %vm774_vm0, %v799_v25, 0.0 }
  0xb5   : > { %807 = vadd.xlane.f32.xlu0 %v806_v23  ;;  %804 = vadd.xlane.f32.xlu1 %v803_v26 }
  0xb9   : > { %810 = vadd.xlane.f32.xlu1 %v809_v27 }
 0x13e   : > { %v802_v30 = vpop.xlane.xlu0 %801 }
 0x13f   : > { %v812_v31 = vmul.f32 0.125, %v802_v30 }
 0x141   : > { %v816_v32 = vadd.f32 1e-06, %v812_v31 }
 0x142   : > { %v805_v33 = vpop.xlane.xlu1 %804  ;;  %v808_v34 = vpop.xlane.xlu0 %807 }
 0x143   : > { %4299 = vrsqrt.f32 %v816_v32  ;;  %v813_v35 = vmul.f32 0.125, %v805_v33  ;;  %v814_v36 = vmul.f32 0.125, %v808_v34 }
 0x145   : > { %v817_v37 = vadd.f32 1e-06, %v813_v35  ;;  %v818_v38 = vadd.f32 1e-06, %v814_v36 }
 0x146   : > { %v811_v39 = vpop.xlane.xlu1 %810 }
 0x147   : > { %4301 = vrsqrt.f32 %v817_v37  ;;  %v815_v40 = vmul.f32 0.125, %v811_v39 }
 0x148   : > { %4303 = vrsqrt.f32 %v818_v38 }
 0x149   : > { %v819_v41 = vadd.f32 1e-06, %v815_v40 }
 0x14b   : > { %4305 = vrsqrt.f32 %v819_v41 }
 0x14d   : > { %v4300_v42 = vpop.eup %4299 }
 0x14e   : > { %v824_v43 = vmul.f32 %v4300_v42, %v792_v12 }
 0x150   : > { %v834_v48 = vmul.f32 %v3678_v44, %v824_v43  ;;  %v1588_v43 = vld [vmem:[%s5035_s11] sm:$0xff] }
 0x151   : > { %v4302_v45 = vpop.eup %4301 }
 0x152   : > { %v4304_v46 = vpop.eup %4303  ;;  %v825_v47 = vmul.f32 %v4302_v45, %v793_v20  ;;  %v4550_v54 = vadd.f32 %v3679_v50, %v834_v48  ;;  %v3692_v20 = vld [vmem:[%s5068_s27 + $0x18] sm:$0xff]  ;;  %v3695_v48 = vld [vmem:[%s5070_s8] ss:$0 sm:$0xff] }
 0x153   : > { %v826_v49 = vmul.f32 %v4304_v46, %v794_v13 }
 0x154   : > { %v835_v51 = vmul.f32 %v3678_v44, %v825_v47 }
 0x155   : > { %v4306_v52 = vpop.eup %4305  ;;  %v836_v56 = vmul.f32 %v3678_v44, %v826_v49 }
 0x156   : > { %v827_v53 = vmul.f32 %v4306_v52, %v795_v21  ;;  %v4552_v55 = vadd.f32 %v3679_v50, %v835_v51  ;;  %v1490_v21 = vld [vmem:[%s5034_s10] sm:$0xff] }
 0x157   : > { %v4556_v59 = vadd.f32 %v3679_v50, %v836_v56 }
 0x158   : > { %v4189_v57 = vpack.c.bf16 %v4552_v55, %v4550_v54  ;;  %v837_v58 = vmul.f32 %v3678_v44, %v827_v53  ;;  %v1662_v53 = vld [vmem:[%s5036_s12] sm:$0xff] }
 0x15a   : > { %4190 = vmatpush3.bf16.msra.mxu0 %v4189_v57  ;;  %4196 = vmatpush3.bf16.msra.mxu1 %v4189_v57  ;;  %v4558_v60 = vadd.f32 %v3679_v50, %v837_v58  ;;  %v3696_v50 = vld [vmem:[%s5071_s9] ss:$0 sm:$0xff] }
 0x15b   : > { %4191 = vmatprep.subr.bf16.mxu0 %v4365_v28  ;;  %4197 = vmatprep.subr.bf16.mxu1 %v4365_v28 }
 0x15c   : > { %v4192_v61 = vpack.c.bf16 %v4558_v60, %v4556_v59 }
 0x15e   : > { %4193 = vmatpush3.bf16.msra.mxu0 %v4192_v61  ;;  %4199 = vmatpush3.bf16.msra.mxu1 %v4192_v61 }
 0x15f   : > { %3960 = vmatprep.subr.mxu0 %v4367_v29  ;;  %3965 = vmatprep.subr.mxu1 %v4367_v29 }
 0x161   : > { %3947 = vmatmul.mubr.msk.f32.vlgmr.msra.gmra.mrb[0].mxu0 %vm849_vm2, %v848_v62  ;;  %3958 = vmatmul.mubr.msk.f32.vlgmr.msra.gmra.mrb[0].mxu1 %vm849_vm2, %v3681_v63 }
 0x162   : > { %3961 = vmatpush3.msra.mxu0 %v3683_v3  ;;  %3962 = vmatprep.mubr.msk.f32.mxu0 %vm4366_vm1, %v4367_v29 }
 0x163   : > { %3967 = vmatprep.mubr.msk.f32.mxu1 %vm4366_vm1, %v4367_v29  ;;  %4200 = vmatprep.subr.bf16.mxu0 %v4365_v28 }
 0x164   : > { %3966 = vmatpush3.msra.mxu1 %v923_v4 }
 0x165   : > { %3981 = vmatprep.subr.mxu1 %v4367_v29 }
 0x234   : > { %v919_v6 = vpop.f32.mrb[0].mxu0  ;;  %v995_v7 = vpop.f32.mrb[0].mxu1 }
 0x235   : > { %v3959_v8 = vpop.f32.mrb[1].mxu1  ;;  %3963 = vmatmul.mubr.msk.f32.vlgmr.msra.gmra.mrb[2].mxu0 %vm774_vm0, %v995_v7  ;;  %3968 = vmatmul.mubr.msk.f32.vlgmr.msra.gmra.mrb[2].mxu1 %vm774_vm0, %v919_v6  ;;  %v3948_v9 = vpop.f32.mrb[1].mxu0  ;;  %v1489_v6 = vld [vmem:[%s5072_s26 + $0x18] sm:$0xff] }
 0x236   : > { %4202 = vmatpush3.bf16.msra.mxu0 %v4189_v57  ;;  %3978 = vmatprep.mubr.msk.f32.mxu0 %vm4366_vm1, %v4367_v29 }
 0x237   : > { %4203 = vmatprep.subr.bf16.mxu0 %v4365_v28  ;;  %3983 = vmatprep.mubr.msk.f32.mxu1 %vm4366_vm1, %v4367_v29 }
 0x238   : > { %3982 = vmatpush3.msra.mxu1 %v3688_v11 }
 0x239   : > { %4206 = vmatprep.subr.bf16.mxu1 %v4365_v28 }
 0x23a   : > { %4205 = vmatpush3.bf16.msra.mxu0 %v4192_v61 }
 0x23b   : > { %3997 = vmatprep.subr.mxu0 %v4367_v29 }
 0x23d   : > { %3979 = vmatmul.mubr.msk.f32.vlgmr.msra.gmra.mrb[4].mxu0 %vm849_vm2, %v3686_v10  ;;  %v1488_v10 = vld [vmem:[%s5072_s26 + $0x10] sm:$0xff] }
 0x23e   : > { %3999 = vmatprep.mubr.msk.f32.mxu0 %vm4366_vm1, %v4367_v29  ;;  %3998 = vmatpush3.msra.mxu0 %v3692_v20 }
 0x23f   : > { %4002 = vmatprep.subr.mxu0 %v1490_v21 }
 0x308   : > { %v1070_v12 = vpop.f32.mrb[2].mxu0  ;;  %v1143_v13 = vpop.f32.mrb[2].mxu1 }
 0x309   : > { %v1144_v14 = vadd.f32 %v1143_v13, %v1070_v12  ;;  %v3964_v15 = vpop.f32.mrb[3].mxu0  ;;  %v3969_v16 = vpop.f32.mrb[3].mxu1 }
 0x310   : > { %v1218_v17 = vpop.f32.mrb[4].mxu0 }
 0x311   : > { %v3980_v18 = vpop.f32.mrb[5].mxu0  ;;  %3984 = vmatmul.mubr.msk.f32.vlgmr.msra.gmra.mrb[4].mxu1 %vm774_vm0, %v1218_v17 }
 0x312   : > { %4208 = vmatpush3.bf16.msra.mxu1 %v4189_v57  ;;  %3994 = vmatprep.mubr.msk.f32.mxu1 %vm4366_vm1, %v4367_v29 }
 0x313   : > { %4209 = vmatprep.subr.bf16.mxu1 %v4365_v28  ;;  %v3694_v28 = vld [vmem:[%s5069_s0] ss:$0 sm:$0xff] }
 0x316   : > { %4211 = vmatpush3.bf16.msra.mxu1 %v4192_v61  ;;  %v1486_v61 = vld [vmem:[%s5072_s26] sm:$0xff] }
 0x317   : > { %4010 = vmatprep.subr.mxu1 %v4367_v29 }
 0x319   : > { %3995 = vmatmul.mubr.msk.f32.vlgmr.msra.gmra.mrb[6].mxu1 %vm849_vm2, %v3690_v19 }
 0x31a   : > { %4012 = vmatprep.mubr.msk.f32.mxu1 %vm4366_vm1, %v4367_v29  ;;  %4011 = vmatpush3.msra.mxu1 %v1588_v43 }
 0x31b   : > { %4015 = vmatprep.subr.mxu1 %v4367_v29 }
 0x3e4   : > { %v1293_v22 = vpop.f32.mrb[4].mxu1 }
 0x3e5   : > { %v1297_v23 = vadd.f32 %v1293_v22, %v1144_v14  ;;  %v3985_v24 = vpop.f32.mrb[5].mxu1 }
 0x3ec   : > { %v1369_v25 = vpop.f32.mrb[6].mxu1 }
 0x3ed   : > { %v3996_v26 = vpop.f32.mrb[7].mxu1  ;;  %4000 = vmatmul.mubr.msk.f32.vlgmr.msra.gmra.mrb[6].mxu0 %vm774_vm0, %v1369_v25 }
 0x3ee   : > { %4004 = vmatprep.mubr.msk.f32.mxu0 %vm774_vm0, %v4550_v54  ;;  %4003 = vmatpush3.msra.mxu0 %v1490_v21 }
 0x3f1   : > { %4005 = vmatmul.mubr.msk.f32.vlgmr.msra.gmra.mrb[8].mxu0 %vm774_vm0, %v4552_v55 }
 0x3f2   : > { %4007 = vmatprep.mubr.msk.f32.mxu0 %vm774_vm0, %v4556_v59 }
 0x3f5   : > { %4008 = vmatmul.mubr.msk.f32.gmra.mrb[10].mxu0 %vm774_vm0, %v4558_v60 }
 0x4c0   : > { %v1444_v27 = vpop.f32.mrb[6].mxu0 }
 0x4c1   : > { %v1448_v30 = vadd.f32 %v1444_v27, %v1297_v23  ;;  %v4001_v31 = vpop.f32.mrb[7].mxu0 }
 0x4c3   : > { %v1456_v32 = vadd.f32 %v3694_v28, %v1448_v30 }
 0x4c4   : > { %v4006_v33 = vpop.f32.mrb[8].mxu0 }
 0x4c5   : > { %v1569_v34 = vpop.f32.mrb[9].mxu0  ;;  %v1459_v35 = vsel %vm774_vm0, %v1456_v32, 0.0 }
 0x4c6   : > { %1460 = vadd.xlane.f32.xlu0 %v1459_v35  ;;  %4022 = vmatprep.mubr.msk.f32.mxu0 %vm774_vm0, %v1569_v34 }
 0x4c8   : > { %v4009_v36 = vpop.f32.mrb[10].mxu0 }
 0x4c9   : > { %v1579_v37 = vpop.f32.mrb[11].mxu0 }
 0x553   : > { %v1461_v38 = vpop.xlane.xlu0 %1460 }
 0x554   : > { %v1462_v39 = vmul.f32 0.125, %v1461_v38  ;;  %v1982_v38 = vld [vmem:[%s5037_s13] sm:$0xff] }
 0x556   : > { %v1463_v40 = vsub.f32 %v1456_v32, %v1462_v39 }
 0x558   : > { %v1464_v41 = vmul.f32 %v1463_v40, %v1463_v40 }
 0x55a   : > { %v1465_v42 = vsel %vm774_vm0, %v1464_v41, 0.0 }
 0x55b   : > { %1466 = vadd.xlane.f32.xlu1 %v1465_v42 }
 0x5e8   : > { %v1467_v44 = vpop.xlane.xlu1 %1466 }
 0x5e9   : > { %v1468_v45 = vmul.f32 0.125, %v1467_v44 }
 0x5eb   : > { %v1469_v46 = vadd.f32 1e-06, %v1468_v45 }
 0x5ed   : > { %4307 = vrsqrt.f32 %v1469_v46 }
 0x5f7   : > { %v4308_v47 = vpop.eup %4307 }
 0x5f8   : > { %v1471_v49 = vmul.f32 %v4308_v47, %v1463_v40 }
 0x5fa   : > { %v1478_v51 = vmul.f32 %v3695_v48, %v1471_v49 }
 0x5fc   : > { %v1485_v52 = vadd.f32 %v3696_v50, %v1478_v51 }
 0x5fe   : > { %4013 = vmatmul.mubr.msk.f32.vlgmr.msra.gmra.mrb[8].mxu1 %vm774_vm0, %v1485_v52 }
 0x5ff   : > { %4016 = vmatpush3.msra.mxu1 %v1662_v53  ;;  %4017 = vmatprep.mubr.msk.f32.mxu1 %vm4366_vm1, %v4367_v29  ;;  %v1487_v29 = vld [vmem:[%s5072_s26 + $0x8] sm:$0xff] }
 0x602   : > { %4018 = vmatmul.mubr.msk.f32.vlgmr.msra.gmra.mrb[10].mxu1 %vm774_vm0, %v1485_v52 }
 0x6d1   : > { %v1658_v54 = vpop.f32.mrb[8].mxu1 }
 0x6d2   : > { %v4014_v55 = vpop.f32.mrb[9].mxu1  ;;  %4020 = vmatprep.subr.msk.mxu0 %vm774_vm0, %v1658_v54 }
 0x6d3   : > { %4021 = vmatpush3.xpose.msk.msra.mxu0 %vm774_vm0, %v1658_v54 }
 0x6d4   : > { %4036 = vmatprep.subr.mxu0 %v1982_v38 }
 0x6d5   : > { %v1729_v56 = vpop.f32.mrb[10].mxu1 }
 0x6d6   : > { %v4019_v57 = vpop.f32.mrb[11].mxu1  ;;  %4023 = vmatmul.mubr.msk.f32.vlgmr.msra.gmra.mrb[12].mxu0 %vm774_vm0, %v4006_v33  ;;  %4028 = vmatprep.subr.mxu1 %v1729_v56 }
 0x6d7   : > { %4025 = vmatprep.mubr.msk.f32.mxu0 %vm774_vm0, %v1579_v37  ;;  %4029 = vmatpush3.msra.mxu1 %v1729_v56  ;;  %v3716_v56 = vld [vmem:[%s5038_s14] ss:$0 sm:$0xff] }
 0x6d8   : > { %4037 = vmatpush3.msra.mxu0 %v1982_v38 }
 0x6da   : > { %4026 = vmatmul.mubr.msk.f32.gmra.mrb[14].mxu0 %vm774_vm0, %v4009_v36 }
 0x7a9   : > { %v4024_v58 = vpop.f32.mrb[12].mxu0 }
 0x7aa   : > { %v1834_v59 = vmul.f32 0.35355338, %v4024_v58  ;;  %v1814_v60 = vpop.f32.mrb[13].mxu0 }
 0x7ab   : > { %v1833_v62 = vmul.f32 0.35355338, %v1814_v60 }
 0x7ac   : > { %v1838_v63 = vadd.f32 %v1834_v59, %v1487_v29 }
 0x7ad   : > { %v4027_v3 = vpop.f32.mrb[14].mxu0  ;;  %v1837_v4 = vadd.f32 %v1833_v62, %v1486_v61 }
 0x7ae   : > { %v1836_v7 = vmul.f32 0.35355338, %v4027_v3  ;;  %v1824_v8 = vpop.f32.mrb[15].mxu0  ;;  %v1844_v9 = vsel %vm774_vm0, %v1838_v63, -inf }
 0x7af   : > { %v1835_v11 = vmul.f32 0.35355338, %v1824_v8  ;;  %1845 = vmax.xlane.f32.xlu1 %v1844_v9  ;;  %v1841_v12 = vsel %vm774_vm0, %v1837_v4, -inf }
 0x7b0   : > { %1842 = vmax.xlane.f32.xlu0 %v1841_v12  ;;  %v1840_v13 = vadd.f32 %v1836_v7, %v1489_v6 }
 0x7b1   : > { %v1839_v14 = vadd.f32 %v1835_v11, %v1488_v10 }
 0x7b2   : > { %v1850_v15 = vsel %vm774_vm0, %v1840_v13, -inf }
 0x7b3   : > { %1851 = vmax.xlane.f32.xlu1 %v1850_v15  ;;  %v1847_v16 = vsel %vm774_vm0, %v1839_v14, -inf }
 0x7b4   : > { %1848 = vmax.xlane.f32.xlu0 %v1847_v16 }
 0x83c   : > { %v1846_v17 = vpop.xlane.xlu1 %1845 }
 0x83d   : > { %v1854_v18 = vsub.f32 %v1838_v63, %v1846_v17  ;;  %v1843_v19 = vpop.xlane.xlu0 %1842 }
 0x83e   : > { %v1853_v20 = vsub.f32 %v1837_v4, %v1843_v19 }
 0x83f   : > { %v1859_v21 = vmul.f32 1.442695, %v1854_v18 }
 0x840   : > { %v1857_v22 = vmul.f32 1.442695, %v1853_v20  ;;  %v1852_v23 = vpop.xlane.xlu1 %1851 }
 0x841   : > { %4309 = vpow2.f32 %v1859_v21  ;;  %v1856_v24 = vsub.f32 %v1840_v13, %v1852_v23  ;;  %v1849_v25 = vpop.xlane.xlu0 %1848 }
 0x842   : > { %4311 = vpow2.f32 %v1857_v22  ;;  %v1855_v26 = vsub.f32 %v1839_v14, %v1849_v25 }
 0x843   : > { %v1863_v27 = vmul.f32 1.442695, %v1856_v24 }
 0x844   : > { %v1861_v28 = vmul.f32 1.442695, %v1855_v26 }
 0x845   : > { %4313 = vpow2.f32 %v1863_v27  ;;  %v2169_v27 = vld [vmem:[%s5041_s17] sm:$0xff] }
 0x846   : > { %4315 = vpow2.f32 %v1861_v28  ;;  %4044 = vmatprep.subr.mxu1 %v2169_v27 }
 0x84b   : > { %v4310_v30 = vpop.eup %4309 }
 0x84c   : > { %v4312_v31 = vpop.eup %4311  ;;  %v1868_v32 = vsel %vm774_vm0, %v4310_v30, 0.0 }
 0x84d   : > { %1869 = vadd.xlane.f32.xlu1 %v1868_v32  ;;  %v1865_v33 = vsel %vm774_vm0, %v4312_v31, 0.0 }
 0x84e   : > { %1866 = vadd.xlane.f32.xlu0 %v1865_v33 }
 0x84f   : > { %v4314_v34 = vpop.eup %4313 }
 0x850   : > { %v4316_v35 = vpop.eup %4315  ;;  %v1874_v36 = vsel %vm774_vm0, %v4314_v34, 0.0 }
 0x851   : > { %1875 = vadd.xlane.f32.xlu1 %v1874_v36  ;;  %v1871_v37 = vsel %vm774_vm0, %v4316_v35, 0.0 }
 0x852   : > { %1872 = vadd.xlane.f32.xlu0 %v1871_v37 }
 0x8da   : > { %v1870_v39 = vpop.xlane.xlu1 %1869 }
 0x8db   : > { %4317 = vrcp.f32 %v1870_v39  ;;  %v1867_v40 = vpop.xlane.xlu0 %1866 }
 0x8dc   : > { %4319 = vrcp.f32 %v1867_v40 }
 0x8de   : > { %v1876_v41 = vpop.xlane.xlu1 %1875 }
 0x8df   : > { %4321 = vrcp.f32 %v1876_v41  ;;  %v1873_v42 = vpop.xlane.xlu0 %1872 }
 0x8e0   : > { %4323 = vrcp.f32 %v1873_v42  ;;  %v3717_v42 = vld [vmem:[%s5039_s15] ss:$0 sm:$0xff] }
 0x8e5   : > { %v4318_v43 = vpop.eup %4317 }
 0x8e6   : > { %v4320_v44 = vpop.eup %4319  ;;  %v1882_v46 = vmul.f32 %v4318_v43, %v4310_v30 }
 0x8e7   : > { %v1881_v45 = vmul.f32 %v4320_v44, %v4312_v31 }
 0x8e9   : > { %v4322_v47 = vpop.eup %4321  ;;  %4030 = vmatprep.mubr.msk.f32.mxu1 %vm774_vm0, %v1881_v45 }
 0x8ea   : > { %v4324_v48 = vpop.eup %4323  ;;  %4031 = vmatmul.mubr.msk.f32.vlgmr.msra.gmra.mrb[12].mxu1 %vm774_vm0, %v1882_v46  ;;  %v1884_v50 = vmul.f32 %v4322_v47, %v4314_v34  ;;  %v3718_v46 = vld [vmem:[%s5040_s16] ss:$0 sm:$0xff] }
 0x8eb   : > { %v1883_v49 = vmul.f32 %v4324_v48, %v4316_v35  ;;  %4045 = vmatpush3.msra.mxu1 %v2169_v27  ;;  %v3753_v27 = vld [vmem:[%s5073_s1 + $0x88] sm:$0xff] }
 0x8ed   : > { %4033 = vmatprep.mubr.msk.f32.mxu1 %vm774_vm0, %v1883_v49 }
 0x8ee   : > { %4034 = vmatmul.mubr.msk.f32.gmra.mrb[14].mxu1 %vm774_vm0, %v1884_v50 }
 0x9bd   : > { %v4032_v51 = vpop.f32.mrb[12].mxu1 }
 0x9be   : > { %v1963_v52 = vpop.f32.mrb[13].mxu1 }
 0x9bf   : > { %4038 = vmatprep.mubr.msk.f32.mxu0 %vm774_vm0, %v1963_v52 }
 0x9c0   : > { %4039 = vmatmul.mubr.msk.f32.vlgmr.msra.gmra.mrb[16].mxu0 %vm774_vm0, %v4032_v51 }
 0x9c1   : > { %v4035_v53 = vpop.f32.mrb[14].mxu1 }
 0x9c2   : > { %v1973_v54 = vpop.f32.mrb[15].mxu1 }
 0x9c3   : > { %4041 = vmatprep.mubr.msk.f32.mxu0 %vm774_vm0, %v1973_v54 }
 0x9c4   : > { %4042 = vmatmul.mubr.msk.f32.gmra.mrb[18].mxu0 %vm774_vm0, %v4035_v53 }
 0xa93   : > { %v4040_v55 = vpop.f32.mrb[16].mxu0 }
 0xa94   : > { %v2081_v57 = vadd.f32 %v4040_v55, %v4518_v2  ;;  %v2061_v58 = vpop.f32.mrb[17].mxu0 }
 0xa95   : > { %v2080_v29 = vadd.f32 %v2061_v58, %v4514_v0 }
 0xa96   : > { %v4694_v59 = vadd.f32 %v3716_v56, %v2081_v57 }
 0xa97   : > { %v4696_v60 = vadd.f32 %v3716_v56, %v2080_v29  ;;  %v4043_v61 = vpop.f32.mrb[18].mxu0  ;;  %v2276_v29 = vld [vmem:[%s5073_s1] sm:$0xff] }
 0xa98   : > { %v2083_v62 = vadd.f32 %v4043_v61, %v4524_v5  ;;  %v2071_v63 = vpop.f32.mrb[19].mxu0  ;;  %v2100_v3 = vsel %vm774_vm0, %v4694_v59, 0.0  ;;  %v3728_v61 = vld [vmem:[%s5073_s1 + $0x20] sm:$0xff]  ;;  %4060 = vmatprep.mubr.msk.f32.mxu0 %vm849_vm2, %v2276_v29 }
 0xa99   : > { %v2082_v4 = vadd.f32 %v2071_v63, %v4516_v1  ;;  %2101 = vadd.xlane.f32.xlu1 %v2100_v3  ;;  %v2097_v2 = vsel %vm774_vm0, %v4696_v60, 0.0 }
 0xa9a   : > { %v4704_v6 = vadd.f32 %v3716_v56, %v2083_v62  ;;  %2098 = vadd.xlane.f32.xlu0 %v2097_v2  ;;  %v3719_v62 = vld [vmem:[%s5042_s18] ss:$0 sm:$0xff] }
 0xa9b   : > { %v4706_v0 = vadd.f32 %v3716_v56, %v2082_v4 }
 0xa9c   : > { %v2106_v7 = vsel %vm774_vm0, %v4704_v6, 0.0 }
 0xa9d   : > { %2107 = vadd.xlane.f32.xlu1 %v2106_v7  ;;  %v2103_v5 = vsel %vm774_vm0, %v4706_v0, 0.0 }
 0xa9e   : > { %2104 = vadd.xlane.f32.xlu0 %v2103_v5 }
 0xb26   : > { %v2102_v8 = vpop.xlane.xlu1 %2101 }
 0xb27   : > { %v2110_v9 = vmul.f32 0.125, %v2102_v8  ;;  %v2099_v1 = vpop.xlane.xlu0 %2098 }
 0xb28   : > { %v2109_v10 = vmul.f32 0.125, %v2099_v1 }
 0xb29   : > { %v2114_v11 = vsub.f32 %v4694_v59, %v2110_v9 }
 0xb2a   : > { %v2113_v12 = vsub.f32 %v4696_v60, %v2109_v10  ;;  %v2108_v13 = vpop.xlane.xlu1 %2107 }
 0xb2b   : > { %v2112_v14 = vmul.f32 0.125, %v2108_v13  ;;  %v2105_v15 = vpop.xlane.xlu0 %2104  ;;  %v2118_v16 = vmul.f32 %v2114_v11, %v2114_v11  ;;  %v2278_v13 = vld [vmem:[%s5073_s1 + $0x10] sm:$0xff] }
 0xb2c   : > { %v2111_v17 = vmul.f32 0.125, %v2105_v15  ;;  %v2117_v18 = vmul.f32 %v2113_v12, %v2113_v12  ;;  %v2279_v15 = vld [vmem:[%s5073_s1 + $0x18] sm:$0xff] }
 0xb2d   : > { %v2116_v19 = vsub.f32 %v4704_v6, %v2112_v14  ;;  %v2124_v20 = vsel %vm774_vm0, %v2118_v16, 0.0  ;;  %v3730_v14 = vld [vmem:[%s5073_s1 + $0x30] sm:$0xff]  ;;  %v3731_v16 = vld [vmem:[%s5073_s1 + $0x38] sm:$0xff] }
 0xb2e   : > { %v2115_v21 = vsub.f32 %v4706_v0, %v2111_v17  ;;  %2125 = vadd.xlane.f32.xlu1 %v2124_v20  ;;  %v2121_v22 = vsel %vm774_vm0, %v2117_v18, 0.0  ;;  %v3736_v17 = vld [vmem:[%s5073_s1 + $0x40] sm:$0xff]  ;;  %v3745_v20 = vld [vmem:[%s5073_s1 + $0x68] sm:$0xff] }
 0xb2f   : > { %2122 = vadd.xlane.f32.xlu0 %v2121_v22  ;;  %v2120_v23 = vmul.f32 %v2116_v19, %v2116_v19  ;;  %v3744_v18 = vld [vmem:[%s5073_s1 + $0x60] sm:$0xff]  ;;  %v3746_v22 = vld [vmem:[%s5073_s1 + $0x70] sm:$0xff] }
 0xb30   : > { %v2119_v24 = vmul.f32 %v2115_v21, %v2115_v21 }
 0xb31   : > { %v2130_v25 = vsel %vm774_vm0, %v2120_v23, 0.0  ;;  %v3739_v23 = vld [vmem:[%s5073_s1 + $0x58] sm:$0xff] }
 0xb32   : > { %2131 = vadd.xlane.f32.xlu1 %v2130_v25  ;;  %v2127_v26 = vsel %vm774_vm0, %v2119_v24, 0.0  ;;  %v3747_v24 = vld [vmem:[%s5073_s1 + $0x78] sm:$0xff]  ;;  %v3752_v25 = vld [vmem:[%s5073_s1 + $0x80] sm:$0xff] }
 0xb33   : > { %2128 = vadd.xlane.f32.xlu0 %v2127_v26  ;;  %v3760_v26 = vld [vmem:[%s5073_s1 + $0xa0] sm:$0xff] }
 0xbbb   : > { %v2126_v28 = vpop.xlane.xlu1 %2125 }
 0xbbc   : > { %v2134_v30 = vmul.f32 0.125, %v2126_v28  ;;  %v2123_v31 = vpop.xlane.xlu0 %2122  ;;  %v3761_v28 = vld [vmem:[%s5073_s1 + $0xa8] sm:$0xff] }
 0xbbd   : > { %v2133_v32 = vmul.f32 0.125, %v2123_v31  ;;  %v3762_v31 = vld [vmem:[%s5073_s1 + $0xb0] sm:$0xff] }
 0xbbe   : > { %v2138_v33 = vadd.f32 1e-06, %v2134_v30  ;;  %v3754_v30 = vld [vmem:[%s5073_s1 + $0x90] sm:$0xff] }
 0xbbf   : > { %v2137_v34 = vadd.f32 1e-06, %v2133_v32  ;;  %v2132_v35 = vpop.xlane.xlu1 %2131  ;;  %v3755_v32 = vld [vmem:[%s5073_s1 + $0x98] sm:$0xff] }
 0xbc0   : > { %4325 = vrsqrt.f32 %v2138_v33  ;;  %v2136_v36 = vmul.f32 0.125, %v2132_v35  ;;  %v2129_v37 = vpop.xlane.xlu0 %2128  ;;  %v3763_v33 = vld [vmem:[%s5073_s1 + $0xb8] sm:$0xff]  ;;  %v3776_v35 = vld [vmem:[%s5073_s1 + $0xe0] sm:$0xff] }
 0xbc1   : > { %4327 = vrsqrt.f32 %v2137_v34  ;;  %v2135_v38 = vmul.f32 0.125, %v2129_v37  ;;  %v3768_v34 = vld [vmem:[%s5073_s1 + $0xc0] sm:$0xff]  ;;  %v3777_v37 = vld [vmem:[%s5073_s1 + $0xe8] sm:$0xff] }
 0xbc2   : > { %v2140_v39 = vadd.f32 1e-06, %v2136_v36  ;;  %v3769_v36 = vld [vmem:[%s5073_s1 + $0xc8] sm:$0xff] }
 0xbc3   : > { %v2139_v40 = vadd.f32 1e-06, %v2135_v38  ;;  %v3770_v38 = vld [vmem:[%s5073_s1 + $0xd0] sm:$0xff] }
 0xbc4   : > { %4329 = vrsqrt.f32 %v2140_v39  ;;  %v3778_v39 = vld [vmem:[%s5073_s1 + $0xf0] sm:$0xff] }
 0xbc5   : > { %4331 = vrsqrt.f32 %v2139_v40  ;;  %v3771_v40 = vld [vmem:[%s5073_s1 + $0xd8] sm:$0xff] }
 0xbca   : > { %v4326_v41 = vpop.eup %4325 }
 0xbcb   : > { %v4328_v43 = vpop.eup %4327  ;;  %v2146_v44 = vmul.f32 %v4326_v41, %v2114_v11  ;;  %v2277_v11 = vld [vmem:[%s5073_s1 + $0x8] sm:$0xff]  ;;  %v3779_v41 = vld [vmem:[%s5073_s1 + $0xf8] sm:$0xff] }
 0xbcc   : > { %v2145_v45 = vmul.f32 %v4328_v43, %v2113_v12  ;;  %v3729_v12 = vld [vmem:[%s5073_s1 + $0x28] sm:$0xff] }
 0xbcd   : > { %v2156_v47 = vmul.f32 %v3717_v42, %v2146_v44  ;;  %v3785_v43 = vld [vmem:[%s5073_s1 + $0x108] sm:$0xff]  ;;  %v3786_v44 = vld [vmem:[%s5073_s1 + $0x110] sm:$0xff] }
 0xbce   : > { %v4330_v48 = vpop.eup %4329  ;;  %v2155_v49 = vmul.f32 %v3717_v42, %v2145_v45  ;;  %v3787_v45 = vld [vmem:[%s5073_s1 + $0x118] sm:$0xff] }
 0xbcf   : > { %v4332_v50 = vpop.eup %4331  ;;  %v2148_v51 = vmul.f32 %v4330_v48, %v2116_v19  ;;  %v2166_v54 = vadd.f32 %v3718_v46, %v2156_v47  ;;  %v3737_v19 = vld [vmem:[%s5073_s1 + $0x48] sm:$0xff] }
 0xbd0   : > { %v2165_v52 = vadd.f32 %v3718_v46, %v2155_v49  ;;  %v2147_v53 = vmul.f32 %v4332_v50, %v2115_v21  ;;  %v3738_v21 = vld [vmem:[%s5073_s1 + $0x50] sm:$0xff]  ;;  %v3421_v47 = vld [vmem:[%s5045_s21 + $0x8] sm:$0xff]  ;;  %v2377_v49 = vlaneseq }
 0xbd1   : > { %v2158_v55 = vmul.f32 %v3717_v42, %v2148_v51 }
 0xbd2   : > { %4046 = vmatprep.mubr.msk.f32.mxu1 %vm774_vm0, %v2165_v52  ;;  %v2157_v56 = vmul.f32 %v3717_v42, %v2147_v53  ;;  %v3784_v42 = vld [vmem:[%s5073_s1 + $0x100] sm:$0xff]  ;;  %v4926_v50 = vshrl.u32 %v2377_v49, 7 }
 0xbd3   : > { %4047 = vmatmul.mubr.msk.f32.vlgmr.msra.gmra.mrb[16].mxu1 %vm774_vm0, %v2166_v54  ;;  %v2168_v58 = vadd.f32 %v3718_v46, %v2158_v55  ;;  %v4933_v53 = vld [vmem:[%s5043_s19] sm:$0xff] }
 0xbd4   : > { %v2167_v57 = vadd.f32 %v3718_v46, %v2157_v56  ;;  %v3420_v46 = vld [vmem:[%s5045_s21] sm:$0xff]  ;;  %v2379_v51 = vsub.s32 0, %v4926_v50  ;;  %v2493_v52 = vsub.s32 1, %v4926_v50 }
 0xbd5   : > { %v4284_v48 = vpack.c.bf16 %v3421_v47, %v3420_v46 }
 0xbd6   : > { %4049 = vmatprep.mubr.msk.f32.mxu1 %vm774_vm0, %v2167_v57  ;;  %v2380_v54 = vrot.slane %v4933_v53, %v2379_v51  ;;  %v2494_v55 = vrot.slane %v4933_v53, %v2493_v52 }
 0xbd7   : > { %4050 = vmatmul.mubr.msk.f32.gmra.mrb[18].mxu1 %vm774_vm0, %v2168_v58 }
 0xbd8   : > { %4074 = vmatprep.mubr.msk.f32.mxu1 %vm849_vm2, %v3728_v61 }
 0xca6   : > { %v4048_v63 = vpop.f32.mrb[16].mxu1 }
 0xca7   : > { %v2261_v3 = vadd.f32 %v4048_v63, %v3719_v62  ;;  %v2255_v4 = vpop.f32.mrb[17].mxu1  ;;  %v2607_v63 = vsub.s32 2, %v4926_v50 }
 0xca8   : > { %v2256_v2 = vadd.f32 %v3719_v62, %v2255_v4 }
 0xcaa   : > { %v4744_v7 = vpack.c.bf16 %v2261_v3, %v2256_v2  ;;  %v4051_v5 = vpop.f32.mrb[18].mxu1  ;;  %v2721_v3 = vsub.s32 3, %v4926_v50 }
 0xcab   : > { %v2271_v8 = vadd.f32 %v4051_v5, %v3719_v62  ;;  %v2265_v9 = vpop.f32.mrb[19].mxu1 }
 0xcac   : > { %v2266_v1 = vadd.f32 %v3719_v62, %v2265_v9  ;;  %4213 = vmatprep.subr.bf16.mxu0 %v4744_v7  ;;  %4221 = vmatprep.subr.bf16.mxu1 %v4744_v7 }
 0xcad   : > { %4215 = vmatpush3.bf16.msra.mxu0 %v4744_v7  ;;  %4223 = vmatpush3.bf16.msra.mxu1 %v4744_v7 }
 0xcae   : > { %v4750_v10 = vpack.c.bf16 %v2271_v8, %v2266_v1 }
 0xcb0   : > { %4217 = vmatprep.subr.bf16.mxu0 %v4750_v10  ;;  %4225 = vmatprep.subr.bf16.mxu1 %v4750_v10 }
 0xcb1   : > { %4219 = vmatpush3.bf16.msra.mxu0 %v4750_v10  ;;  %4227 = vmatpush3.bf16.msra.mxu1 %v4750_v10 }
 0xcb2   : > { %4229 = vmatprep.subr.bf16.mxu0 %v4744_v7  ;;  %4237 = vmatprep.subr.bf16.mxu1 %v4744_v7 }
 0xcb4   : > { %4061 = vmatmul.mubr.msk.f32.vlgmr.msra.gmra.mrb[20].mxu0 %vm849_vm2, %v2277_v11  ;;  %4075 = vmatmul.mubr.msk.f32.vlgmr.msra.gmra.mrb[20].mxu1 %vm849_vm2, %v3729_v12  ;;  %v2608_v12 = vrot.slane %v4933_v53, %v2607_v63 }
 0xcb5   : > { %4231 = vmatpush3.bf16.msra.mxu0 %v4744_v7  ;;  %4239 = vmatpush3.bf16.msra.mxu1 %v4744_v7 }
 0xcb6   : > { %4233 = vmatprep.subr.bf16.mxu0 %v4750_v10  ;;  %4241 = vmatprep.subr.bf16.mxu1 %v4750_v10 }
 0xcb7   : > { %4063 = vmatprep.mubr.msk.f32.mxu0 %vm849_vm2, %v2278_v13  ;;  %4077 = vmatprep.mubr.msk.f32.mxu1 %vm849_vm2, %v3730_v14  ;;  %v2722_v14 = vrot.slane %v4933_v53, %v2721_v3 }
 0xcb8   : > { %4064 = vmatmul.mubr.msk.f32.gmra.mrb[22].mxu0 %vm849_vm2, %v2279_v15  ;;  %4078 = vmatmul.mubr.msk.f32.gmra.mrb[22].mxu1 %vm849_vm2, %v3731_v16 }
 0xcb9   : > { %4235 = vmatpush3.bf16.msra.mxu0 %v4750_v10  ;;  %4243 = vmatpush3.bf16.msra.mxu1 %v4750_v10 }
 0xcba   : > { %4245 = vmatprep.subr.bf16.mxu0 %v4744_v7  ;;  %4253 = vmatprep.subr.bf16.mxu1 %v4744_v7 }
 0xcbb   : > { %4088 = vmatprep.mubr.msk.f32.mxu0 %vm849_vm2, %v3736_v17  ;;  %4102 = vmatprep.mubr.msk.f32.mxu1 %vm849_vm2, %v3744_v18 }
 0xcbc   : > { %4089 = vmatmul.mubr.msk.f32.vlgmr.msra.gmra.mrb[24].mxu0 %vm849_vm2, %v3737_v19  ;;  %4103 = vmatmul.mubr.msk.f32.vlgmr.msra.gmra.mrb[24].mxu1 %vm849_vm2, %v3745_v20 }
 0xcbd   : > { %4247 = vmatpush3.bf16.msra.mxu0 %v4744_v7  ;;  %4255 = vmatpush3.bf16.msra.mxu1 %v4744_v7 }
 0xcbe   : > { %4249 = vmatprep.subr.bf16.mxu0 %v4750_v10  ;;  %4257 = vmatprep.subr.bf16.mxu1 %v4750_v10 }
 0xcbf   : > { %4091 = vmatprep.mubr.msk.f32.mxu0 %vm849_vm2, %v3738_v21  ;;  %4105 = vmatprep.mubr.msk.f32.mxu1 %vm849_vm2, %v3746_v22  ;;  %v2835_v21 = vsub.s32 4, %v4926_v50 }
 0xcc0   : > { %4092 = vmatmul.mubr.msk.f32.gmra.mrb[26].mxu0 %vm849_vm2, %v3739_v23  ;;  %4106 = vmatmul.mubr.msk.f32.gmra.mrb[26].mxu1 %vm849_vm2, %v3747_v24 }
 0xcc1   : > { %4251 = vmatpush3.bf16.msra.mxu0 %v4750_v10  ;;  %4259 = vmatpush3.bf16.msra.mxu1 %v4750_v10 }
 0xcc2   : > { %4261 = vmatprep.subr.bf16.mxu0 %v4744_v7  ;;  %4269 = vmatprep.subr.bf16.mxu1 %v4744_v7 }
 0xcc3   : > { %4116 = vmatprep.mubr.msk.f32.mxu0 %vm849_vm2, %v3752_v25  ;;  %4130 = vmatprep.mubr.msk.f32.mxu1 %vm849_vm2, %v3760_v26  ;;  %v2949_v26 = vsub.s32 5, %v4926_v50 }
 0xcc4   : > { %4117 = vmatmul.mubr.msk.f32.vlgmr.msra.gmra.mrb[28].mxu0 %vm849_vm2, %v3753_v27  ;;  %4131 = vmatmul.mubr.msk.f32.vlgmr.msra.gmra.mrb[28].mxu1 %vm849_vm2, %v3761_v28 }
 0xcc5   : > { %4263 = vmatpush3.bf16.msra.mxu0 %v4744_v7  ;;  %4271 = vmatpush3.bf16.msra.mxu1 %v4744_v7 }
 0xcc6   : > { %4265 = vmatprep.subr.bf16.mxu0 %v4750_v10  ;;  %4273 = vmatprep.subr.bf16.mxu1 %v4750_v10 }
 0xcc7   : > { %4119 = vmatprep.mubr.msk.f32.mxu0 %vm849_vm2, %v3754_v30  ;;  %4133 = vmatprep.mubr.msk.f32.mxu1 %vm849_vm2, %v3762_v31 }
 0xcc8   : > { %4120 = vmatmul.mubr.msk.f32.gmra.mrb[30].mxu0 %vm849_vm2, %v3755_v32  ;;  %4134 = vmatmul.mubr.msk.f32.gmra.mrb[30].mxu1 %vm849_vm2, %v3763_v33 }
 0xcc9   : > { %4267 = vmatpush3.bf16.msra.mxu0 %v4750_v10  ;;  %4275 = vmatpush3.bf16.msra.mxu1 %v4750_v10 }
 0xcca   : > { %4277 = vmatprep.subr.bf16.mxu0 %v4744_v7  ;;  %4144 = vmatprep.mubr.msk.f32.mxu0 %vm849_vm2, %v3768_v34  ;;  %v2836_v34 = vrot.slane %v4933_v53, %v2835_v21 }
 0xccb   : > { %4158 = vmatprep.mubr.msk.f32.mxu1 %vm849_vm2, %v3776_v35  ;;  %4285 = vmatprep.subr.bf16.mxu1 %v4284_v48 }
 0xccc   : > { %4145 = vmatmul.mubr.msk.f32.vlgmr.msra.gmra.mrb[32].mxu0 %vm849_vm2, %v3769_v36  ;;  %4159 = vmatmul.mubr.msk.f32.vlgmr.msra.gmra.mrb[32].mxu1 %vm849_vm2, %v3777_v37 }
 0xccd   : > { %4279 = vmatpush3.bf16.msra.mxu0 %v4744_v7  ;;  %4147 = vmatprep.mubr.msk.f32.mxu0 %vm849_vm2, %v3770_v38 }
 0xcce   : > { %4281 = vmatprep.subr.bf16.mxu0 %v4750_v10  ;;  %4161 = vmatprep.mubr.msk.f32.mxu1 %vm849_vm2, %v3778_v39 }
 0xccf   : > { %4287 = vmatpush3.bf16.msra.mxu1 %v4284_v48  ;;  %v3063_v48 = vsub.s32 6, %v4926_v50 }
 0xcd0   : > { %4148 = vmatmul.mubr.msk.f32.gmra.mrb[34].mxu0 %vm849_vm2, %v3771_v40  ;;  %4162 = vmatmul.mubr.msk.f32.gmra.mrb[34].mxu1 %vm849_vm2, %v3779_v41  ;;  %v2950_v40 = vrot.slane %v4933_v53, %v2949_v26 }
 0xcd1   : > { %4283 = vmatpush3.bf16.msra.mxu0 %v4750_v10  ;;  %4172 = vmatprep.mubr.msk.f32.mxu0 %vm849_vm2, %v3784_v42 }
 0xcd4   : > { %4173 = vmatmul.mubr.msk.f32.vlgmr.msra.gmra.mrb[36].mxu0 %vm849_vm2, %v3785_v43 }
 0xcd5   : > { %4175 = vmatprep.mubr.msk.f32.mxu0 %vm849_vm2, %v3786_v44 }
 0xcd8   : > { %4176 = vmatmul.mubr.msk.f32.gmra.mrb[38].mxu0 %vm849_vm2, %v3787_v45 }
 0xd87   : > { %v4062_v56 = vpop.f32.mrb[20].mxu0  ;;  %v4076_v57 = vpop.f32.mrb[20].mxu1 }
 0xd88   : > { %v2382_v58 = vmul.f32 %v4062_v56, %v2380_v54  ;;  %v2496_v29 = vmul.f32 %v4076_v57, %v2494_v55  ;;  %v2358_v61 = vpop.f32.mrb[21].mxu0  ;;  %v2472_v62 = vpop.f32.mrb[21].mxu1  ;;  %v3177_v56 = vsub.s32 7, %v4926_v50 }
 0xd89   : > { %v2381_v4 = vmul.f32 %v2380_v54, %v2358_v61  ;;  %v2495_v2 = vmul.f32 %v2494_v55, %v2472_v62 }
 0xd8a   : > { %v2500_v7 = vadd.f32 %v2496_v29, %v2382_v58 }
 0xd8b   : > { %v2499_v5 = vadd.f32 %v2495_v2, %v2381_v4  ;;  %v4065_v8 = vpop.f32.mrb[22].mxu0  ;;  %v4079_v9 = vpop.f32.mrb[22].mxu1  ;;  %v3064_v4 = vrot.slane %v4933_v53, %v3063_v48 }
 0xd8c   : > { %v2384_v1 = vmul.f32 %v4065_v8, %v2380_v54  ;;  %v2368_v10 = vpop.f32.mrb[23].mxu0  ;;  %v2498_v11 = vmul.f32 %v4079_v9, %v2494_v55  ;;  %v2482_v13 = vpop.f32.mrb[23].mxu1 }
 0xd8d   : > { %v2383_v15 = vmul.f32 %v2380_v54, %v2368_v10  ;;  %v2497_v16 = vmul.f32 %v2494_v55, %v2482_v13 }
 0xd8e   : > { %v2502_v17 = vadd.f32 %v2498_v11, %v2384_v1  ;;  %v3178_v1 = vrot.slane %v4933_v53, %v3177_v56 }
 0xd8f   : > { %v4090_v18 = vpop.f32.mrb[24].mxu0  ;;  %v2501_v19 = vadd.f32 %v2497_v16, %v2383_v15  ;;  %v4104_v20 = vpop.f32.mrb[24].mxu1 }
 0xd90   : > { %v2610_v22 = vmul.f32 %v4090_v18, %v2608_v12  ;;  %v2586_v23 = vpop.f32.mrb[25].mxu0  ;;  %v2724_v24 = vmul.f32 %v4104_v20, %v2722_v14  ;;  %v2700_v25 = vpop.f32.mrb[25].mxu1 }
 0xd91   : > { %v2609_v27 = vmul.f32 %v2608_v12, %v2586_v23  ;;  %v2723_v28 = vmul.f32 %v2722_v14, %v2700_v25 }
 0xd92   : > { %v2614_v30 = vadd.f32 %v2610_v22, %v2500_v7 }
 0xd93   : > { %v2613_v31 = vadd.f32 %v2609_v27, %v2499_v5  ;;  %v4093_v32 = vpop.f32.mrb[26].mxu0  ;;  %v4107_v33 = vpop.f32.mrb[26].mxu1 }
 0xd94   : > { %v2728_v35 = vadd.f32 %v2724_v24, %v2614_v30  ;;  %v2612_v36 = vmul.f32 %v4093_v32, %v2608_v12  ;;  %v2596_v37 = vpop.f32.mrb[27].mxu0  ;;  %v2726_v38 = vmul.f32 %v4107_v33, %v2722_v14  ;;  %v2710_v39 = vpop.f32.mrb[27].mxu1 }
 0xd95   : > { %v2727_v41 = vadd.f32 %v2723_v28, %v2613_v31  ;;  %v2611_v42 = vmul.f32 %v2608_v12, %v2596_v37  ;;  %v2725_v43 = vmul.f32 %v2722_v14, %v2710_v39 }
 0xd96   : > { %v2616_v44 = vadd.f32 %v2612_v36, %v2502_v17  ;;  %v3792_v36 = vld [vmem:[%s5043_s19 + $0x8] ss:$0 sm:$0xff] }
 0xd97   : > { %v2615_v45 = vadd.f32 %v2611_v42, %v2501_v19  ;;  %v4118_v46 = vpop.f32.mrb[28].mxu0  ;;  %v4132_v47 = vpop.f32.mrb[28].mxu1 }
 0xd98   : > { %v2730_v49 = vadd.f32 %v2726_v38, %v2616_v44  ;;  %v2838_v51 = vmul.f32 %v4118_v46, %v2836_v34  ;;  %v2814_v52 = vpop.f32.mrb[29].mxu0  ;;  %v2952_v54 = vmul.f32 %v4132_v47, %v2950_v40  ;;  %v2928_v55 = vpop.f32.mrb[29].mxu1  ;;  %v3793_v44 = vld [vmem:[%s5044_s20] ss:$0 sm:$0xff] }
 0xd99   : > { %v2729_v57 = vadd.f32 %v2725_v43, %v2615_v45  ;;  %v2837_v58 = vmul.f32 %v2836_v34, %v2814_v52  ;;  %v2951_v29 = vmul.f32 %v2950_v40, %v2928_v55 }
 0xd9a   : > { %v2842_v61 = vadd.f32 %v2838_v51, %v2728_v35 }
 0xd9b   : > { %v2841_v62 = vadd.f32 %v2837_v58, %v2727_v41  ;;  %v4121_v63 = vpop.f32.mrb[30].mxu0  ;;  %v4135_v3 = vpop.f32.mrb[30].mxu1 }
 0xd9c   : > { %v2956_v2 = vadd.f32 %v2952_v54, %v2842_v61  ;;  %v2840_v7 = vmul.f32 %v4121_v63, %v2836_v34  ;;  %v2824_v5 = vpop.f32.mrb[31].mxu0  ;;  %v2954_v8 = vmul.f32 %v4135_v3, %v2950_v40  ;;  %v2938_v9 = vpop.f32.mrb[31].mxu1 }
 0xd9d   : > { %v2955_v10 = vadd.f32 %v2951_v29, %v2841_v62  ;;  %v2839_v11 = vmul.f32 %v2836_v34, %v2824_v5  ;;  %v2953_v12 = vmul.f32 %v2950_v40, %v2938_v9 }
 0xd9e   : > { %v2844_v50 = vadd.f32 %v2840_v7, %v2730_v49 }
 0xd9f   : > { %v2843_v13 = vadd.f32 %v2839_v11, %v2729_v57  ;;  %v4146_v14 = vpop.f32.mrb[32].mxu0  ;;  %v4160_v15 = vpop.f32.mrb[32].mxu1 }
 0xda0   : > { %v2958_v16 = vadd.f32 %v2954_v8, %v2844_v50  ;;  %v3066_v17 = vmul.f32 %v4146_v14, %v3064_v4  ;;  %v3042_v18 = vpop.f32.mrb[33].mxu0  ;;  %v3180_v19 = vmul.f32 %v4160_v15, %v3178_v1  ;;  %v3156_v20 = vpop.f32.mrb[33].mxu1 }
 0xda1   : > { %v2957_v21 = vadd.f32 %v2953_v12, %v2843_v13  ;;  %v3065_v22 = vmul.f32 %v3064_v4, %v3042_v18  ;;  %v3179_v23 = vmul.f32 %v3178_v1, %v3156_v20 }
 0xda2   : > { %v3070_v24 = vadd.f32 %v3066_v17, %v2956_v2 }
 0xda3   : > { %v3069_v25 = vadd.f32 %v3065_v22, %v2955_v10  ;;  %v4149_v26 = vpop.f32.mrb[34].mxu0  ;;  %v4163_v27 = vpop.f32.mrb[34].mxu1 }
 0xda4   : > { %v3184_v53 = vadd.f32 %v3180_v19, %v3070_v24  ;;  %v3068_v28 = vmul.f32 %v4149_v26, %v3064_v4  ;;  %v3052_v30 = vpop.f32.mrb[35].mxu0  ;;  %v3182_v31 = vmul.f32 %v4163_v27, %v3178_v1  ;;  %v3166_v32 = vpop.f32.mrb[35].mxu1 }
 0xda5   : > { %v3183_v33 = vadd.f32 %v3179_v23, %v3069_v25  ;;  %v3067_v34 = vmul.f32 %v3064_v4, %v3052_v30  ;;  %v3181_v35 = vmul.f32 %v3178_v1, %v3166_v32 }
 0xda6   : > { %v3072_v37 = vadd.f32 %v3068_v28, %v2958_v16 }
 0xda7   : > { %v3071_v38 = vadd.f32 %v3067_v34, %v2957_v21  ;;  %v4174_v39 = vpop.f32.mrb[36].mxu0 }
 0xda8   : > { %v3186_v40 = vadd.f32 %v3182_v31, %v3072_v37  ;;  %v3294_v41 = vmul.f32 %v4174_v39, %v3792_v36  ;;  %v3270_v42 = vpop.f32.mrb[37].mxu0 }
 0xda9   : > { %v3185_v43 = vadd.f32 %v3181_v35, %v3071_v38  ;;  %v3293_v45 = vmul.f32 %v3792_v36, %v3270_v42 }
 0xdaa   : > { %v3298_v46 = vadd.f32 %v3294_v41, %v3184_v53 }
 0xdab   : > { %v3297_v47 = vadd.f32 %v3293_v45, %v3183_v33  ;;  %v4177_v48 = vpop.f32.mrb[38].mxu0 }
 0xdac   : > { %v4955_v49 = vadd.f32 %v3793_v44, %v3298_v46  ;;  %v3296_v51 = vmul.f32 %v4177_v48, %v3792_v36  ;;  %v3280_v52 = vpop.f32.mrb[39].mxu0 }
 0xdad   : > { %v4957_v54 = vadd.f32 %v3793_v44, %v3297_v47  ;;  %v3295_v55 = vmul.f32 %v3792_v36, %v3280_v52 }
 0xdae   : > { %v4960_v56 = vmul.f32 0.70710677, %v4955_v49  ;;  %v3300_v57 = vadd.f32 %v3296_v51, %v3186_v40 }
 0xdaf   : > { %v4963_v58 = vmul.f32 0.70710677, %v4957_v54  ;;  %v3299_v29 = vadd.f32 %v3295_v55, %v3185_v43 }
 0xdb0   : > { %v3321_v61 = vand.u32 2147483647, %v4960_v56  ;;  %v4966_v62 = vadd.f32 %v3793_v44, %v3300_v57  ;;  %vm3401_vm3 = vcmp.ge.f32.partialorder %v4960_v56, 0.0 }
 0xdb1   : > { %v3320_v63 = vand.u32 2147483647, %v4963_v58  ;;  %v4969_v3 = vadd.f32 %v3793_v44, %v3299_v29  ;;  %vm3400_vm4 = vcmp.ge.f32.partialorder %v4963_v58, 0.0 }
 0xdb2   : > { %v3325_v4 = vmul.f32 0.3275911, %v3321_v61  ;;  %v4972_v2 = vmul.f32 0.70710677, %v4966_v62  ;;  %v3377_v14 = vsub.f32 0.0, %v3321_v61 }
 0xdb3   : > { %v3324_v7 = vmul.f32 0.3275911, %v3320_v63  ;;  %v4975_v5 = vmul.f32 0.70710677, %v4969_v3  ;;  %v3376_v15 = vsub.f32 0.0, %v3320_v63 }
 0xdb4   : > { %v3329_v8 = vadd.f32 1.0, %v3325_v4  ;;  %v3323_v9 = vand.u32 2147483647, %v4972_v2  ;;  %v3381_v17 = vmul.f32 %v3377_v14, %v3321_v61  ;;  %vm3403_vm5 = vcmp.ge.f32.partialorder %v4972_v2, 0.0 }
 0xdb5   : > { %v3328_v1 = vadd.f32 1.0, %v3324_v7  ;;  %v3322_v10 = vand.u32 2147483647, %v4975_v5  ;;  %v3380_v21 = vmul.f32 %v3376_v15, %v3320_v63  ;;  %vm3402_vm7 = vcmp.ge.f32.partialorder %v4975_v5, 0.0 }
 0xdb6   : > { %4333 = vrcp.f32 %v3329_v8  ;;  %v3327_v11 = vmul.f32 0.3275911, %v3323_v9  ;;  %v3379_v18 = vsub.f32 0.0, %v3323_v9  ;;  %v3386_v26 = vmul.f32 1.442695, %v3381_v17 }
 0xdb7   : > { %4335 = vrcp.f32 %v3328_v1  ;;  %v3326_v12 = vmul.f32 0.3275911, %v3322_v10  ;;  %v3378_v22 = vsub.f32 0.0, %v3322_v10  ;;  %v3384_v31 = vmul.f32 1.442695, %v3380_v21 }
 0xdb8   : > { %v3331_v50 = vadd.f32 1.0, %v3327_v11  ;;  %v3383_v27 = vmul.f32 %v3379_v18, %v3323_v9 }
 0xdb9   : > { %v3330_v13 = vadd.f32 1.0, %v3326_v12  ;;  %v3382_v32 = vmul.f32 %v3378_v22, %v3322_v10 }
 0xdba   : > { %4337 = vrcp.f32 %v3331_v50  ;;  %v3390_v38 = vmul.f32 1.442695, %v3383_v27 }
 0xdbb   : > { %4339 = vrcp.f32 %v3330_v13  ;;  %v3388_v42 = vmul.f32 1.442695, %v3382_v32 }
 0xdbc   : > { %4341 = vpow2.f32 %v3386_v26 }
 0xdbd   : > { %4343 = vpow2.f32 %v3384_v31 }
 0xdbe   : > { %4345 = vpow2.f32 %v3390_v38 }
 0xdbf   : > { %4347 = vpow2.f32 %v3388_v42 }
 0xdc0   : > { %v4334_v16 = vpop.eup %4333 }
 0xdc1   : > { %v4336_v19 = vpop.eup %4335  ;;  %v3341_v20 = vmul.f32 1.0614054, %v4334_v16 }
 0xdc2   : > { %v3340_v23 = vmul.f32 1.0614054, %v4336_v19 }
 0xdc3   : > { %v3345_v24 = vadd.f32 -1.4531521, %v3341_v20 }
 0xdc4   : > { %v4338_v25 = vpop.eup %4337  ;;  %v3344_v53 = vadd.f32 -1.4531521, %v3340_v23 }
 0xdc5   : > { %v4340_v28 = vpop.eup %4339  ;;  %v3349_v30 = vmul.f32 %v4334_v16, %v3345_v24  ;;  %v3343_v33 = vmul.f32 1.0614054, %v4338_v25 }
 0xdc6   : > { %v3348_v34 = vmul.f32 %v4336_v19, %v3344_v53  ;;  %v3342_v35 = vmul.f32 1.0614054, %v4340_v28  ;;  %v4342_v1 = vpop.eup %4341 }
 0xdc7   : > { %v3353_v36 = vadd.f32 1.4214138, %v3349_v30  ;;  %v3347_v37 = vadd.f32 -1.4531521, %v3343_v33  ;;  %v4344_v12 = vpop.eup %4343  ;;  %v3312_v33 = vmul.f32 0.5, %v4957_v54 }
 0xdc8   : > { %v3352_v39 = vadd.f32 1.4214138, %v3348_v34  ;;  %v3346_v40 = vadd.f32 -1.4531521, %v3342_v35  ;;  %v4346_v20 = vpop.eup %4345 }
 0xdc9   : > { %v3357_v41 = vmul.f32 %v4334_v16, %v3353_v36  ;;  %v3351_v43 = vmul.f32 %v4338_v25, %v3347_v37  ;;  %v4348_v23 = vpop.eup %4347 }
 0xdca   : > { %v3356_v44 = vmul.f32 %v4336_v19, %v3352_v39  ;;  %v3350_v45 = vmul.f32 %v4340_v28, %v3346_v40  ;;  %v3314_v39 = vmul.f32 0.5, %v4969_v3  ;;  %v3315_v40 = vmul.f32 0.5, %v4966_v62 }
 0xdcb   : > { %v3361_v46 = vadd.f32 -0.28449672, %v3357_v41  ;;  %v3355_v47 = vadd.f32 1.4214138, %v3351_v43  ;;  %v3798_v41 = vld [vmem:[%s5046_s22] ss:$0 sm:$0xff] }
 0xdcc   : > { %v3360_v48 = vadd.f32 -0.28449672, %v3356_v44  ;;  %v3354_v51 = vadd.f32 1.4214138, %v3350_v45 }
 0xdcd   : > { %v3365_v52 = vmul.f32 %v4334_v16, %v3361_v46  ;;  %v3359_v55 = vmul.f32 %v4338_v25, %v3355_v47 }
 0xdce   : > { %v3364_v57 = vmul.f32 %v4336_v19, %v3360_v48  ;;  %v3358_v29 = vmul.f32 %v4340_v28, %v3354_v51 }
 0xdcf   : > { %v3369_v61 = vadd.f32 0.2548296, %v3365_v52  ;;  %v3363_v63 = vadd.f32 -0.28449672, %v3359_v55 }
 0xdd0   : > { %v3368_v4 = vadd.f32 0.2548296, %v3364_v57  ;;  %v3362_v7 = vadd.f32 -0.28449672, %v3358_v29 }
 0xdd1   : > { %v3373_v8 = vmul.f32 %v4334_v16, %v3369_v61  ;;  %v3367_v9 = vmul.f32 %v4338_v25, %v3363_v63 }
 0xdd2   : > { %v3372_v10 = vmul.f32 %v4336_v19, %v3368_v4  ;;  %v3366_v11 = vmul.f32 %v4340_v28, %v3362_v7 }
 0xdd3   : > { %v3393_v50 = vmul.f32 %v4342_v1, %v3373_v8  ;;  %v3371_v13 = vadd.f32 0.2548296, %v3367_v9 }
 0xdd4   : > { %v3392_v14 = vmul.f32 %v4344_v12, %v3372_v10  ;;  %v3370_v15 = vadd.f32 0.2548296, %v3366_v11 }
 0xdd5   : > { %v3397_v17 = vsub.f32 1.0, %v3393_v50  ;;  %v3375_v18 = vmul.f32 %v4338_v25, %v3371_v13 }
 0xdd6   : > { %v3396_v21 = vsub.f32 1.0, %v3392_v14  ;;  %v3374_v22 = vmul.f32 %v4340_v28, %v3370_v15  ;;  %v3313_v28 = vmul.f32 0.5, %v4955_v49 }
 0xdd7   : > { %v3405_v24 = vsub.f32 0.0, %v3397_v17  ;;  %v3395_v26 = vmul.f32 %v4346_v20, %v3375_v18 }
 0xdd8   : > { %v3404_v16 = vsub.f32 0.0, %v3396_v21  ;;  %v3394_v27 = vmul.f32 %v4348_v23, %v3374_v22 }
 0xdd9   : > { %v3409_v53 = vsel %vm3401_vm3, %v3397_v17, %v3405_v24  ;;  %v3399_v19 = vsub.f32 1.0, %v3395_v26 }
 0xdda   : > { %v3413_v30 = vadd.f32 1.0, %v3409_v53  ;;  %v3408_v31 = vsel %vm3400_vm4, %v3396_v21, %v3404_v16  ;;  %v3398_v32 = vsub.f32 1.0, %v3394_v27 }
 0xddb   : > { %v3412_v25 = vadd.f32 1.0, %v3408_v31  ;;  %v3407_v34 = vsub.f32 0.0, %v3399_v19 }
 0xddc   : > { %v3406_v35 = vsub.f32 0.0, %v3398_v32  ;;  %v3417_v37 = vmul.f32 %v3413_v30, %v3313_v28 }
 0xddd   : > { %v3416_v56 = vmul.f32 %v3412_v25, %v3312_v33  ;;  %v3411_v36 = vsel %vm3403_vm5, %v3399_v19, %v3407_v34  ;;  %v3799_v25 = vld [vmem:[%s5047_s23] ss:$0 sm:$0xff] }
 0xdde   : > { %v3410_v58 = vsel %vm3402_vm7, %v3398_v32, %v3406_v35  ;;  %v3415_v38 = vadd.f32 1.0, %v3411_v36 }
 0xddf   : > { %4182 = vmatprep.mubr.msk.f32.mxu1 %vm3422_vm6, %v3416_v56  ;;  %v3414_v54 = vadd.f32 1.0, %v3410_v58  ;;  %v3800_v56 = vld [vmem:[%s5048_s24] ss:$0 sm:$0xff] }
 0xde0   : > { %4183 = vmatmul.mubr.msk.f32.vlgmr.msra.gmra.mrb[36].mxu1 %vm3422_vm6, %v3417_v37  ;;  %v3419_v2 = vmul.f32 %v3415_v38, %v3315_v40 }
 0xde1   : > { %v3418_v49 = vmul.f32 %v3414_v54, %v3314_v39 }
 0xde3   : > { %4185 = vmatprep.mubr.msk.f32.mxu1 %vm3422_vm6, %v3418_v49 }
 0xde4   : > { %4186 = vmatmul.mubr.msk.f32.gmra.mrb[38].mxu1 %vm3422_vm6, %v3419_v2 }
 0xeb3   : > { %v4184_v5 = vpop.f32.mrb[36].mxu1 }
 0xeb4   : > { %v3521_v3 = vadd.f32 %v4184_v5, %v4694_v59  ;;  %v3501_v42 = vpop.f32.mrb[37].mxu1 }
 0xeb5   : > { %v3520_v43 = vadd.f32 %v3501_v42, %v4696_v60 }
 0xeb6   : > { %v3532_v44 = vadd.f32 %v3798_v41, %v3521_v3 }
 0xeb7   : > { %v4187_v62 = vpop.f32.mrb[38].mxu1  ;;  %v3531_v45 = vadd.f32 %v3798_v41, %v3520_v43 }
 0xeb8   : > { %v3523_v46 = vadd.f32 %v4187_v62, %v4704_v6  ;;  %v3511_v47 = vpop.f32.mrb[39].mxu1  ;;  %v3540_v48 = vsel %vm774_vm0, %v3532_v44, 0.0 }
 0xeb9   : > { %v3522_v51 = vadd.f32 %v3511_v47, %v4706_v0  ;;  %3541 = vadd.xlane.f32.xlu1 %v3540_v48  ;;  %v3537_v52 = vsel %vm774_vm0, %v3531_v45, 0.0 }
 0xeba   : > { %3538 = vadd.xlane.f32.xlu0 %v3537_v52  ;;  %v3534_v55 = vadd.f32 %v3798_v41, %v3523_v46 }
 0xebb   : > { %v3533_v57 = vadd.f32 %v3798_v41, %v3522_v51 }
 0xebc   : > { %v3546_v59 = vsel %vm774_vm0, %v3534_v55, 0.0 }
 0xebd   : > { %3547 = vadd.xlane.f32.xlu1 %v3546_v59  ;;  %v3543_v60 = vsel %vm774_vm0, %v3533_v57, 0.0 }
 0xebe   : > { %3544 = vadd.xlane.f32.xlu0 %v3543_v60 }
 0xf46   : > { %v3542_v29 = vpop.xlane.xlu1 %3541 }
 0xf47   : > { %v3550_v61 = vmul.f32 0.125, %v3542_v29  ;;  %v3539_v6 = vpop.xlane.xlu0 %3538 }
 0xf48   : > { %v3549_v63 = vmul.f32 0.125, %v3539_v6 }
 0xf49   : > { %v3554_v4 = vsub.f32 %v3532_v44, %v3550_v61 }
 0xf4a   : > { %v3553_v7 = vsub.f32 %v3531_v45, %v3549_v63  ;;  %v3548_v8 = vpop.xlane.xlu1 %3547 }
 0xf4b   : > { %v3552_v0 = vmul.f32 0.125, %v3548_v8  ;;  %v3545_v9 = vpop.xlane.xlu0 %3544  ;;  %v3558_v1 = vmul.f32 %v3554_v4, %v3554_v4 }
 0xf4c   : > { %v3551_v10 = vmul.f32 0.125, %v3545_v9  ;;  %v3557_v11 = vmul.f32 %v3553_v7, %v3553_v7 }
 0xf4d   : > { %v3556_v12 = vsub.f32 %v3534_v55, %v3552_v0  ;;  %v3564_v50 = vsel %vm774_vm0, %v3558_v1, 0.0 }
 0xf4e   : > { %v3555_v13 = vsub.f32 %v3533_v57, %v3551_v10  ;;  %3565 = vadd.xlane.f32.xlu1 %v3564_v50  ;;  %v3561_v14 = vsel %vm774_vm0, %v3557_v11, 0.0 }
 0xf4f   : > { %3562 = vadd.xlane.f32.xlu0 %v3561_v14  ;;  %v3560_v15 = vmul.f32 %v3556_v12, %v3556_v12 }
 0xf50   : > { %v3559_v17 = vmul.f32 %v3555_v13, %v3555_v13 }
 0xf51   : > { %v3570_v18 = vsel %vm774_vm0, %v3560_v15, 0.0 }
 0xf52   : > { %3571 = vadd.xlane.f32.xlu1 %v3570_v18  ;;  %v3567_v20 = vsel %vm774_vm0, %v3559_v17, 0.0 }
 0xf53   : > { %3568 = vadd.xlane.f32.xlu0 %v3567_v20 }
 0xfdb   : > { %v3566_v21 = vpop.xlane.xlu1 %3565 }
 0xfdc   : > { %v3574_v22 = vmul.f32 0.125, %v3566_v21  ;;  %v3563_v23 = vpop.xlane.xlu0 %3562 }
 0xfdd   : > { %v3573_v24 = vmul.f32 0.125, %v3563_v23 }
 0xfde   : > { %v3578_v26 = vadd.f32 1e-06, %v3574_v22 }
 0xfdf   : > { %v3577_v16 = vadd.f32 1e-06, %v3573_v24  ;;  %v3572_v27 = vpop.xlane.xlu1 %3571 }
 0xfe0   : > { %4349 = vrsqrt.f32 %v3578_v26  ;;  %v3576_v53 = vmul.f32 0.125, %v3572_v27  ;;  %v3569_v19 = vpop.xlane.xlu0 %3568 }
 0xfe1   : > { %4351 = vrsqrt.f32 %v3577_v16  ;;  %v3575_v30 = vmul.f32 0.125, %v3569_v19 }
 0xfe2   : > { %v3580_v31 = vadd.f32 1e-06, %v3576_v53 }
 0xfe3   : > { %v3579_v32 = vadd.f32 1e-06, %v3575_v30 }
 0xfe4   : > { %4353 = vrsqrt.f32 %v3580_v31 }
 0xfe5   : > { %4355 = vrsqrt.f32 %v3579_v32 }
 0xfea   : > { %v4350_v33 = vpop.eup %4349 }
 0xfeb   : > { %v4352_v34 = vpop.eup %4351  ;;  %v3586_v28 = vmul.f32 %v4350_v33, %v3554_v4 }
 0xfec   : > { %v3585_v35 = vmul.f32 %v4352_v34, %v3553_v7 }
 0xfed   : > { %v3596_v36 = vmul.f32 %v3799_v25, %v3586_v28 }
 0xfee   : > { %v4354_v37 = vpop.eup %4353  ;;  %v3595_v58 = vmul.f32 %v3799_v25, %v3585_v35 }
 0xfef   : > { %v4356_v38 = vpop.eup %4355  ;;  %v3588_v39 = vmul.f32 %v4354_v37, %v3556_v12  ;;  %v3606_v49 = vadd.f32 %v3800_v56, %v3596_v36 }
 0xff0   : > { %v3605_v54 = vadd.f32 %v3800_v56, %v3595_v58  ;;  %v3587_v40 = vmul.f32 %v4356_v38, %v3555_v13 }
 0xff1   : > { %v3598_v2 = vmul.f32 %v3799_v25, %v3588_v39  ;;  %3610 = vst.msk [vmem:[%s766_s28 + $0x8] sm:$0xff] %vm774_vm0, %v3606_v49 }
 0xff2   : > { %3609 = vst.msk [vmem:[%s766_s28] sm:$0xff] %vm774_vm0, %v3605_v54  ;;  %v3597_v5 = vmul.f32 %v3799_v25, %v3587_v40 }
 0xff3   : > { %v3608_v3 = vadd.f32 %v3800_v56, %v3598_v2 }
 0xff4   : > { %v3607_v41 = vadd.f32 %v3800_v56, %v3597_v5 }
 0xff5   : > { %3612 = vst.msk [vmem:[%s766_s28 + $0x18] sm:$0xff] %vm774_vm0, %v3608_v3 }
 0xff6   : > { %3611 = vst.msk [vmem:[%s766_s28 + $0x10] sm:$0xff] %vm774_vm0, %v3607_v41 }
 0xff7 PF: > { %s35_s29 = sadd.s32 1, %s4363_s29  }
 0xff8   : > { %p32_p4 = scmp.ge.s32.totalorder %s35_s29, 4  }
 0xffa   :  { %34 = sbr.rel (!%p32_p4) target bundleno = 11 (0xb), region = 164 }

// kernel: pvt_netv2_forward.6
= control target key start
LH: loop header
LB: loop body
LE: loop exit
PB: predicated region body
PF: predicated region fallthrough
CT: control target
= control target key end

     0   :  { %s506_s18 = smov 0   ;;  %s569_s0 = inlined_call_operand.vmem [shape: f32[16,72], index: 0, kind: input, shape index: {}]   ;;  %s570_s1 = inlined_call_operand.vmem [shape: f32[72,16], index: 1, kind: input, shape index: {}]   ;;  %s571_s2 = inlined_call_operand.vmem [shape: f32[1,16], index: 2, kind: input, shape index: {}]   ;;  %s572_s3 = inlined_call_operand.vmem [shape: f32[1,16], index: 3, kind: input, shape index: {}]   ;;  %s573_s4 = inlined_call_operand.vmem [shape: f32[1,16], index: 4, kind: input, shape index: {}]   ;;  %s574_s5 = inlined_call_operand.vmem [shape: f32[16,16], index: 5, kind: output, shape index: {}]  }
   0x1 LB: > { %s396_s19 = sadd.s32 4294967295, %s471_s18   ;;  %p400_p0 = scmp.ge.s32.totalorder %s471_s18, 1  ;;  %s471_s18 = sphi %s506_s18, %s15_s18  }
   0x2   : > { %p186_p1 = scmp.lt.s32.totalorder %s471_s18, 3 }
   0x4   : > { %p187_p2 = pnand %p400_p0, %p186_p1 }
   0x5   : > { %v221_v0 = vld [vmem:[%s570_s1] sm:$0xff] (!%p187_p2)  ;;  %v222_v1 = vld [vmem:[%s570_s1 + $0x8] sm:$0xff] (!%p187_p2)  ;;  %v223_v2 = vld [vmem:[%s570_s1 + $0x10] sm:$0xff] (!%p187_p2)  ;;  %v473_v3 = vmov (!%p187_p2), 0.0|0.0   ;;  %vm474_vm0 = vmmov (!%p187_p2), 0   ;;  %v475_v6 = vmov (!%p187_p2), 0.0  }
   0x6   : > { %190 = sbr.rel (%p187_p2) target bundleno = 553 (0x229), region = 40  ;;  %440 = vmatprep.subr.bf16.mxu0 (!%p187_p2), %v473_v3  ;;  %v441_v4 = vpack.c.bf16 (!%p187_p2), %v222_v1, %v221_v0  ;;  %v224_v5 = vld [vmem:[%s570_s1 + $0x18] sm:$0xff] (!%p187_p2)  ;;  %437 = vmatprep.mubr.msk.f32.mxu0 (!%p187_p2), %vm474_vm0, %v475_v6  ;;  %p212_p3 = scmp.lt.s32.totalorder (!%p187_p2), %s396_s19, 1  ;;  %v225_v8 = vld [vmem:[%s570_s1 + $0x20] sm:$0xff] (!%p187_p2)  ;;  %v226_v9 = vld [vmem:[%s570_s1 + $0x28] sm:$0xff] (!%p187_p2)  ;;  %vm237_vm1 = vcmask (!%p187_p2), 588800  }
   0x7   : > { %v444_v7 = vpack.c.bf16 (!%p187_p2), %v224_v5, %v223_v2  ;;  %v447_v10 = vpack.c.bf16 (!%p187_p2), %v226_v9, %v225_v8  ;;  %v227_v11 = vld [vmem:[%s570_s1 + $0x30] sm:$0xff] (!%p187_p2)  ;;  %v228_v12 = vld [vmem:[%s570_s1 + $0x38] sm:$0xff] (!%p187_p2)  ;;  %v229_v14 = vld [vmem:[%s570_s1 + $0x40] sm:$0xff] (!%p187_p2)  ;;  %vm313_vm2 = vcmask (!%p187_p2), 130048  }
   0x8   : > { %442 = vmatpush3.bf16.msra.mxu0 (!%p187_p2), %v441_v4  ;;  %v450_v13 = vpack.c.bf16 (!%p187_p2), %v228_v12, %v227_v11  ;;  %v403_v16 = vld [vmem:[%s571_s2] ss:$0 sm:$0xff] (!%p187_p2) }
   0x9   : > { %443 = vmatprep.subr.bf16.mxu0 (!%p187_p2), %v473_v3  ;;  %v405_v30 = vld [vmem:[%s572_s3] ss:$0 sm:$0xff] (!%p187_p2) }
   0xa   : > { %v406_v32 = vld [vmem:[%s573_s4] ss:$0 sm:$0xff] (!%p187_p2) }
   0xc   : > { %445 = vmatpush3.bf16.msra.mxu0 (!%p187_p2), %v444_v7 }
   0xd   : > { %s576_s19 = smov (!%p212_p3, %s396_s19), 1  ;;  %446 = vmatprep.subr.bf16.mxu0 %v473_v3 }
   0xe   : > { %s401_s11 = sshll.u32 %s576_s19, 3 }
   0xf   : > { %s215_s14 = scalar_lea.vmem %s569_s0, %s401_s11  ;;  %s219_s27 = scalar_lea.vmem %s574_s5, %s401_s11 }
  0x10   : > { %448 = vmatpush3.bf16.msra.mxu0 %v447_v10  ;;  %v220_v15 = vld [vmem:[%s215_s14] sm:$0xff] }
  0x11   : > { %449 = vmatprep.subr.bf16.mxu0 %v473_v3 }
  0x14   : > { %451 = vmatpush3.bf16.msra.mxu0 %v450_v13 }
  0x15   : > { %435 = vmatprep.subr.mxu0 %v475_v6 }
  0x18   : > { %436 = vmatpush3.msra.mxu0 %v229_v14 }
  0x19   : > { %438 = vmatmul.mubr.msk.f32.vlgmr.msra.gmra.mrb[0].mxu0 %vm237_vm1, %v220_v15 }
  0xec   : > { %v307_v17 = vpop.f32.mrb[0].mxu0 }
  0xed   : > { %v308_v18 = vadd.f32 %v403_v16, %v307_v17  ;;  %v439_v19 = vpop.f32.mrb[1].mxu0 }
  0xef   : > { %v314_v20 = vsel %vm313_vm2, %v308_v18, 0.0 }
  0xf0   : > { %315 = vadd.xlane.f32.xlu0 %v314_v20 }
 0x17d   : > { %v316_v21 = vpop.xlane.xlu0 %315 }
 0x17e   : > { %v318_v22 = vmul.f32 0.0625, %v316_v21 }
 0x180   : > { %v319_v23 = vsub.f32 %v308_v18, %v318_v22 }
 0x182   : > { %v320_v24 = vmul.f32 %v319_v23, %v319_v23 }
 0x184   : > { %v321_v25 = vsel %vm313_vm2, %v320_v24, 0.0 }
 0x185   : > { %322 = vadd.xlane.f32.xlu0 %v321_v25 }
 0x212   : > { %v323_v26 = vpop.xlane.xlu0 %322 }
 0x213   : > { %v324_v27 = vmul.f32 0.0625, %v323_v26 }
 0x215   : > { %v325_v28 = vadd.f32 1e-06, %v324_v27 }
 0x217   : > { %463 = vrsqrt.f32 %v325_v28 }
 0x221   : > { %v464_v29 = vpop.eup %463 }
 0x222   : > { %v327_v31 = vmul.f32 %v464_v29, %v319_v23 }
 0x224   : > { %v334_v33 = vmul.f32 %v405_v30, %v327_v31 }
 0x226   : > { %v341_v34 = vadd.f32 %v406_v32, %v334_v33 }
 0x228   : > { %342 = vst.msk [vmem:[%s219_s27] sm:$0xff] %vm313_vm2, %v341_v34 }
 0x229 PF: > { %s15_s18 = sadd.s32 1, %s471_s18  }
 0x22a   : > { %p12_p4 = scmp.ge.s32.totalorder %s15_s18, 4  }
 0x22c   :  { %14 = sbr.rel (!%p12_p4) target bundleno = 1 (0x1), region = 70 }

// kernel: pvt_netv2_forward.7
= control target key start
LH: loop header
LB: loop body
LE: loop exit
PB: predicated region body
PF: predicated region fallthrough
CT: control target
= control target key end

     0   :  { %s4124_s0 = inlined_call_operand.vmem [shape: f32[16,16], index: 0, kind: input, shape index: {}]   ;;  %s4125_s1 = inlined_call_operand.vmem [shape: f32[8,8], index: 1, kind: input, shape index: {}]   ;;  %s4126_s2 = inlined_call_operand.vmem [shape: f32[9,8,8], index: 2, kind: input, shape index: {}]   ;;  %s4127_s3 = inlined_call_operand.vmem [shape: f32[1,16], index: 3, kind: input, shape index: {}]   ;;  %s4128_s4 = inlined_call_operand.hbm [shape: f32[1,16], index: 4, kind: input, shape index: {}]   ;;  %s4129_s5 = inlined_call_operand.vmem [shape: f32[2,16,8], index: 5, kind: input, shape index: {}]   ;;  %s4130_s6 = inlined_call_operand.vmem [shape: f32[2,16,8], index: 6, kind: input, shape index: {}]   ;;  %s4131_s7 = inlined_call_operand.vmem [shape: f32[2,16,8], index: 7, kind: input, shape index: {}]   ;;  %s4132_s8 = inlined_call_operand.vmem [shape: f32[2,8,16], index: 8, kind: input, shape index: {}]   ;;  %s4133_s9 = inlined_call_operand.hbm [shape: f32[1,16], index: 9, kind: input, shape index: {}]   ;;  %s4134_s10 = inlined_call_operand.hbm [shape: f32[1,16], index: 10, kind: input, shape index: {}]   ;;  %s4135_s11 = inlined_call_operand.hbm [shape: f32[1,16], index: 11, kind: input, shape index: {}]   ;;  %s4136_s12 = inlined_call_operand.vmem [shape: f32[16,32], index: 12, kind: input, shape index: {}]   ;;  %s4137_s13 = inlined_call_operand.hbm [shape: f32[1,32], index: 13, kind: input, shape index: {}]   ;;  %s4138_s14 = inlined_call_operand.vmem [shape: f32[9,32], index: 14, kind: input, shape index: {}]   ;;  %s4139_s15 = inlined_call_operand.hbm [shape: f32[1,32], index: 15, kind: input, shape index: {}]   ;;  %s4140_s16 = inlined_call_operand.vmem [shape: f32[32,16], index: 16, kind: input, shape index: {}]   ;;  %s4141_s17 = inlined_call_operand.hbm [shape: f32[1,16], index: 17, kind: input, shape index: {}]   ;;  %s4142_s18 = inlined_call_operand.hbm [shape: f32[1,16], index: 18, kind: input, shape index: {}]   ;;  %s4143_s19 = inlined_call_operand.hbm [shape: f32[1,16], index: 19, kind: input, shape index: {}]   ;;  %s4144_s20 = inlined_call_operand.vmem [shape: f32[16,16], index: 20, kind: output, shape index: {}]  }
   0x1   :  { %4151 = sst [smem:[#allocation22_spill]] %s4124_s0 }
   0x2   :  { %4152 = sst [smem:[#allocation23_spill]] %s4125_s1 }
   0x3   :  { %4153 = sst [smem:[#allocation24_spill]] %s4126_s2 }
   0x4   :  { %4154 = sst [smem:[#allocation25_spill]] %s4127_s3 }
   0x5   :  { %4155 = sst [smem:[#allocation26_spill]] %s4128_s4 }
   0x6   :  { %4156 = sst [smem:[#allocation27_spill]] %s4133_s9 }
   0x7   :  { %4157 = sst [smem:[#allocation28_spill]] %s4138_s14 }
   0x8   :  { %4158 = sst [smem:[#allocation29_spill]] %s4144_s20 }
   0x9   :  { %25 = vsyncpa [#allocation3], 0 }
   0xa   :  { %26 = vsyncpa [#allocation5], 0 }
   0xb   :  { %27 = vsyncpa [#allocation8], 0 }
   0xc   :  { %28 = vsyncpa [#allocation11], 0 }
   0xd   :  { %29 = vsyncpa [#allocation14], 0  ;;  %s3639_s1 = smov 0  }
   0xe LB: > { %4159 = sst [smem:[#allocation21_spill]] %s3520_s1  ;;  %s3522_s22 = smov [#allocation4]   ;;  %s3520_s1 = sphi %s3639_s1, %s35_s1  }
   0xf   : > { %s536_s23 = sshll.u32 %s3522_s22, 4  ;;  %s3645_s24 = sadd.s32 4294967295, %s3520_s1   ;;  %s3650_s23 = int_to_ptr.vmem [resolvable:$true] %s536_s23 }
  0x10   : > { %p2828_p0 = scmp.ge.s32.totalorder %s3520_s1, 1  ;;  %p491_p1 = scmp.lt.s32.totalorder %s3520_s1, 3 }
  0x11   : > { %p4149_p2 = scmp.eq.s32.totalorder %s3645_s24, 0  ;;  %s3523_s25 = smov [#allocation7]  }
  0x12   : > { %p3652_p3 = pnand %p2828_p0, %p491_p1  ;;  %s558_s3 = sshll.u32 %s3523_s25, 4  ;;  %s3658_s3 = int_to_ptr.vmem [resolvable:$true] %s558_s3 }
  0x13   : > { %s3524_s26 = smov [#allocation10]   ;;  %s3525_s4 = smov [#allocation13]  }
  0x14   : > { %s4160_s2 = scalar_select %p3652_p3, 1, 0 }
  0x15   : > { %p3158_p4 = pneg %p3652_p3  ;;  %s586_s27 = sshll.u32 %s3524_s26, 4  ;;  %s3666_s27 = int_to_ptr.vmem [resolvable:$true] %s586_s27 }
  0x16   : > { %s611_s29 = sshll.u32 %s3525_s4, 4  ;;  %s4162_s9 = sld [smem:[#allocation27_spill]]  ;;  %s3668_s29 = int_to_ptr.vmem [resolvable:$true] %s611_s29 }
  0x17   : > { %p3662_p5 = pnand %p4149_p2, %p3158_p4 }
  0x19   : > { %p3678_p7 = pneg %p3662_p5 }
  0x1c   : > { %s3242_s21 = scalar_lea.hbm %s4162_s9, 16 }
  0x1d   : > { %p3243_p6 = scmp.ne.s32.totalorder %s4162_s9, %s3242_s21  ;;  %p3249_p10 = scmp.lt.u32.totalorder %s3242_s21, %s4162_s9 }
  0x1f   : > { %p3245_p8 = pnand %p3678_p7, %p3243_p6 }
  0x21   : > { %p3246_p9 = pneg %p3245_p8 }
  0x23   : > { %p3251_p11 = pnand %p3249_p10, %p3246_p9 }
  0x25   : > { %3254 = shalt.err (!%p3251_p11)
}
  0x26   : > { %s3255_s30 = scalar_lea.vmem %s3650_s23, 16  ;;  %s3262_s0 = scalar_lea.vmem %s3650_s23, 32 }
  0x27   : > { %p3256_p12 = scmp.ne.s32.totalorder %s3650_s23, %s3255_s30  ;;  %p3263_p1 = scmp.lt.s32.totalorder %s3650_s23, %s3650_s23 }
  0x28   : > { %p3264_p4 = scmp.lt.s32.totalorder %s3262_s0, %s3255_s30 }
  0x29   : > { %p3258_p13 = pnand %p3256_p12, %p3678_p7 }
  0x2a   : > { %p3265_p6 = por %p3264_p4, %p3263_p1 }
  0x2b   : > { %p3259_p0 = pneg %p3258_p13 }
  0x2d   : > { %p3266_p8 = pnand %p3265_p6, %p3259_p0 }
  0x2f   : > { %3269 = shalt.err (!%p3266_p8)
}
  0x30   : > { %3164 = dma.hbm_to_vmem [thread:$0]  (!%p3662_p5), %s4162_s9, 16, %s3650_s23, [#allocation5]  }
  0x31   : > { %s3270_s4 = scalar_lea.hbm %s4135_s11, 16 }
  0x32   : > { %p3271_p9 = scmp.ne.s32.totalorder %s4135_s11, %s3270_s4  ;;  %p3277_p12 = scmp.lt.u32.totalorder %s3270_s4, %s4135_s11 }
  0x34   : > { %p3273_p10 = pnand %p3271_p9, %p3678_p7 }
  0x36   : > { %p3274_p11 = pneg %p3273_p10 }
  0x38   : > { %p3279_p13 = pnand %p3277_p12, %p3274_p11 }
  0x3a   : > { %3282 = shalt.err (!%p3279_p13)
}
  0x3b   : > { %s3283_s23 = scalar_lea.vmem %s3658_s3, 16  ;;  %s3290_s14 = scalar_lea.vmem %s3658_s3, 32 }
  0x3c   : > { %p3284_p0 = scmp.ne.s32.totalorder %s3658_s3, %s3283_s23  ;;  %p3291_p6 = scmp.lt.s32.totalorder %s3658_s3, %s3658_s3 }
  0x3d   : > { %p3292_p8 = scmp.lt.s32.totalorder %s3290_s14, %s3283_s23 }
  0x3e   : > { %p3286_p1 = pnand %p3284_p0, %p3678_p7 }
  0x3f   : > { %p3293_p9 = por %p3292_p8, %p3291_p6 }
  0x40   : > { %p3287_p4 = pneg %p3286_p1 }
  0x42   : > { %p3294_p10 = pnand %p3293_p9, %p3287_p4 }
  0x44   : > { %3297 = shalt.err (!%p3294_p10)
}
  0x45   : > { %3170 = dma.hbm_to_vmem [thread:$0]  (!%p3662_p5), %s4135_s11, 16, %s3658_s3, [#allocation8]  }
  0x46   : > { %s3298_s25 = scalar_lea.hbm %s4139_s15, 16 }
  0x47   : > { %p3299_p11 = scmp.ne.s32.totalorder %s4139_s15, %s3298_s25  ;;  %p3305_p0 = scmp.lt.u32.totalorder %s3298_s25, %s4139_s15 }
  0x49   : > { %p3301_p12 = pnand %p3299_p11, %p3678_p7 }
  0x4b   : > { %p3302_p13 = pneg %p3301_p12 }
  0x4d   : > { %p3307_p1 = pnand %p3305_p0, %p3302_p13 }
  0x4f   : > { %3310 = shalt.err (!%p3307_p1)
}
  0x50   : > { %s3311_s3 = scalar_lea.vmem %s3666_s27, 16  ;;  %s3318_s14 = scalar_lea.vmem %s3666_s27, 32 }
  0x51   : > { %p3312_p4 = scmp.ne.s32.totalorder %s3666_s27, %s3311_s3  ;;  %p3319_p9 = scmp.lt.s32.totalorder %s3666_s27, %s3666_s27 }
  0x52   : > { %p3320_p10 = scmp.lt.s32.totalorder %s3318_s14, %s3311_s3 }
  0x53   : > { %p3314_p6 = pnand %p3312_p4, %p3678_p7 }
  0x54   : > { %p3321_p11 = por %p3320_p10, %p3319_p9 }
  0x55   : > { %p3315_p8 = pneg %p3314_p6 }
  0x57   : > { %p3322_p12 = pnand %p3321_p11, %p3315_p8 }
  0x59   : > { %3325 = shalt.err (!%p3322_p12)
}
  0x5a   : > { %3176 = dma.hbm_to_vmem [thread:$0]  (!%p3662_p5), %s4139_s15, 16, %s3666_s27, [#allocation11]  }
  0x5b   : > { %s3326_s25 = scalar_lea.hbm %s4142_s18, 16 }
  0x5c   : > { %p3327_p13 = scmp.ne.s32.totalorder %s4142_s18, %s3326_s25  ;;  %p3333_p4 = scmp.lt.u32.totalorder %s3326_s25, %s4142_s18 }
  0x5e   : > { %p3329_p0 = pnand %p3327_p13, %p3678_p7 }
  0x60   : > { %p3330_p1 = pneg %p3329_p0 }
  0x62   : > { %p3335_p6 = pnand %p3333_p4, %p3330_p1 }
  0x64   : > { %3338 = shalt.err (!%p3335_p6)
}
  0x65   : > { %s3339_s27 = scalar_lea.vmem %s3668_s29, 16  ;;  %s3346_s3 = scalar_lea.vmem %s3668_s29, 32 }
  0x66   : > { %p3340_p8 = scmp.ne.s32.totalorder %s3668_s29, %s3339_s27  ;;  %p3347_p11 = scmp.lt.s32.totalorder %s3668_s29, %s3668_s29 }
  0x67   : > { %p3348_p12 = scmp.lt.s32.totalorder %s3346_s3, %s3339_s27 }
  0x68   : > { %p3342_p9 = pnand %p3340_p8, %p3678_p7 }
  0x69   : > { %p3349_p13 = por %p3348_p12, %p3347_p11 }
  0x6a   : > { %p3343_p10 = pneg %p3342_p9 }
  0x6c   : > { %p3350_p0 = pnand %p3349_p13, %p3343_p10 }
  0x6e   : > { %3353 = shalt.err (!%p3350_p0)
}
  0x6f   : > { %3182 = dma.hbm_to_vmem [thread:$0]  (!%p3662_p5), %s4142_s18, 16, %s3668_s29, [#allocation14]  }
  0x70   : > { %s3526_s1 = smov [#allocation2]   ;;  %s3527_s22 = smov [#allocation6]  }
  0x71   : > { %s513_s21 = sshll.u32 %s3526_s1, 4  ;;  %s547_s25 = sshll.u32 %s3527_s22, 4  ;;  %s514_s21 = int_to_ptr.vmem [resolvable:$true] %s513_s21  ;;  %s548_s25 = int_to_ptr.vmem [resolvable:$true] %s547_s25 }
  0x72   : > { %s4164_s0 = sld [smem:[#allocation26_spill]] }
  0x78   : > { %s3354_s23 = scalar_lea.hbm %s4164_s0, 16 }
  0x79   : > { %p3355_p1 = scmp.ne.s32.totalorder %s4164_s0, %s3354_s23  ;;  %p3361_p8 = scmp.lt.u32.totalorder %s3354_s23, %s4164_s0 }
  0x7b   : > { %p3357_p4 = pnand %p3355_p1, %p3678_p7 }
  0x7d   : > { %p3358_p6 = pneg %p3357_p4 }
  0x7f   : > { %p3363_p9 = pnand %p3361_p8, %p3358_p6 }
  0x81   : > { %3366 = shalt.err (!%p3363_p9)
}
  0x82   : > { %s3367_s29 = scalar_lea.vmem %s514_s21, 16  ;;  %s3374_s20 = scalar_lea.vmem %s514_s21, 32 }
  0x83   : > { %p3368_p10 = scmp.ne.s32.totalorder %s514_s21, %s3367_s29  ;;  %p3375_p13 = scmp.lt.s32.totalorder %s514_s21, %s514_s21 }
  0x84   : > { %p3376_p0 = scmp.lt.s32.totalorder %s3374_s20, %s3367_s29 }
  0x85   : > { %p3370_p11 = pnand %p3368_p10, %p3678_p7 }
  0x86   : > { %p3377_p2 = por %p3376_p0, %p3375_p13 }
  0x87   : > { %p3371_p12 = pneg %p3370_p11 }
  0x89   : > { %p3378_p3 = pnand %p3377_p2, %p3371_p12 }
  0x8b   : > { %3381 = shalt.err (!%p3378_p3)
}
  0x8c   : > { %3161 = dma.hbm_to_vmem [thread:$0]  (!%p3662_p5), %s4164_s0, 16, %s514_s21, [#allocation3]  }
  0x8d   : > { %s3382_s30 = scalar_lea.hbm %s4134_s10, 16 }
  0x8e   : > { %p3383_p1 = scmp.ne.s32.totalorder %s4134_s10, %s3382_s30  ;;  %p3389_p3 = scmp.lt.u32.totalorder %s3382_s30, %s4134_s10 }
  0x90   : > { %p3385_p4 = pnand %p3383_p1, %p3678_p7 }
  0x92   : > { %p3386_p2 = pneg %p3385_p4 }
  0x94   : > { %p3391_p6 = pnand %p3389_p3, %p3386_p2 }
  0x96   : > { %3394 = shalt.err (!%p3391_p6)
}
  0x97   : > { %s3395_s29 = scalar_lea.vmem %s548_s25, 16  ;;  %s3402_s21 = scalar_lea.vmem %s548_s25, 32 }
  0x98   : > { %p3396_p8 = scmp.ne.s32.totalorder %s548_s25, %s3395_s29  ;;  %p3403_p11 = scmp.lt.s32.totalorder %s548_s25, %s548_s25 }
  0x99   : > { %p3404_p12 = scmp.lt.s32.totalorder %s3402_s21, %s3395_s29 }
  0x9a   : > { %p3398_p9 = pnand %p3396_p8, %p3678_p7 }
  0x9b   : > { %p3405_p13 = por %p3404_p12, %p3403_p11 }
  0x9c   : > { %p3399_p10 = pneg %p3398_p9 }
  0x9e   : > { %p3406_p0 = pnand %p3405_p13, %p3399_p10 }
  0xa0   : > { %3409 = shalt.err (!%p3406_p0)
}
  0xa1   : > { %3167 = dma.hbm_to_vmem [thread:$0]  (!%p3662_p5), %s4134_s10, 16, %s548_s25, [#allocation5]  }
  0xa2   : > { %s3528_s22 = smov [#allocation9]   ;;  %s3529_s4 = smov [#allocation12]  }
  0xa3   : > { %s572_s9 = sshll.u32 %s3528_s22, 4  ;;  %s600_s30 = sshll.u32 %s3529_s4, 4  ;;  %s573_s9 = int_to_ptr.vmem [resolvable:$true] %s572_s9  ;;  %s601_s30 = int_to_ptr.vmem [resolvable:$true] %s600_s30 }
  0xa4   : > { %s3410_s3 = scalar_lea.hbm %s4137_s13, 16 }
  0xa5   : > { %p3411_p1 = scmp.ne.s32.totalorder %s4137_s13, %s3410_s3  ;;  %p3417_p3 = scmp.lt.u32.totalorder %s3410_s3, %s4137_s13 }
  0xa7   : > { %p3413_p4 = pnand %p3411_p1, %p3678_p7 }
  0xa9   : > { %p3414_p2 = pneg %p3413_p4 }
  0xab   : > { %p3419_p6 = pnand %p3417_p3, %p3414_p2 }
  0xad   : > { %3422 = shalt.err (!%p3419_p6)
}
  0xae   : > { %s3423_s25 = scalar_lea.vmem %s573_s9, 16  ;;  %s3430_s1 = scalar_lea.vmem %s573_s9, 32 }
  0xaf   : > { %p3424_p8 = scmp.ne.s32.totalorder %s573_s9, %s3423_s25  ;;  %p3431_p11 = scmp.lt.s32.totalorder %s573_s9, %s573_s9 }
  0xb0   : > { %p3432_p12 = scmp.lt.s32.totalorder %s3430_s1, %s3423_s25 }
  0xb1   : > { %p3426_p9 = pnand %p3424_p8, %p3678_p7 }
  0xb2   : > { %p3433_p13 = por %p3432_p12, %p3431_p11 }
  0xb3   : > { %p3427_p10 = pneg %p3426_p9 }
  0xb5   : > { %p3434_p0 = pnand %p3433_p13, %p3427_p10 }
  0xb7   : > { %3437 = shalt.err (!%p3434_p0)
}
  0xb8   : > { %3173 = dma.hbm_to_vmem [thread:$0]  (!%p3662_p5), %s4137_s13, 16, %s573_s9, [#allocation8]  }
  0xb9   : > { %s3438_s3 = scalar_lea.hbm %s4141_s17, 16 }
  0xba   : > { %p3439_p1 = scmp.ne.s32.totalorder %s4141_s17, %s3438_s3  ;;  %p3445_p3 = scmp.lt.u32.totalorder %s3438_s3, %s4141_s17 }
  0xbc   : > { %p3441_p4 = pnand %p3439_p1, %p3678_p7 }
  0xbe   : > { %p3442_p2 = pneg %p3441_p4 }
  0xc0   : > { %p3447_p6 = pnand %p3445_p3, %p3442_p2 }
  0xc2   : > { %3450 = shalt.err (!%p3447_p6)
}
  0xc3   : > { %s3451_s25 = scalar_lea.vmem %s601_s30, 16  ;;  %s3458_s9 = scalar_lea.vmem %s601_s30, 32 }
  0xc4   : > { %p3452_p8 = scmp.ne.s32.totalorder %s601_s30, %s3451_s25  ;;  %p3459_p11 = scmp.lt.s32.totalorder %s601_s30, %s601_s30 }
  0xc5   : > { %p3460_p12 = scmp.lt.s32.totalorder %s3458_s9, %s3451_s25 }
  0xc6   : > { %p3454_p9 = pnand %p3452_p8, %p3678_p7 }
  0xc7   : > { %p3461_p13 = por %p3460_p12, %p3459_p11 }
  0xc8   : > { %p3455_p10 = pneg %p3454_p9 }
  0xca   : > { %p3462_p0 = pnand %p3461_p13, %p3455_p10 }
  0xcc   : > { %3465 = shalt.err (!%p3462_p0)
}
  0xcd   : > { %3179 = dma.hbm_to_vmem [thread:$0]  (!%p3662_p5), %s4141_s17, 16, %s601_s30, [#allocation11]  }
  0xce   : > { %s3530_s4 = smov [#allocation15]   ;;  %s3466_s14 = scalar_lea.hbm %s4143_s19, 16 }
  0xcf   : > { %s622_s23 = sshll.u32 %s3530_s4, 4  ;;  %p3467_p1 = scmp.ne.s32.totalorder %s4143_s19, %s3466_s14  ;;  %s623_s23 = int_to_ptr.vmem [resolvable:$true] %s622_s23 }
  0xd0   : > { %p3473_p3 = scmp.lt.u32.totalorder %s3466_s14, %s4143_s19 }
  0xd1   : > { %p3469_p4 = pnand %p3467_p1, %p3678_p7 }
  0xd3   : > { %p3470_p2 = pneg %p3469_p4 }
  0xd5   : > { %p3475_p6 = pnand %p3473_p3, %p3470_p2 }
  0xd7   : > { %3478 = shalt.err (!%p3475_p6)
}
  0xd8   : > { %s3479_s30 = scalar_lea.vmem %s623_s23, 16  ;;  %s3486_s9 = scalar_lea.vmem %s623_s23, 32 }
  0xd9   : > { %p3480_p8 = scmp.ne.s32.totalorder %s623_s23, %s3479_s30  ;;  %p3487_p11 = scmp.lt.s32.totalorder %s623_s23, %s623_s23 }
  0xda   : > { %p3488_p12 = scmp.lt.s32.totalorder %s3486_s9, %s3479_s30 }
  0xdb   : > { %p3482_p9 = pnand %p3480_p8, %p3678_p7 }
  0xdc   : > { %p3489_p13 = por %p3488_p12, %p3487_p11 }
  0xdd   : > { %p3483_p10 = pneg %p3482_p9 }
  0xdf   : > { %p3490_p0 = pnand %p3489_p13, %p3483_p10 }
  0xe1   : > { %3493 = shalt.err (!%p3490_p0)
}
  0xe2   : > { %3185 = dma.hbm_to_vmem [thread:$0]  (!%p3662_p5), %s4143_s19, 16, %s623_s23, [#allocation14]  }
  0xe3   : > { %p4165_p1 = scmp.ne.s32.totalorder %s4160_s2, 0 }
  0xe4   : > { %p4166_p4 = scmp.eq.s32.totalorder (!%p4165_p1), %s3645_s24, 0 }
  0xe5   : > { %642 = sbr.rel (%p4165_p1) target bundleno = 3839 (0xeff), region = 100 }
  0xec   : > { %3499 = dma.done.wait (%p4166_p4), [#allocation3], 16   ;;  %p4167_p7 = pmov %p4166_p4 }
  0xed   : > { %p4168_p2 = pmov %p4166_p4 }
  0xee   : > { %3501 = vsyncadd (%p4167_p7), [#allocation3], 4294967280 }
  0xef   : > { %3503 = dma.done.wait (%p4168_p2), [#allocation5], 32   ;;  %p4169_p3 = pmov %p4168_p2 }
  0xf0   : > { %p4170_p6 = pmov %p4168_p2 }
  0xf1   : > { %3505 = vsyncadd (%p4169_p3), [#allocation5], 4294967264 }
  0xf2   : > { %3507 = dma.done.wait (%p4170_p6), [#allocation8], 32   ;;  %p4171_p5 = pmov %p4168_p2 }
  0xf3   : > { %p4172_p8 = pmov %p4168_p2 }
  0xf4   : > { %3509 = vsyncadd (%p4171_p5), [#allocation8], 4294967264 }
  0xf5   : > { %3511 = dma.done.wait (%p4172_p8), [#allocation11], 32   ;;  %p4173_p9 = pmov %p4168_p2 }
  0xf6   : > { %p4174_p10 = pmov %p4168_p2 }
  0xf7   : > { %3513 = vsyncadd (%p4173_p9), [#allocation11], 4294967264 }
  0xf8   : > { %3515 = dma.done.wait (%p4174_p10), [#allocation14], 32   ;;  %p4175_p11 = pmov %p4168_p2 }
  0xf9   : > { %p730_p12 = scmp.lt.s32.totalorder %s3645_s24, 1  ;;  %s4176_s4 = sld [smem:[#allocation22_spill]]  ;;  %vm741_vm0 = vcmask 130048   ;;  %v771_v7 = vld [vmem:[%s4129_s5] sm:$0xff]  ;;  %v772_v8 = vld [vmem:[%s4129_s5 + $0x8] sm:$0xff]  ;;  %v3531_v12 = vmov 0.0|0.0  }
  0xfa   : > { %3517 = vsyncadd (%p4175_p11), [#allocation14], 4294967264  ;;  %v918_v9 = vld [vmem:[%s4131_s7] sm:$0xff]  ;;  %v3096_v10 = vpack.c.bf16 %v772_v8, %v771_v7  ;;  %v919_v11 = vld [vmem:[%s4131_s7 + $0x8] sm:$0xff]  ;;  %3095 = vmatprep.subr.bf16.mxu1 %v3531_v12  ;;  %3101 = vmatprep.subr.bf16.mxu0 %v3531_v12  ;;  %vm3532_vm1 = vmmov 0   ;;  %v3533_v14 = vmov 0.0  }
  0xfb   : > { %s4184_s24 = smov (!%p730_p12, %s3645_s24), 1  ;;  %v3102_v13 = vpack.c.bf16 %v919_v11, %v918_v9  ;;  %2964 = vmatprep.mubr.msk.f32.mxu1 %vm3532_vm1, %v3533_v14  ;;  %2978 = vmatprep.mubr.msk.f32.mxu0 %vm3532_vm1, %v3533_v14  ;;  %s4177_s22 = sld [smem:[#allocation25_spill]]  ;;  %v846_v21 = vld [vmem:[%s4130_s6] sm:$0xff]  ;;  %v847_v22 = vld [vmem:[%s4130_s6 + $0x8] sm:$0xff]  ;;  %vm990_vm2 = vcmask 64512   ;;  %v2859_v31 = vld [vmem:[%s4129_s5 + $0x10] sm:$0xff] }
  0xfc   : > { %s2849_s2 = sshll.u32 %s4184_s24, 3  ;;  %3097 = vmatpush3.bf16.msra.mxu1 %v3096_v10  ;;  %v2852_v23 = vld [vmem:[#allocation2] ss:$0 sm:$0xff]  ;;  %v3099_v25 = vpack.c.bf16 %v847_v22, %v846_v21  ;;  %v2860_v32 = vld [vmem:[%s4129_s5 + $0x18] sm:$0xff]  ;;  %v2865_v36 = vld [vmem:[%s4131_s7 + $0x10] sm:$0xff]  ;;  %s4180_s9 = sld [smem:[#allocation28_spill]] }
  0xfd   : > { %3103 = vmatpush3.bf16.msra.mxu0 %v3102_v13  ;;  %3098 = vmatprep.subr.bf16.mxu1 %v3531_v12  ;;  %v3105_v35 = vpack.c.bf16 %v2860_v32, %v2859_v31  ;;  %v2866_v37 = vld [vmem:[%s4131_s7 + $0x18] sm:$0xff]  ;;  %v2862_v55 = vld [vmem:[%s4130_s6 + $0x10] sm:$0xff]  ;;  %vm2572_vm4 = vcmask 261120  }
  0xfe   : > { %2986 = vmatprep.subr.mxu0 %v3533_v14  ;;  %v3111_v38 = vpack.c.bf16 %v2866_v37, %v2865_v36  ;;  %v2863_v56 = vld [vmem:[%s4130_s6 + $0x18] sm:$0xff] }
  0xff   : > { %s733_s23 = scalar_lea.vmem %s4176_s4, %s2849_s2  ;;  %v3108_v58 = vpack.c.bf16 %v2863_v56, %v2862_v55 }
 0x100   : > { %v3894_v0 = vld [vmem:[%s733_s23] sm:$0xff]  ;;  %s4181_s23 = sld [smem:[#allocation29_spill]] }
 0x101   : > { %v742_v1 = vsel %vm741_vm0, %v3894_v0, 0.0  ;;  %v2851_v19 = vld [vmem:[%s4177_s22] ss:$0 sm:$0xff]  ;;  %s4178_s22 = sld [smem:[#allocation23_spill]] }
 0x102   : > { %743 = vadd.xlane.f32.xlu0 %v742_v1 }
 0x106   : > { %s737_s27 = scalar_lea.vmem %s4181_s23, %s2849_s2 }
 0x107   : > { %v770_v40 = vld [vmem:[%s4178_s22] sm:$0xff]  ;;  %s4179_s22 = sld [smem:[#allocation24_spill]] }
 0x10d   : > { %v2890_v55 = vld [vmem:[%s4179_s22 + $0x30] sm:$0xff]  ;;  %v2892_v56 = vld [vmem:[%s4179_s22 + $0x38] sm:$0xff] }
 0x18f   : > { %v744_v2 = vpop.xlane.xlu0 %743 }
 0x190   : > { %v746_v3 = vmul.f32 0.0625, %v744_v2 }
 0x192   : > { %v747_v4 = vsub.f32 %v3894_v0, %v746_v3 }
 0x194   : > { %v748_v5 = vmul.f32 %v747_v4, %v747_v4 }
 0x196   : > { %v749_v6 = vsel %vm741_vm0, %v748_v5, 0.0 }
 0x197   : > { %750 = vadd.xlane.f32.xlu0 %v749_v6 }
 0x224   : > { %v751_v15 = vpop.xlane.xlu0 %750 }
 0x225   : > { %v752_v16 = vmul.f32 0.0625, %v751_v15 }
 0x227   : > { %v753_v17 = vadd.f32 1e-06, %v752_v16  ;;  %v1153_v16 = vld [vmem:[%s4132_s8] sm:$0xff] }
 0x229   : > { %3224 = vrsqrt.f32 %v753_v17  ;;  %v2871_v17 = vld [vmem:[%s4132_s8 + $0x8] sm:$0xff] }
 0x233   : > { %v3225_v18 = vpop.eup %3224 }
 0x234   : > { %v755_v20 = vmul.f32 %v3225_v18, %v747_v4 }
 0x236   : > { %v762_v24 = vmul.f32 %v2851_v19, %v755_v20 }
 0x238   : > { %v3929_v26 = vadd.f32 %v2852_v23, %v762_v24 }
 0x23a   : > { %2965 = vmatmul.mubr.msk.f32.vlgmr.msra.gmra.mrb[0].mxu1 %vm741_vm0, %v3929_v26  ;;  %2979 = vmatmul.mubr.msk.f32.vlgmr.msra.gmra.mrb[0].mxu0 %vm741_vm0, %v3929_v26 }
 0x23b   : > { %3100 = vmatpush3.bf16.msra.mxu1 %v3099_v25  ;;  %2971 = vmatprep.mubr.msk.f32.mxu1 %vm3532_vm1, %v3533_v14  ;;  %v2874_v25 = vld [vmem:[#allocation4] ss:$0 sm:$0xff] }
 0x23c   : > { %2981 = vmatprep.subr.mxu1 %v3533_v14  ;;  %2988 = vmatprep.mubr.msk.f32.mxu0 %vm3532_vm1, %v3533_v14 }
 0x23e   : > { %2972 = vmatmul.mubr.msk.f32.vlgmr.msra.gmra.mrb[2].mxu1 %vm741_vm0, %v3929_v26 }
 0x23f   : > { %2983 = vmatprep.mubr.msk.f32.mxu1 %vm3532_vm1, %v3533_v14 }
 0x30d   : > { %v842_v27 = vpop.f32.mrb[0].mxu1  ;;  %v986_v28 = vpop.f32.mrb[0].mxu0 }
 0x30e   : > { %v2966_v29 = vpop.f32.mrb[1].mxu1  ;;  %v2980_v30 = vpop.f32.mrb[1].mxu0  ;;  %2987 = vmatpush3.msra.mxu0 %v986_v28 }
 0x30f   : > { %3107 = vmatprep.subr.bf16.mxu0 %v3531_v12 }
 0x311   : > { %v914_v33 = vpop.f32.mrb[2].mxu1 }
 0x312   : > { %v2973_v34 = vpop.f32.mrb[3].mxu1  ;;  %2982 = vmatpush3.xpose.msk.msra.mxu1 %vm990_vm2, %v914_v33 }
 0x313   : > { %3104 = vmatprep.subr.bf16.mxu1 %v3531_v12  ;;  %v1721_v34 = vld [vmem:[%s4136_s12] sm:$0xff] }
 0x315   : > { %2984 = vmatmul.mubr.msk.f32.vlgmr.msra.gmra.mrb[4].mxu1 %vm990_vm2, %v842_v27 }
 0x316   : > { %3106 = vmatpush3.bf16.msra.mxu1 %v3105_v35  ;;  %2995 = vmatprep.mubr.msk.f32.mxu1 %vm3532_vm1, %v3533_v14 }
 0x317   : > { %3110 = vmatprep.subr.bf16.mxu1 %v3531_v12 }
 0x319   : > { %2996 = vmatmul.mubr.msk.f32.vlgmr.msra.gmra.mrb[6].mxu1 %vm741_vm0, %v3929_v26 }
 0x31a   : > { %3112 = vmatpush3.bf16.msra.mxu1 %v3111_v38  ;;  %3009 = vmatprep.mubr.msk.f32.mxu1 %vm3532_vm1, %v3533_v14 }
 0x31b   : > { %3017 = vmatprep.subr.mxu1 %v3533_v14 }
 0x31d   : > { %3010 = vmatmul.mubr.msk.f32.vlgmr.msra.gmra.mrb[8].mxu1 %vm741_vm0, %v3929_v26 }
 0x31e   : > { %3019 = vmatprep.mubr.msk.f32.mxu1 %vm3532_vm1, %v3533_v14 }
 0x3e8   : > { %v1063_v39 = vpop.f32.mrb[4].mxu1 }
 0x3e9   : > { %v1067_v41 = vmul.f32 0.35355338, %v1063_v39  ;;  %v2985_v42 = vpop.f32.mrb[5].mxu1 }
 0x3ea   : > { %v2876_v42 = vld [vmem:[#allocation7] ss:$0 sm:$0xff] }
 0x3eb   : > { %v1068_v43 = vadd.f32 %v1067_v41, %v770_v40 }
 0x3ec   : > { %v1223_v44 = vpop.f32.mrb[6].mxu1 }
 0x3ed   : > { %v2997_v45 = vpop.f32.mrb[7].mxu1  ;;  %v1069_v46 = vsel %vm990_vm2, %v1068_v43, -inf }
 0x3ee   : > { %1070 = vmax.xlane.f32.xlu1 %v1069_v46  ;;  %v2877_v45 = vld [vmem:[#allocation9] ss:$0 sm:$0xff] }
 0x3f0   : > { %v1369_v47 = vpop.f32.mrb[8].mxu1 }
 0x3f1   : > { %v3011_v48 = vpop.f32.mrb[9].mxu1  ;;  %3018 = vmatpush3.msra.mxu1 %v1369_v47 }
 0x3f2   : > { %3027 = vmatprep.subr.mxu1 %v3533_v14 }
 0x47b   : > { %v1071_v49 = vpop.xlane.xlu1 %1070 }
 0x47c   : > { %v1072_v50 = vsub.f32 %v1068_v43, %v1071_v49  ;;  %v1805_v49 = vld [vmem:[%s4179_s22] sm:$0xff] }
 0x47e   : > { %v1073_v51 = vmul.f32 1.442695, %v1072_v50  ;;  %v2880_v50 = vld [vmem:[%s4179_s22 + $0x8] sm:$0xff] }
 0x480   : > { %3226 = vpow2.f32 %v1073_v51  ;;  %v2882_v51 = vld [vmem:[%s4179_s22 + $0x10] sm:$0xff] }
 0x48a   : > { %v3227_v52 = vpop.eup %3226 }
 0x48b   : > { %v1075_v53 = vsel %vm990_vm2, %v3227_v52, 0.0 }
 0x48c   : > { %1076 = vadd.xlane.f32.xlu1 %v1075_v53  ;;  %v2886_v53 = vld [vmem:[%s4179_s22 + $0x20] sm:$0xff] }
 0x519   : > { %v1077_v54 = vpop.xlane.xlu1 %1076 }
 0x51a   : > { %3228 = vrcp.f32 %v1077_v54  ;;  %v2888_v54 = vld [vmem:[%s4179_s22 + $0x28] sm:$0xff] }
 0x524   : > { %v3229_v57 = vpop.eup %3228 }
 0x525   : > { %v1079_v59 = vmul.f32 %v3229_v57, %v3227_v52  ;;  %v2884_v52 = vld [vmem:[%s4179_s22 + $0x18] sm:$0xff]  ;;  %v2894_v57 = vld [vmem:[%s4179_s22 + $0x40] sm:$0xff] }
 0x527   : > { %2989 = vmatmul.mubr.msk.f32.vlgmr.msra.gmra.mrb[2].mxu0 %vm990_vm2, %v1079_v59  ;;  %v2569_v59 = vld [vmem:[%s4140_s16 + $0x8] sm:$0xff] }
 0x528   : > { %3109 = vmatpush3.bf16.msra.mxu0 %v3108_v58  ;;  %3002 = vmatprep.mubr.msk.f32.mxu0 %vm3532_vm1, %v3533_v14  ;;  %v2568_v58 = vld [vmem:[%s4140_s16] sm:$0xff] }
 0x529   : > { %3012 = vmatprep.subr.mxu0 %v3533_v14 }
 0x52b   : > { %3003 = vmatmul.mubr.msk.f32.vlgmr.msra.gmra.mrb[4].mxu0 %vm741_vm0, %v3929_v26 }
 0x52c   : > { %3014 = vmatprep.mubr.msk.f32.mxu0 %vm3532_vm1, %v3533_v14 }
 0x5fa   : > { %v1149_v60 = vpop.f32.mrb[2].mxu0 }
 0x5fb   : > { %v2990_v61 = vpop.f32.mrb[3].mxu0 }
 0x5fc   : > { %v2570_v61 = vld [vmem:[%s4140_s16 + $0x10] sm:$0xff] }
 0x5fe   : > { %v1296_v62 = vpop.f32.mrb[4].mxu0 }
 0x5ff   : > { %v3004_v63 = vpop.f32.mrb[5].mxu0  ;;  %3013 = vmatpush3.xpose.msk.msra.mxu0 %vm990_vm2, %v1296_v62 }
 0x600   : > { %3022 = vmatprep.subr.mxu0 %v3533_v14  ;;  %v1879_v63 = vlaneseq }
 0x602   : > { %3015 = vmatmul.mubr.msk.f32.vlgmr.msra.gmra.mrb[6].mxu0 %vm990_vm2, %v1223_v44 }
 0x603   : > { %3024 = vmatprep.mubr.msk.f32.mxu0 %vm3532_vm1, %v3533_v14  ;;  %3023 = vmatpush3.msra.mxu0 %v2871_v17 }
 0x604   : > { %3113 = vmatprep.subr.bf16.mxu0 %v3531_v12 }
 0x6d5   : > { %v1445_v1 = vpop.f32.mrb[6].mxu0 }
 0x6d6   : > { %v1449_v2 = vmul.f32 0.35355338, %v1445_v1  ;;  %v3016_v3 = vpop.f32.mrb[7].mxu0  ;;  %v1880_v1 = vshrl.u32 %v1879_v63, 7 }
 0x6d8   : > { %v1450_v4 = vadd.f32 %v1449_v2, %v770_v40  ;;  %v2875_v40 = vld [vmem:[#allocation6] ss:$0 sm:$0xff]  ;;  %v1881_v2 = vsub.s32 0, %v1880_v1  ;;  %v1962_v3 = vsub.s32 1, %v1880_v1 }
 0x6da   : > { %v1451_v5 = vsel %vm990_vm2, %v1450_v4, -inf }
 0x6db   : > { %1452 = vmax.xlane.f32.xlu0 %v1451_v5 }
 0x768   : > { %v1453_v6 = vpop.xlane.xlu0 %1452 }
 0x769   : > { %v1454_v7 = vsub.f32 %v1450_v4, %v1453_v6  ;;  %v1803_v4 = vld [vmem:[%s4180_s9] sm:$0xff]  ;;  %v2043_v6 = vsub.s32 2, %v1880_v1 }
 0x76a   : > { %v1882_v5 = vrot.slane %v1803_v4, %v1881_v2 }
 0x76b   : > { %v1455_v8 = vmul.f32 1.442695, %v1454_v7  ;;  %v2124_v7 = vsub.s32 3, %v1880_v1  ;;  %v2044_v17 = vrot.slane %v1803_v4, %v2043_v6 }
 0x76d   : > { %3230 = vpow2.f32 %v1455_v8 }
 0x777   : > { %v3231_v9 = vpop.eup %3230 }
 0x778   : > { %v1457_v10 = vsel %vm990_vm2, %v3231_v9, 0.0 }
 0x779   : > { %1458 = vadd.xlane.f32.xlu1 %v1457_v10 }
 0x806   : > { %v1459_v11 = vpop.xlane.xlu1 %1458 }
 0x807   : > { %3232 = vrcp.f32 %v1459_v11 }
 0x811   : > { %v3233_v13 = vpop.eup %3232 }
 0x812   : > { %v1461_v15 = vmul.f32 %v3233_v13, %v3231_v9 }
 0x814   : > { %3020 = vmatmul.mubr.msk.f32.vlgmr.msra.gmra.mrb[10].mxu1 %vm990_vm2, %v1461_v15 }
 0x815   : > { %3028 = vmatpush3.msra.mxu1 %v1153_v16  ;;  %3029 = vmatprep.mubr.msk.f32.mxu1 %vm3532_vm1, %v3533_v14  ;;  %v2205_v16 = vsub.s32 4, %v1880_v1 }
 0x816   : > { %3039 = vmatprep.subr.mxu1 %v3533_v14 }
 0x818   : > { %3030 = vmatmul.mubr.msk.f32.vlgmr.msra.gmra.mrb[12].mxu1 %vm990_vm2, %v1149_v60  ;;  %v3117_v60 = vpack.c.bf16 %v2569_v59, %v2568_v58 }
 0x819   : > { %3041 = vmatprep.mubr.msk.f32.mxu1 %vm3532_vm1, %v3533_v14 }
 0x8e7   : > { %v1531_v18 = vpop.f32.mrb[10].mxu1 }
 0x8e8   : > { %v3021_v19 = vpop.f32.mrb[11].mxu1  ;;  %3025 = vmatmul.mubr.msk.f32.vlgmr.msra.gmra.mrb[8].mxu0 %vm990_vm2, %v1531_v18  ;;  %v2125_v18 = vrot.slane %v1803_v4, %v2124_v7 }
 0x8e9   : > { %3036 = vmatprep.mubr.msk.f32.mxu0 %vm3532_vm1, %v3533_v14  ;;  %v2286_v19 = vsub.s32 5, %v1880_v1 }
 0x8eb   : > { %v1679_v20 = vpop.f32.mrb[12].mxu1 }
 0x8ec   : > { %v3031_v21 = vpop.f32.mrb[13].mxu1 }
 0x9bb   : > { %v1606_v22 = vpop.f32.mrb[8].mxu0 }
 0x9bc   : > { %v1680_v23 = vadd.f32 %v1679_v20, %v1606_v22  ;;  %v3026_v24 = vpop.f32.mrb[9].mxu0 }
 0x9bd   : > { %v2367_v24 = vsub.s32 6, %v1880_v1 }
 0x9be   : > { %v1683_v26 = vadd.f32 %v1680_v23, %v3894_v0  ;;  %v1722_v0 = vld [vmem:[%s4136_s12 + $0x8] sm:$0xff]  ;;  %v2206_v23 = vrot.slane %v1803_v4, %v2205_v16 }
 0x9bf   : > { %v3114_v35 = vpack.c.bf16 %v1722_v0, %v1721_v34  ;;  %v2368_v0 = vrot.slane %v1803_v4, %v2367_v24 }
 0x9c0   : > { %v4017_v27 = vadd.f32 %v2874_v25, %v1683_v26 }
 0x9c1   : > { %3115 = vmatpush3.bf16.msra.mxu0 %v3114_v35 }
 0x9c2   : > { %v1694_v28 = vsel %vm741_vm0, %v4017_v27, 0.0  ;;  %3044 = vmatprep.subr.mxu0 %v3533_v14 }
 0x9c3   : > { %1695 = vadd.xlane.f32.xlu0 %v1694_v28 }
 0xa50   : > { %v1696_v29 = vpop.xlane.xlu0 %1695 }
 0xa51   : > { %v1697_v30 = vmul.f32 0.0625, %v1696_v29 }
 0xa53   : > { %v1698_v31 = vsub.f32 %v4017_v27, %v1697_v30  ;;  %v2287_v30 = vrot.slane %v1803_v4, %v2286_v19 }
 0xa55   : > { %v1699_v32 = vmul.f32 %v1698_v31, %v1698_v31 }
 0xa57   : > { %v1700_v33 = vsel %vm741_vm0, %v1699_v32, 0.0 }
 0xa58   : > { %1701 = vadd.xlane.f32.xlu1 %v1700_v33 }
 0xae5   : > { %v1702_v36 = vpop.xlane.xlu1 %1701 }
 0xae6   : > { %v1703_v37 = vmul.f32 0.0625, %v1702_v36 }
 0xae8   : > { %v1704_v38 = vadd.f32 1e-06, %v1703_v37 }
 0xaea   : > { %3234 = vrsqrt.f32 %v1704_v38 }
 0xaf4   : > { %v3235_v39 = vpop.eup %3234 }
 0xaf5   : > { %v1706_v41 = vmul.f32 %v3235_v39, %v1698_v31  ;;  %v2448_v31 = vsub.s32 7, %v1880_v1 }
 0xaf7   : > { %v1713_v43 = vmul.f32 %v2875_v40, %v1706_v41  ;;  %v2449_v40 = vrot.slane %v1803_v4, %v2448_v31 }
 0xaf9   : > { %v1720_v44 = vadd.f32 %v2876_v42, %v1713_v43 }
 0xafb   : > { %3037 = vmatmul.mubr.msk.f32.vlgmr.msra.gmra.mrb[10].mxu0 %vm741_vm0, %v1720_v44 }
 0xafc   : > { %3046 = vmatprep.mubr.msk.f32.mxu0 %vm3532_vm1, %v3533_v14 }
 0xbce   : > { %v1799_v46 = vpop.f32.mrb[10].mxu0 }
 0xbcf   : > { %v1800_v47 = vadd.f32 %v2877_v45, %v1799_v46  ;;  %v3038_v48 = vpop.f32.mrb[11].mxu0 }
 0xbd1   : > { %3040 = vmatpush3.msra.mxu1 %v1800_v47  ;;  %3045 = vmatpush3.msra.mxu0 %v1800_v47 }
 0xbd2   : > { %3042 = vmatmul.mubr.msk.f32.vlgmr.msra.gmra.mrb[14].mxu1 %vm990_vm2, %v1805_v49  ;;  %3047 = vmatmul.mubr.msk.f32.vlgmr.msra.gmra.mrb[12].mxu0 %vm990_vm2, %v2880_v50  ;;  %v2896_v49 = vld [vmem:[%s4180_s9 + $0x8] ss:$0 sm:$0xff] }
 0xbd3   : > { %3049 = vmatprep.subr.mxu1 %v3533_v14  ;;  %3054 = vmatprep.subr.mxu0 %v3533_v14 }
 0xbd4   : > { %3050 = vmatpush3.msra.mxu1 %v1800_v47  ;;  %3055 = vmatpush3.msra.mxu0 %v1800_v47 }
 0xbd5   : > { %3051 = vmatprep.mubr.msk.f32.mxu1 %vm3532_vm1, %v3533_v14  ;;  %3056 = vmatprep.mubr.msk.f32.mxu0 %vm3532_vm1, %v3533_v14 }
 0xbd6   : > { %3059 = vmatprep.subr.mxu1 %v3533_v14  ;;  %3064 = vmatprep.subr.mxu0 %v3533_v14 }
 0xbd7   : > { %3052 = vmatmul.mubr.msk.f32.vlgmr.msra.gmra.mrb[16].mxu1 %vm990_vm2, %v2882_v51  ;;  %3057 = vmatmul.mubr.msk.f32.vlgmr.msra.gmra.mrb[14].mxu0 %vm990_vm2, %v2884_v52 }
 0xbd8   : > { %3060 = vmatpush3.msra.mxu1 %v1800_v47  ;;  %3065 = vmatpush3.msra.mxu0 %v1800_v47 }
 0xbd9   : > { %3061 = vmatprep.mubr.msk.f32.mxu1 %vm3532_vm1, %v3533_v14  ;;  %3066 = vmatprep.mubr.msk.f32.mxu0 %vm3532_vm1, %v3533_v14 }
 0xbda   : > { %3069 = vmatprep.subr.mxu1 %v3533_v14  ;;  %3074 = vmatprep.subr.mxu0 %v3533_v14 }
 0xbdb   : > { %3062 = vmatmul.mubr.msk.f32.vlgmr.msra.gmra.mrb[18].mxu1 %vm990_vm2, %v2886_v53  ;;  %3067 = vmatmul.mubr.msk.f32.vlgmr.msra.gmra.mrb[16].mxu0 %vm990_vm2, %v2888_v54 }
 0xbdc   : > { %3070 = vmatpush3.msra.mxu1 %v1800_v47  ;;  %3075 = vmatpush3.msra.mxu0 %v1800_v47 }
 0xbdd   : > { %3071 = vmatprep.mubr.msk.f32.mxu1 %vm3532_vm1, %v3533_v14  ;;  %3079 = vmatprep.subr.mxu1 %v3533_v14 }
 0xbde   : > { %3076 = vmatprep.mubr.msk.f32.mxu0 %vm3532_vm1, %v3533_v14  ;;  %3116 = vmatprep.subr.bf16.mxu0 %v3531_v12 }
 0xbdf   : > { %3072 = vmatmul.mubr.msk.f32.vlgmr.msra.gmra.mrb[20].mxu1 %vm990_vm2, %v2890_v55  ;;  %3077 = vmatmul.mubr.msk.f32.vlgmr.msra.gmra.mrb[18].mxu0 %vm990_vm2, %v2892_v56  ;;  %v2897_v55 = vld [vmem:[#allocation10] ss:$0 sm:$0xff] }
 0xbe0   : > { %3080 = vmatpush3.msra.mxu1 %v1800_v47  ;;  %3081 = vmatprep.mubr.msk.f32.mxu1 %vm3532_vm1, %v3533_v14 }
 0xbe1   : > { %3092 = vmatprep.mubr.msk.f32.mxu0 %vm3532_vm1, %v3533_v14  ;;  %3118 = vmatpush3.bf16.msra.mxu0 %v3117_v60  ;;  %v2571_v14 = vld [vmem:[%s4140_s16 + $0x18] sm:$0xff] }
 0xbe2   : > { %3119 = vmatprep.subr.bf16.mxu0 %v3531_v12  ;;  %v3120_v62 = vpack.c.bf16 %v2571_v14, %v2570_v61  ;;  %v1963_v12 = vrot.slane %v1803_v4, %v1962_v3 }
 0xbe3   : > { %3082 = vmatmul.mubr.msk.f32.vlgmr.msra.gmra.mrb[22].mxu1 %vm990_vm2, %v2894_v57 }
 0xbe5   : > { %3121 = vmatpush3.bf16.msra.mxu0 %v3120_v62 }
 0xca5   : > { %v1875_v8 = vpop.f32.mrb[14].mxu1  ;;  %v1956_v9 = vpop.f32.mrb[12].mxu0 }
 0xca6   : > { %v1883_v10 = vmul.f32 %v1882_v5, %v1875_v8  ;;  %v1964_v11 = vmul.f32 %v1963_v12, %v1956_v9  ;;  %v3043_v13 = vpop.f32.mrb[15].mxu1  ;;  %v3048_v15 = vpop.f32.mrb[13].mxu0 }
 0xca8   : > { %v1965_v20 = vadd.f32 %v1964_v11, %v1883_v10 }
 0xcaa   : > { %v2037_v21 = vpop.f32.mrb[16].mxu1  ;;  %v2118_v22 = vpop.f32.mrb[14].mxu0 }
 0xcab   : > { %v2045_v25 = vmul.f32 %v2044_v17, %v2037_v21  ;;  %v2126_v26 = vmul.f32 %v2125_v18, %v2118_v22  ;;  %v3053_v28 = vpop.f32.mrb[17].mxu1  ;;  %v3058_v29 = vpop.f32.mrb[15].mxu0  ;;  %v2899_v21 = vld [vmem:[#allocation12] ss:$0 sm:$0xff] }
 0xcad   : > { %v2046_v32 = vadd.f32 %v2045_v25, %v1965_v20 }
 0xcae   : > { %v2199_v33 = vpop.f32.mrb[18].mxu1  ;;  %v2280_v34 = vpop.f32.mrb[16].mxu0 }
 0xcaf   : > { %v2127_v35 = vadd.f32 %v2126_v26, %v2046_v32  ;;  %v2207_v36 = vmul.f32 %v2206_v23, %v2199_v33  ;;  %v2288_v37 = vmul.f32 %v2287_v30, %v2280_v34  ;;  %v3063_v38 = vpop.f32.mrb[19].mxu1  ;;  %v3068_v39 = vpop.f32.mrb[17].mxu0 }
 0xcb1   : > { %v2208_v41 = vadd.f32 %v2207_v36, %v2127_v35  ;;  %v2900_v35 = vld [vmem:[#allocation13] ss:$0 sm:$0xff]  ;;  %v2901_v36 = vld [vmem:[#allocation15] ss:$0 sm:$0xff] }
 0xcb2   : > { %v2361_v42 = vpop.f32.mrb[20].mxu1  ;;  %v2442_v43 = vpop.f32.mrb[18].mxu0 }
 0xcb3   : > { %v2289_v44 = vadd.f32 %v2288_v37, %v2208_v41  ;;  %v2369_v45 = vmul.f32 %v2368_v0, %v2361_v42  ;;  %v2450_v46 = vmul.f32 %v2449_v40, %v2442_v43  ;;  %v3073_v47 = vpop.f32.mrb[21].mxu1  ;;  %v3078_v48 = vpop.f32.mrb[19].mxu0 }
 0xcb5   : > { %v2370_v50 = vadd.f32 %v2369_v45, %v2289_v44 }
 0xcb6   : > { %v2523_v51 = vpop.f32.mrb[22].mxu1 }
 0xcb7   : > { %v2451_v52 = vadd.f32 %v2450_v46, %v2370_v50  ;;  %v2531_v53 = vmul.f32 %v2896_v49, %v2523_v51  ;;  %v3083_v54 = vpop.f32.mrb[23].mxu1 }
 0xcb9   : > { %v2532_v56 = vadd.f32 %v2531_v53, %v2451_v52 }
 0xcbb   : > { %v2540_v57 = vadd.f32 %v2897_v55, %v2532_v56 }
 0xcbd   : > { %v2542_v58 = vmul.f32 0.70710677, %v2540_v57  ;;  %v2541_v17 = vmul.f32 0.5, %v2540_v57 }
 0xcbf   : > { %v2543_v59 = vand.u32 2147483647, %v2542_v58  ;;  %vm2563_vm3 = vcmp.ge.f32.partialorder %v2542_v58, 0.0 }
 0xcc1   : > { %v2544_v60 = vmul.f32 0.3275911, %v2543_v59  ;;  %v2557_v14 = vsub.f32 0.0, %v2543_v59 }
 0xcc3   : > { %v2545_v61 = vadd.f32 1.0, %v2544_v60  ;;  %v2558_v63 = vmul.f32 %v2557_v14, %v2543_v59 }
 0xcc5   : > { %3236 = vrcp.f32 %v2545_v61  ;;  %v2559_v3 = vmul.f32 1.442695, %v2558_v63 }
 0xcc7   : > { %3238 = vpow2.f32 %v2559_v3 }
 0xccf   : > { %v3237_v62 = vpop.eup %3236 }
 0xcd0   : > { %v2548_v1 = vmul.f32 1.0614054, %v3237_v62 }
 0xcd1   : > { %v3239_v10 = vpop.eup %3238 }
 0xcd2   : > { %v2549_v2 = vadd.f32 -1.4531521, %v2548_v1 }
 0xcd4   : > { %v2550_v4 = vmul.f32 %v3237_v62, %v2549_v2 }
 0xcd6   : > { %v2551_v5 = vadd.f32 1.4214138, %v2550_v4 }
 0xcd8   : > { %v2552_v12 = vmul.f32 %v3237_v62, %v2551_v5 }
 0xcda   : > { %v2553_v6 = vadd.f32 -0.28449672, %v2552_v12 }
 0xcdc   : > { %v2554_v7 = vmul.f32 %v3237_v62, %v2553_v6 }
 0xcde   : > { %v2555_v8 = vadd.f32 0.2548296, %v2554_v7 }
 0xce0   : > { %v2556_v9 = vmul.f32 %v3237_v62, %v2555_v8 }
 0xce2   : > { %v2561_v11 = vmul.f32 %v3239_v10, %v2556_v9 }
 0xce4   : > { %v2562_v13 = vsub.f32 1.0, %v2561_v11 }
 0xce6   : > { %v2564_v15 = vsub.f32 0.0, %v2562_v13 }
 0xce8   : > { %v2565_v16 = vsel %vm2563_vm3, %v2562_v13, %v2564_v15 }
 0xce9   : > { %v2566_v18 = vadd.f32 1.0, %v2565_v16 }
 0xceb   : > { %v2567_v19 = vmul.f32 %v2566_v18, %v2541_v17 }
 0xced   : > { %3093 = vmatmul.mubr.msk.f32.vlgmr.msra.gmra.mrb[20].mxu0 %vm2572_vm4, %v2567_v19 }
 0xdc0   : > { %v2642_v20 = vpop.f32.mrb[20].mxu0 }
 0xdc1   : > { %v2646_v22 = vadd.f32 %v2642_v20, %v4017_v27  ;;  %v3094_v23 = vpop.f32.mrb[21].mxu0 }
 0xdc3   : > { %v2654_v24 = vadd.f32 %v2899_v21, %v2646_v22 }
 0xdc5   : > { %v2657_v25 = vsel %vm741_vm0, %v2654_v24, 0.0 }
 0xdc6   : > { %2658 = vadd.xlane.f32.xlu0 %v2657_v25 }
 0xe53   : > { %v2659_v26 = vpop.xlane.xlu0 %2658 }
 0xe54   : > { %v2660_v28 = vmul.f32 0.0625, %v2659_v26 }
 0xe56   : > { %v2661_v29 = vsub.f32 %v2654_v24, %v2660_v28 }
 0xe58   : > { %v2662_v30 = vmul.f32 %v2661_v29, %v2661_v29 }
 0xe5a   : > { %v2663_v31 = vsel %vm741_vm0, %v2662_v30, 0.0 }
 0xe5b   : > { %2664 = vadd.xlane.f32.xlu1 %v2663_v31 }
 0xee8   : > { %v2665_v32 = vpop.xlane.xlu1 %2664 }
 0xee9   : > { %v2666_v33 = vmul.f32 0.0625, %v2665_v32 }
 0xeeb   : > { %v2667_v34 = vadd.f32 1e-06, %v2666_v33 }
 0xeed   : > { %3240 = vrsqrt.f32 %v2667_v34 }
 0xef7   : > { %v3241_v0 = vpop.eup %3240 }
 0xef8   : > { %v2669_v27 = vmul.f32 %v3241_v0, %v2661_v29 }
 0xefa   : > { %v2676_v37 = vmul.f32 %v2900_v35, %v2669_v27 }
 0xefc   : > { %v2683_v38 = vadd.f32 %v2901_v36, %v2676_v37 }
 0xefe   : > { %2684 = vst.msk [vmem:[%s737_s27] sm:$0xff] %vm741_vm0, %v2683_v38 }
 0xeff PF: > { %s4182_s3 = sld [smem:[#allocation21_spill]] }
 0xf05   : > { %s35_s1 = sadd.s32 1, %s4182_s3  }
 0xf06   : > { %p32_p13 = scmp.ge.s32.totalorder %s35_s1, 4  }
 0xf08   :  { %34 = sbr.rel (!%p32_p13) target bundleno = 14 (0xe), region = 179 }
 0xf0f   :  { %2704 = vsyncpa [#allocation3], 1 }
 0xf10   :  { %2706 = vsyncpa [#allocation3 + $0x1], 1 }
 0xf11   :  { %2707 = vsyncpa [#allocation5], 1 }
 0xf12   :  { %2708 = vsyncpa [#allocation8], 1 }
 0xf13   :  { %2709 = vsyncpa [#allocation11], 1 }
 0xf14   :  { %2710 = vsyncpa [#allocation14], 1 }

</bundles_post_ra>
